<compile_context>
chip_gen: v7x
topology: tpu7x:2x2x1
jax: 0.10.0
libtpu: 0.0.40
codegen_flags: <defaults>
</compile_context>

<pallas_src>
import math
import functools

import jax
import jax.numpy as jnp
from jax.experimental import pallas as pl
from jax.experimental.pallas import tpu as pltpu


MATMUL_DTYPE = jnp.float32   # set to jnp.bfloat16 for bf16 MXU operands (v6e/v7x)


def _mm(a, b):
    """2-D matmul a @ b with f32 accumulation (operands optionally bf16)."""
    return jnp.dot(a.astype(MATMUL_DTYPE), b.astype(MATMUL_DTYPE),
                   preferred_element_type=jnp.float32)


def _mm_nt(a, b):
    """a @ b.T (contract last dims of both) with f32 accumulation."""
    return jax.lax.dot_general(
        a.astype(MATMUL_DTYPE), b.astype(MATMUL_DTYPE),
        dimension_numbers=(((1,), (1,)), ((), ())),
        preferred_element_type=jnp.float32)


# ------------------------------------------------------------------ kernel --

def _fused_kernel(*refs, B, T, Nobj, Nbody, S, H, num_heads, num_layers, L_pad):
    (st_ref, bt_ref, wd_ref, add_ref, bias_ref,
     co_w1, co_b1, co_w2, co_b2,          # fc_cast_obj   (dim_adjust folded)
     cb_w1, cb_b1, cb_w2, cb_b2,          # fc_cast_body  (dim_adjust folded)
     cw_w1, cw_b1, cw_w2, cw_b2,          # fc_cast_words (dim_adjust folded)
     wqkv_ref, bqkv_ref, wo_ref, bo_ref,  # stacked per-layer attention params
     ff_w1_ref, ff_b1_ref, ff_w2_ref, ff_b2_ref,
     g1_ref, be1_ref, g2_ref, be2_ref,    # stacked per-layer LayerNorm params
     gf_ref, bef_ref,                     # final encoder LayerNorm
     ho_w1_ref, ho_b1_ref, ho_w2_ref, ho_b2_ref,   # fc_out head
     out_ref, x_ref) = refs               # output + VMEM scratch

    TN = T * Nobj
    TB = T * Nbody
    Ntok = TN + TB + S
    L = Ntok + 1                          # + learned query token
    dh = H // num_heads

    def ffw(x, w1, b1, w2, b2):           # Feedforward: Linear -> ReLU -> Linear
        h = jnp.maximum(_mm(x, w1[...]) + b1[...], 0.0)
        return _mm(h, w2[...]) + b2[...]

    def layernorm(z, g, b):
        mu = jnp.mean(z, axis=-1, keepdims=True)
        var = jnp.mean(jnp.square(z - mu), axis=-1, keepdims=True)
        return (z - mu) * jax.lax.rsqrt(var + 1e-5) * g + b

    # ---- input cast FFNs (dim_adjust projection pre-folded into w2/b2) ------
    st = ffw(st_ref[...], co_w1, co_b1, co_w2, co_b2)      # (B*TN, H)
    bt = ffw(bt_ref[...], cb_w1, cb_b1, cb_w2, cb_b2)      # (B*TB, H)
    wd = ffw(wd_ref[...], cw_w1, cw_b1, cw_w2, cw_b2)      # (B*S,  H)

    # ---- assemble the padded (B*L_pad, H) token slab in VMEM scratch --------
    x_ref[...] = jnp.zeros_like(x_ref)                     # query / pad rows
    for b in range(B):
        base = b * L_pad
        x_ref[pl.ds(base, TN), :] = st[b * TN:(b + 1) * TN, :]
        x_ref[pl.ds(base + TN, TB), :] = bt[b * TB:(b + 1) * TB, :]
        x_ref[pl.ds(base + TN + TB, S), :] = wd[b * S:(b + 1) * S, :]
    # add_ref carries PE + modality one-hot + dim_adjust bias + query token.
    x2 = x_ref[...] + add_ref[...]                          # (B*L_pad, H)

    bias = bias_ref[...]        # additive mask: 0 valid / -1e30 cross-batch|pad

    # ---- num_layers x post-LN TransformerEncoderLayer (ReLU FFN) ------------
    for l in range(num_layers):
        qkv = _mm(x2, wqkv_ref[l]) + bqkv_ref[l]            # (B*L_pad, 3H)
        wo_l = wo_ref[l]                                    # (H, H)
        attn = bo_ref[l]                                    # (1, H) -> broadcast
        for h in range(num_heads):
            c = h * dh
            q_h = qkv[:, c:c + dh]            # 1/sqrt(dh) pre-folded into W_q/b_q
            k_h = qkv[:, H + c:H + c + dh]
            v_h = qkv[:, 2 * H + c:2 * H + c + dh]
            # Scores over the whole (B*L_pad) slab; the additive bias masks
            # cross-batch and padded key columns (O(B^2) waste, fine at B=2).
            s = _mm_nt(q_h, k_h) + bias                     # (B*L_pad, B*L_pad)
            s = s - jnp.max(s, axis=-1, keepdims=True)
            p = jnp.exp(s)
            p = p / jnp.sum(p, axis=-1, keepdims=True)      # exact softmax
            o_h = _mm(p, v_h)                               # (B*L_pad, dh)
            # Fold the head straight into its sublane-aligned W_o row block.
            attn = attn + _mm(o_h, wo_l[c:c + dh, :])
        y = layernorm(x2 + attn, g1_ref[l], be1_ref[l])
        ff = jnp.maximum(_mm(y, ff_w1_ref[l]) + ff_b1_ref[l], 0.0)
        ff = _mm(ff, ff_w2_ref[l]) + ff_b2_ref[l]
        x2 = layernorm(y + ff, g2_ref[l], be2_ref[l])

    # ---- final encoder LayerNorm + fc_out head + sigmoid (query token) ------
    x_ref[...] = x2                                         # residual -> scratch
    last = jnp.concatenate(
        [x_ref[pl.ds(b * L_pad + L - 1, 1), :] for b in range(B)], axis=0)  # (B, H)
    y = layernorm(last, gf_ref[...], bef_ref[...])
    z = jnp.maximum(_mm(y, ho_w1_ref[...]) + ho_b1_ref[...], 0.0)
    z = _mm(z, ho_w2_ref[...]) + ho_b2_ref[...]
    out_ref[...] = jax.nn.sigmoid(z)


# ------------------------------------------------------------------ wrapper --

def _full_block_spec(a):
    nd = a.ndim

    def idx_map(i):
        return (0,) * nd

    return pl.BlockSpec(a.shape, idx_map)


@functools.partial(jax.jit, static_argnames=("num_heads",))
def transformer_ut_forward(params, state_trace, body_trace, description, *,
                           num_heads):
    B, T, Nobj, obj_size = state_trace.shape
    _, _, Nbody, body_size = body_trace.shape
    _, S, voc_size = description.shape
    H = params['query'].shape[-1]
    num_layers = int(params['wqkv'].shape[0])
    dh = H // num_heads

    TN, TB = T * Nobj, T * Nbody
    Ls = TN + TB
    Ntok = Ls + S
    L = Ntok + 1                               # + learned query token
    L_pad = ((L + 7) // 8) * 8                 # pad tokens to a sublane multiple

    # pure layout flattening (no compute)
    st2 = state_trace.reshape(B * TN, obj_size)
    bt2 = body_trace.reshape(B * TB, body_size)
    wd2 = description.reshape(B * S, voc_size)

    # --- host-side parameter folding (exact compositions of linears) --------
    wp, bp = params['dim_adjust']              # (H+2, H), (1, H)
    wpm = wp[:H]

    (co_w1, co_b1), (co_w2, co_b2) = params['fc_cast_obj']
    (cb_w1, cb_b1), (cb_w2, cb_b2) = params['fc_cast_body']
    (cw_w1, cw_b1), (cw_w2, cw_b2) = params['fc_cast_words']
    # fold the dim_adjust projection into the 2nd linear of each cast FFN
    co_w2, co_b2 = co_w2 @ wpm, co_b2 @ wpm
    cb_w2, cb_b2 = cb_w2 @ wpm, cb_b2 @ wpm
    cw_w2, cw_b2 = cw_w2 @ wpm, cw_b2 @ wpm

    # fold 1/sqrt(dh) into the Q columns of the packed QKV projection
    scale = 1.0 / math.sqrt(dh)
    wqkv = params['wqkv'].at[:, :, :H].multiply(scale)
    bqkv = params['bqkv'].at[:, :, :H].multiply(scale)

    # PE + modality one-hot + dim_adjust bias + learned query token -> one
    # additive per-token term (query row = query param, pad rows = 0).
    pe = params['pe']
    pe_tok = jnp.concatenate([jnp.repeat(pe[:T], Nobj, axis=0),
                              jnp.repeat(pe[:T], Nbody, axis=0),
                              pe[:S]], axis=0)                        # (Ntok, H)
    oh_tok = jnp.concatenate([jnp.broadcast_to(wp[H:H + 1], (Ls, H)),
                              jnp.broadcast_to(wp[H + 1:H + 2], (S, H))], axis=0)
    addblk = jnp.concatenate([pe_tok @ wpm + oh_tok + bp,
                              params['query'],
                              jnp.zeros((L_pad - L, H), jnp.float32)], axis=0)
    addfull = jnp.tile(addblk, (B, 1))                                # (B*L_pad, H)

    # additive attention bias: 0 for same-batch valid keys, -1e30 otherwise
    valid_k = jnp.tile(jnp.arange(L_pad) < L, (B,))
    batch_id = jnp.repeat(jnp.arange(B), L_pad)
    attn_bias = jnp.where(
        (batch_id[:, None] == batch_id[None, :]) & valid_k[None, :],
        0.0, -1e30).astype(jnp.float32)                               # (B*L_pad, B*L_pad)

    gf, bef = params['final_norm']
    (ho_w1, ho_b1), (ho_w2, ho_b2) = params['fc_out']

    args = (st2, bt2, wd2, addfull, attn_bias,
            co_w1, co_b1, co_w2, co_b2,
            cb_w1, cb_b1, cb_w2, cb_b2,
            cw_w1, cw_b1, cw_w2, cw_b2,
            wqkv, bqkv, params['wo'], params['bo'],
            params['w1'], params['b1'], params['w2'], params['b2'],
            params['g1'], params['be1'], params['g2'], params['be2'],
            gf, bef, ho_w1, ho_b1, ho_w2, ho_b2)

    kernel = functools.partial(
        _fused_kernel, B=B, T=T, Nobj=Nobj, Nbody=Nbody, S=S, H=H,
        num_heads=num_heads, num_layers=num_layers, L_pad=L_pad)

    # Single grid step: the whole model (~100 KB) is VMEM-resident.
    # TODO(synk): on v7x add a leading "parallel" batch grid axis once B grows
    #   (both TensorCores get work), and when H/num_layers grow move the layer
    #   loop onto an "arbitrary" grid axis with per-layer BlockSpecs on the
    #   stacked weights (index_map -> (l, 0, 0)) + vmem_limit_bytes so weight
    #   DMAs are double-buffered instead of all-resident.
    return pl.pallas_call(
        kernel,
        out_shape=jax.ShapeDtypeStruct((B, 1), jnp.float32),
        grid=(1,),
        in_specs=[_full_block_spec(a) for a in args],
        out_specs=pl.BlockSpec((B, 1), lambda i: (0, 0)),
        scratch_shapes=[pltpu.VMEM((B * L_pad, H), jnp.float32)],
        compiler_params=pltpu.CompilerParams(
            dimension_semantics=("arbitrary",)),
    )(*args)


# --------------------------------------------------------------------- init --

def make_pe(max_len, d_model):
    position = jnp.arange(max_len, dtype=jnp.float32)[:, None]
    div_term = jnp.exp(jnp.arange(0, d_model, 2, dtype=jnp.float32)
                       * (-math.log(10000.0) / d_model))
    ang = position * div_term
    pe = jnp.zeros((max_len, d_model), jnp.float32)
    pe = pe.at[:, 0::2].set(jnp.sin(ang))
    pe = pe.at[:, 1::2].set(jnp.cos(ang))
    return pe


def init_params(key, body_size, obj_size, voc_size, hidden_size, num_layers,
                max_len=64):
    H = hidden_size
    keys = iter(jax.random.split(key, 16 + 12 * num_layers))

    def lin(din, dout):
        k1, k2 = jax.random.split(next(keys))
        lim = 1.0 / math.sqrt(din)
        return (jax.random.uniform(k1, (din, dout), jnp.float32, -lim, lim),
                jax.random.uniform(k2, (1, dout), jnp.float32, -lim, lim))

    params = {
        'fc_cast_body': [lin(body_size, H), lin(H, H)],
        'fc_cast_obj': [lin(obj_size, H), lin(H, H)],
        'fc_cast_words': [lin(voc_size, H), lin(H, H)],
        'dim_adjust': lin(H + 2, H),
        'fc_out': [lin(H, H), lin(H, 1)],
        'query': jnp.zeros((1, H), jnp.float32),     # nn.Parameter(torch.zeros(H))
        'pe': make_pe(max_len, H),
        'final_norm': (jnp.ones((1, H), jnp.float32),
                       jnp.zeros((1, H), jnp.float32)),
    }

    wqkv, bqkv, wo, bo, w1, b1, w2, b2 = ([] for _ in range(8))
    for _ in range(num_layers):
        (wq, bq), (wk, bk), (wv, bv) = lin(H, H), lin(H, H), lin(H, H)
        wqkv.append(jnp.concatenate([wq, wk, wv], axis=1))   # packed in-proj
        bqkv.append(jnp.concatenate([bq, bk, bv], axis=1))
        for lst_w, lst_b in ((wo, bo), (w1, b1), (w2, b2)):
            w, b = lin(H, H)                                 # dim_ff == hidden
            lst_w.append(w)
            lst_b.append(b)
    params.update(
        wqkv=jnp.stack(wqkv), bqkv=jnp.stack(bqkv),
        wo=jnp.stack(wo), bo=jnp.stack(bo),
        w1=jnp.stack(w1), b1=jnp.stack(b1),
        w2=jnp.stack(w2), b2=jnp.stack(b2),
        g1=jnp.ones((num_layers, 1, H), jnp.float32),
        be1=jnp.zeros((num_layers, 1, H), jnp.float32),
        g2=jnp.ones((num_layers, 1, H), jnp.float32),
        be2=jnp.zeros((num_layers, 1, H), jnp.float32),
    )
    return params


# --------------------------------------------------------------------- main --

if __name__ == "__main__":
    B, T, Nobj, S = 2, 4, 3, 6
    body_size, obj_size, voc_size = 6, 5, 10
    hidden_size, num_heads, num_layers = 32, 4, 2

    key = jax.random.PRNGKey(0)
    kp, k1, k2, k3 = jax.random.split(key, 4)
    params = init_params(kp, body_size, obj_size, voc_size, hidden_size,
                         num_layers)

    state_trace = jax.random.normal(k1, (B, T, Nobj, obj_size), jnp.float32)
    body_trace = jax.random.normal(k2, (B, T, 1, body_size), jnp.float32)
    description = jax.random.normal(k3, (B, S, voc_size), jnp.float32)

    out = transformer_ut_forward(params, state_trace, body_trace, description,
                                 num_heads=num_heads)
    out = jax.block_until_ready(out)
    assert out.shape == (B, 1)
    assert bool(jnp.all(jnp.isfinite(out)))
    print("KERNEL_OK")
</pallas_src>

<mosaic_0001>
module attributes {stable_mosaic.version = 11 : i64} {
  func.func @_fused_kernel(%arg0: i32, %arg1: memref<24x5xf32, #tpu.memory_space<vmem>>, %arg2: memref<8x6xf32, #tpu.memory_space<vmem>>, %arg3: memref<12x10xf32, #tpu.memory_space<vmem>>, %arg4: memref<48x32xf32, #tpu.memory_space<vmem>>, %arg5: memref<48x48xf32, #tpu.memory_space<vmem>>, %arg6: memref<5x32xf32, #tpu.memory_space<vmem>>, %arg7: memref<1x32xf32, #tpu.memory_space<vmem>>, %arg8: memref<32x32xf32, #tpu.memory_space<vmem>>, %arg9: memref<1x32xf32, #tpu.memory_space<vmem>>, %arg10: memref<6x32xf32, #tpu.memory_space<vmem>>, %arg11: memref<1x32xf32, #tpu.memory_space<vmem>>, %arg12: memref<32x32xf32, #tpu.memory_space<vmem>>, %arg13: memref<1x32xf32, #tpu.memory_space<vmem>>, %arg14: memref<10x32xf32, #tpu.memory_space<vmem>>, %arg15: memref<1x32xf32, #tpu.memory_space<vmem>>, %arg16: memref<32x32xf32, #tpu.memory_space<vmem>>, %arg17: memref<1x32xf32, #tpu.memory_space<vmem>>, %arg18: memref<2x32x96xf32, #tpu.memory_space<vmem>>, %arg19: memref<2x1x96xf32, #tpu.memory_space<vmem>>, %arg20: memref<2x32x32xf32, #tpu.memory_space<vmem>>, %arg21: memref<2x1x32xf32, #tpu.memory_space<vmem>>, %arg22: memref<2x32x32xf32, #tpu.memory_space<vmem>>, %arg23: memref<2x1x32xf32, #tpu.memory_space<vmem>>, %arg24: memref<2x32x32xf32, #tpu.memory_space<vmem>>, %arg25: memref<2x1x32xf32, #tpu.memory_space<vmem>>, %arg26: memref<2x1x32xf32, #tpu.memory_space<vmem>>, %arg27: memref<2x1x32xf32, #tpu.memory_space<vmem>>, %arg28: memref<2x1x32xf32, #tpu.memory_space<vmem>>, %arg29: memref<2x1x32xf32, #tpu.memory_space<vmem>>, %arg30: memref<1x32xf32, #tpu.memory_space<vmem>>, %arg31: memref<1x32xf32, #tpu.memory_space<vmem>>, %arg32: memref<32x32xf32, #tpu.memory_space<vmem>>, %arg33: memref<1x32xf32, #tpu.memory_space<vmem>>, %arg34: memref<32x1xf32, #tpu.memory_space<vmem>>, %arg35: memref<1x1xf32, #tpu.memory_space<vmem>>, %arg36: memref<2x1xf32, #tpu.memory_space<vmem>>, %arg37: memref<48x32xf32, #tpu.memory_space<vmem>>) attributes {dimension_semantics = [#tpu.dimension_semantics<arbitrary>], iteration_bounds = array<i64: 1>, scalar_prefetch = 0 : i64, scratch_operands = 1 : i64, tpu.core_type = #tpu.core_type<tc>, window_params = [{pipeline_mode = #tpu.pipeline_mode<synchronous>, transform_indices = @transform_0, window_bounds = array<i64: 24, 5>}, {pipeline_mode = #tpu.pipeline_mode<synchronous>, transform_indices = @transform_1, window_bounds = array<i64: 8, 6>}, {pipeline_mode = #tpu.pipeline_mode<synchronous>, transform_indices = @transform_2, window_bounds = array<i64: 12, 10>}, {pipeline_mode = #tpu.pipeline_mode<synchronous>, transform_indices = @transform_3, window_bounds = array<i64: 48, 32>}, {pipeline_mode = #tpu.pipeline_mode<synchronous>, transform_indices = @transform_4, window_bounds = array<i64: 48, 48>}, {pipeline_mode = #tpu.pipeline_mode<synchronous>, transform_indices = @transform_5, window_bounds = array<i64: 5, 32>}, {pipeline_mode = #tpu.pipeline_mode<synchronous>, transform_indices = @transform_6, window_bounds = array<i64: 1, 32>}, {pipeline_mode = #tpu.pipeline_mode<synchronous>, transform_indices = @transform_7, window_bounds = array<i64: 32, 32>}, {pipeline_mode = #tpu.pipeline_mode<synchronous>, transform_indices = @transform_8, window_bounds = array<i64: 1, 32>}, {pipeline_mode = #tpu.pipeline_mode<synchronous>, transform_indices = @transform_9, window_bounds = array<i64: 6, 32>}, {pipeline_mode = #tpu.pipeline_mode<synchronous>, transform_indices = @transform_10, window_bounds = array<i64: 1, 32>}, {pipeline_mode = #tpu.pipeline_mode<synchronous>, transform_indices = @transform_11, window_bounds = array<i64: 32, 32>}, {pipeline_mode = #tpu.pipeline_mode<synchronous>, transform_indices = @transform_12, window_bounds = array<i64: 1, 32>}, {pipeline_mode = #tpu.pipeline_mode<synchronous>, transform_indices = @transform_13, window_bounds = array<i64: 10, 32>}, {pipeline_mode = #tpu.pipeline_mode<synchronous>, transform_indices = @transform_14, window_bounds = array<i64: 1, 32>}, {pipeline_mode = #tpu.pipeline_mode<synchronous>, transform_indices = @transform_15, window_bounds = array<i64: 32, 32>}, {pipeline_mode = #tpu.pipeline_mode<synchronous>, transform_indices = @transform_16, window_bounds = array<i64: 1, 32>}, {pipeline_mode = #tpu.pipeline_mode<synchronous>, transform_indices = @transform_17, window_bounds = array<i64: 2, 32, 96>}, {pipeline_mode = #tpu.pipeline_mode<synchronous>, transform_indices = @transform_18, window_bounds = array<i64: 2, 1, 96>}, {pipeline_mode = #tpu.pipeline_mode<synchronous>, transform_indices = @transform_19, window_bounds = array<i64: 2, 32, 32>}, {pipeline_mode = #tpu.pipeline_mode<synchronous>, transform_indices = @transform_20, window_bounds = array<i64: 2, 1, 32>}, {pipeline_mode = #tpu.pipeline_mode<synchronous>, transform_indices = @transform_21, window_bounds = array<i64: 2, 32, 32>}, {pipeline_mode = #tpu.pipeline_mode<synchronous>, transform_indices = @transform_22, window_bounds = array<i64: 2, 1, 32>}, {pipeline_mode = #tpu.pipeline_mode<synchronous>, transform_indices = @transform_23, window_bounds = array<i64: 2, 32, 32>}, {pipeline_mode = #tpu.pipeline_mode<synchronous>, transform_indices = @transform_24, window_bounds = array<i64: 2, 1, 32>}, {pipeline_mode = #tpu.pipeline_mode<synchronous>, transform_indices = @transform_25, window_bounds = array<i64: 2, 1, 32>}, {pipeline_mode = #tpu.pipeline_mode<synchronous>, transform_indices = @transform_26, window_bounds = array<i64: 2, 1, 32>}, {pipeline_mode = #tpu.pipeline_mode<synchronous>, transform_indices = @transform_27, window_bounds = array<i64: 2, 1, 32>}, {pipeline_mode = #tpu.pipeline_mode<synchronous>, transform_indices = @transform_28, window_bounds = array<i64: 2, 1, 32>}, {pipeline_mode = #tpu.pipeline_mode<synchronous>, transform_indices = @transform_29, window_bounds = array<i64: 1, 32>}, {pipeline_mode = #tpu.pipeline_mode<synchronous>, transform_indices = @transform_30, window_bounds = array<i64: 1, 32>}, {pipeline_mode = #tpu.pipeline_mode<synchronous>, transform_indices = @transform_31, window_bounds = array<i64: 32, 32>}, {pipeline_mode = #tpu.pipeline_mode<synchronous>, transform_indices = @transform_32, window_bounds = array<i64: 1, 32>}, {pipeline_mode = #tpu.pipeline_mode<synchronous>, transform_indices = @transform_33, window_bounds = array<i64: 32, 1>}, {pipeline_mode = #tpu.pipeline_mode<synchronous>, transform_indices = @transform_34, window_bounds = array<i64: 1, 1>}, {pipeline_mode = #tpu.pipeline_mode<synchronous>, transform_indices = @transform_35, window_bounds = array<i64: 2, 1>}]} {
    %c0 = arith.constant 0 : index
    %c0_0 = arith.constant 0 : index
    %0 = vector.load %arg1[%c0, %c0_0] : memref<24x5xf32, #tpu.memory_space<vmem>>, vector<24x5xf32>
    %c0_1 = arith.constant 0 : index
    %c0_2 = arith.constant 0 : index
    %1 = vector.load %arg6[%c0_1, %c0_2] : memref<5x32xf32, #tpu.memory_space<vmem>>, vector<5x32xf32>
    %cst = arith.constant dense<0.000000e+00> : vector<24x32xf32>
    %2 = tpu.matmul %0, %1, %cst {dimension_numbers = #tpu.dot_dimension_numbers<[1], [0], [0], [1], [0, 0, 1, 1], [], []>} : vector<24x5xf32>, vector<5x32xf32>, vector<24x32xf32> -> vector<24x32xf32>
    %c0_3 = arith.constant 0 : index
    %c0_4 = arith.constant 0 : index
    %3 = vector.load %arg7[%c0_3, %c0_4] : memref<1x32xf32, #tpu.memory_space<vmem>>, vector<1x32xf32>
    %4 = vector.broadcast %3 : vector<1x32xf32> to vector<24x32xf32>
    %5 = arith.addf %2, %4 : vector<24x32xf32>
    %cst_5 = arith.constant 0.000000e+00 : f32
    %6 = vector.broadcast %cst_5 : f32 to vector<24x32xf32>
    %7 = arith.maximumf %5, %6 : vector<24x32xf32>
    %c0_6 = arith.constant 0 : index
    %c0_7 = arith.constant 0 : index
    %8 = vector.load %arg8[%c0_6, %c0_7] : memref<32x32xf32, #tpu.memory_space<vmem>>, vector<32x32xf32>
    %cst_8 = arith.constant dense<0.000000e+00> : vector<24x32xf32>
    %9 = tpu.matmul %7, %8, %cst_8 {dimension_numbers = #tpu.dot_dimension_numbers<[1], [0], [0], [1], [0, 0, 1, 1], [], []>} : vector<24x32xf32>, vector<32x32xf32>, vector<24x32xf32> -> vector<24x32xf32>
    %c0_9 = arith.constant 0 : index
    %c0_10 = arith.constant 0 : index
    %10 = vector.load %arg9[%c0_9, %c0_10] : memref<1x32xf32, #tpu.memory_space<vmem>>, vector<1x32xf32>
    %11 = vector.broadcast %10 : vector<1x32xf32> to vector<24x32xf32>
    %12 = arith.addf %9, %11 : vector<24x32xf32>
    %c0_11 = arith.constant 0 : index
    %c0_12 = arith.constant 0 : index
    %13 = vector.load %arg2[%c0_11, %c0_12] : memref<8x6xf32, #tpu.memory_space<vmem>>, vector<8x6xf32>
    %c0_13 = arith.constant 0 : index
    %c0_14 = arith.constant 0 : index
    %14 = vector.load %arg10[%c0_13, %c0_14] : memref<6x32xf32, #tpu.memory_space<vmem>>, vector<6x32xf32>
    %cst_15 = arith.constant dense<0.000000e+00> : vector<8x32xf32>
    %15 = tpu.matmul %13, %14, %cst_15 {dimension_numbers = #tpu.dot_dimension_numbers<[1], [0], [0], [1], [0, 0, 1, 1], [], []>} : vector<8x6xf32>, vector<6x32xf32>, vector<8x32xf32> -> vector<8x32xf32>
    %c0_16 = arith.constant 0 : index
    %c0_17 = arith.constant 0 : index
    %16 = vector.load %arg11[%c0_16, %c0_17] : memref<1x32xf32, #tpu.memory_space<vmem>>, vector<1x32xf32>
    %17 = vector.broadcast %16 : vector<1x32xf32> to vector<8x32xf32>
    %18 = arith.addf %15, %17 : vector<8x32xf32>
    %cst_18 = arith.constant 0.000000e+00 : f32
    %19 = vector.broadcast %cst_18 : f32 to vector<8x32xf32>
    %20 = arith.maximumf %18, %19 : vector<8x32xf32>
    %c0_19 = arith.constant 0 : index
    %c0_20 = arith.constant 0 : index
    %21 = vector.load %arg12[%c0_19, %c0_20] : memref<32x32xf32, #tpu.memory_space<vmem>>, vector<32x32xf32>
    %cst_21 = arith.constant dense<0.000000e+00> : vector<8x32xf32>
    %22 = tpu.matmul %20, %21, %cst_21 {dimension_numbers = #tpu.dot_dimension_numbers<[1], [0], [0], [1], [0, 0, 1, 1], [], []>} : vector<8x32xf32>, vector<32x32xf32>, vector<8x32xf32> -> vector<8x32xf32>
    %c0_22 = arith.constant 0 : index
    %c0_23 = arith.constant 0 : index
    %23 = vector.load %arg13[%c0_22, %c0_23] : memref<1x32xf32, #tpu.memory_space<vmem>>, vector<1x32xf32>
    %24 = vector.broadcast %23 : vector<1x32xf32> to vector<8x32xf32>
    %25 = arith.addf %22, %24 : vector<8x32xf32>
    %c0_24 = arith.constant 0 : index
    %c0_25 = arith.constant 0 : index
    %26 = vector.load %arg3[%c0_24, %c0_25] : memref<12x10xf32, #tpu.memory_space<vmem>>, vector<12x10xf32>
    %c0_26 = arith.constant 0 : index
    %c0_27 = arith.constant 0 : index
    %27 = vector.load %arg14[%c0_26, %c0_27] : memref<10x32xf32, #tpu.memory_space<vmem>>, vector<10x32xf32>
    %cst_28 = arith.constant dense<0.000000e+00> : vector<12x32xf32>
    %28 = tpu.matmul %26, %27, %cst_28 {dimension_numbers = #tpu.dot_dimension_numbers<[1], [0], [0], [1], [0, 0, 1, 1], [], []>} : vector<12x10xf32>, vector<10x32xf32>, vector<12x32xf32> -> vector<12x32xf32>
    %c0_29 = arith.constant 0 : index
    %c0_30 = arith.constant 0 : index
    %29 = vector.load %arg15[%c0_29, %c0_30] : memref<1x32xf32, #tpu.memory_space<vmem>>, vector<1x32xf32>
    %30 = vector.broadcast %29 : vector<1x32xf32> to vector<12x32xf32>
    %31 = arith.addf %28, %30 : vector<12x32xf32>
    %cst_31 = arith.constant 0.000000e+00 : f32
    %32 = vector.broadcast %cst_31 : f32 to vector<12x32xf32>
    %33 = arith.maximumf %31, %32 : vector<12x32xf32>
    %c0_32 = arith.constant 0 : index
    %c0_33 = arith.constant 0 : index
    %34 = vector.load %arg16[%c0_32, %c0_33] : memref<32x32xf32, #tpu.memory_space<vmem>>, vector<32x32xf32>
    %cst_34 = arith.constant dense<0.000000e+00> : vector<12x32xf32>
    %35 = tpu.matmul %33, %34, %cst_34 {dimension_numbers = #tpu.dot_dimension_numbers<[1], [0], [0], [1], [0, 0, 1, 1], [], []>} : vector<12x32xf32>, vector<32x32xf32>, vector<12x32xf32> -> vector<12x32xf32>
    %c0_35 = arith.constant 0 : index
    %c0_36 = arith.constant 0 : index
    %36 = vector.load %arg17[%c0_35, %c0_36] : memref<1x32xf32, #tpu.memory_space<vmem>>, vector<1x32xf32>
    %37 = vector.broadcast %36 : vector<1x32xf32> to vector<12x32xf32>
    %38 = arith.addf %35, %37 : vector<12x32xf32>
    %cst_37 = arith.constant 0.000000e+00 : f32
    %39 = vector.broadcast %cst_37 : f32 to vector<48x32xf32>
    %c0_38 = arith.constant 0 : index
    %c0_39 = arith.constant 0 : index
    %40 = vector.load %arg37[%c0_38, %c0_39] : memref<48x32xf32, #tpu.memory_space<vmem>>, vector<48x32xf32>
    tpu.vector_store %arg37[%c0_38, %c0_39], %39 {strides = array<i32>} : memref<48x32xf32, #tpu.memory_space<vmem>>, vector<48x32xf32>,
    %41 = vector.extract_strided_slice %12 {offsets = [0, 0], sizes = [12, 32], strides = [1, 1]} : vector<24x32xf32> to vector<12x32xf32>
    %c0_40 = arith.constant 0 : index
    %c0_41 = arith.constant 0 : index
    %42 = vector.load %arg37[%c0_40, %c0_41] : memref<48x32xf32, #tpu.memory_space<vmem>>, vector<12x32xf32>
    tpu.vector_store %arg37[%c0_40, %c0_41], %41 {strides = array<i32>} : memref<48x32xf32, #tpu.memory_space<vmem>>, vector<12x32xf32>,
    %43 = vector.extract_strided_slice %25 {offsets = [0, 0], sizes = [4, 32], strides = [1, 1]} : vector<8x32xf32> to vector<4x32xf32>
    %c12 = arith.constant 12 : index
    %c0_42 = arith.constant 0 : index
    %44 = vector.load %arg37[%c12, %c0_42] : memref<48x32xf32, #tpu.memory_space<vmem>>, vector<4x32xf32>
    tpu.vector_store %arg37[%c12, %c0_42], %43 {strides = array<i32>} : memref<48x32xf32, #tpu.memory_space<vmem>>, vector<4x32xf32>,
    %45 = vector.extract_strided_slice %38 {offsets = [0, 0], sizes = [6, 32], strides = [1, 1]} : vector<12x32xf32> to vector<6x32xf32>
    %c16 = arith.constant 16 : index
    %c0_43 = arith.constant 0 : index
    %46 = vector.load %arg37[%c16, %c0_43] : memref<48x32xf32, #tpu.memory_space<vmem>>, vector<6x32xf32>
    tpu.vector_store %arg37[%c16, %c0_43], %45 {strides = array<i32>} : memref<48x32xf32, #tpu.memory_space<vmem>>, vector<6x32xf32>,
    %47 = vector.extract_strided_slice %12 {offsets = [12, 0], sizes = [12, 32], strides = [1, 1]} : vector<24x32xf32> to vector<12x32xf32>
    %c24 = arith.constant 24 : index
    %c0_44 = arith.constant 0 : index
    %48 = vector.load %arg37[%c24, %c0_44] : memref<48x32xf32, #tpu.memory_space<vmem>>, vector<12x32xf32>
    tpu.vector_store %arg37[%c24, %c0_44], %47 {strides = array<i32>} : memref<48x32xf32, #tpu.memory_space<vmem>>, vector<12x32xf32>,
    %49 = vector.extract_strided_slice %25 {offsets = [4, 0], sizes = [4, 32], strides = [1, 1]} : vector<8x32xf32> to vector<4x32xf32>
    %c36 = arith.constant 36 : index
    %c0_45 = arith.constant 0 : index
    %50 = vector.load %arg37[%c36, %c0_45] : memref<48x32xf32, #tpu.memory_space<vmem>>, vector<4x32xf32>
    tpu.vector_store %arg37[%c36, %c0_45], %49 {strides = array<i32>} : memref<48x32xf32, #tpu.memory_space<vmem>>, vector<4x32xf32>,
    %51 = vector.extract_strided_slice %38 {offsets = [6, 0], sizes = [6, 32], strides = [1, 1]} : vector<12x32xf32> to vector<6x32xf32>
    %c40 = arith.constant 40 : index
    %c0_46 = arith.constant 0 : index
    %52 = vector.load %arg37[%c40, %c0_46] : memref<48x32xf32, #tpu.memory_space<vmem>>, vector<6x32xf32>
    tpu.vector_store %arg37[%c40, %c0_46], %51 {strides = array<i32>} : memref<48x32xf32, #tpu.memory_space<vmem>>, vector<6x32xf32>,
    %c0_47 = arith.constant 0 : index
    %c0_48 = arith.constant 0 : index
    %53 = vector.load %arg37[%c0_47, %c0_48] : memref<48x32xf32, #tpu.memory_space<vmem>>, vector<48x32xf32>
    %c0_49 = arith.constant 0 : index
    %c0_50 = arith.constant 0 : index
    %54 = vector.load %arg4[%c0_49, %c0_50] : memref<48x32xf32, #tpu.memory_space<vmem>>, vector<48x32xf32>
    %55 = arith.addf %53, %54 : vector<48x32xf32>
    %c0_51 = arith.constant 0 : index
    %c0_52 = arith.constant 0 : index
    %56 = vector.load %arg5[%c0_51, %c0_52] : memref<48x48xf32, #tpu.memory_space<vmem>>, vector<48x48xf32>
    %c0_53 = arith.constant 0 : index
    %c0_54 = arith.constant 0 : index
    %c0_55 = arith.constant 0 : index
    %57 = vector.load %arg18[%c0_53, %c0_54, %c0_55] : memref<2x32x96xf32, #tpu.memory_space<vmem>>, vector<1x32x96xf32>
    %58 = vector.shape_cast %57 : vector<1x32x96xf32> to vector<32x96xf32>
    %cst_56 = arith.constant dense<0.000000e+00> : vector<48x96xf32>
    %59 = tpu.matmul %55, %58, %cst_56 {dimension_numbers = #tpu.dot_dimension_numbers<[1], [0], [0], [1], [0, 0, 1, 1], [], []>} : vector<48x32xf32>, vector<32x96xf32>, vector<48x96xf32> -> vector<48x96xf32>
    %c0_57 = arith.constant 0 : index
    %c0_58 = arith.constant 0 : index
    %c0_59 = arith.constant 0 : index
    %60 = vector.load %arg19[%c0_57, %c0_58, %c0_59] : memref<2x1x96xf32, #tpu.memory_space<vmem>>, vector<1x1x96xf32>
    %61 = vector.shape_cast %60 : vector<1x1x96xf32> to vector<1x96xf32>
    %62 = vector.broadcast %61 : vector<1x96xf32> to vector<48x96xf32>
    %63 = arith.addf %59, %62 : vector<48x96xf32>
    %c0_60 = arith.constant 0 : index
    %c0_61 = arith.constant 0 : index
    %c0_62 = arith.constant 0 : index
    %64 = vector.load %arg20[%c0_60, %c0_61, %c0_62] : memref<2x32x32xf32, #tpu.memory_space<vmem>>, vector<1x32x32xf32>
    %65 = vector.shape_cast %64 : vector<1x32x32xf32> to vector<32x32xf32>
    %c0_63 = arith.constant 0 : index
    %c0_64 = arith.constant 0 : index
    %c0_65 = arith.constant 0 : index
    %66 = vector.load %arg21[%c0_63, %c0_64, %c0_65] : memref<2x1x32xf32, #tpu.memory_space<vmem>>, vector<1x1x32xf32>
    %67 = vector.shape_cast %66 : vector<1x1x32xf32> to vector<1x32xf32>
    %68 = vector.extract_strided_slice %63 {offsets = [0, 0], sizes = [48, 8], strides = [1, 1]} : vector<48x96xf32> to vector<48x8xf32>
    %69 = vector.extract_strided_slice %63 {offsets = [0, 32], sizes = [48, 8], strides = [1, 1]} : vector<48x96xf32> to vector<48x8xf32>
    %70 = vector.extract_strided_slice %63 {offsets = [0, 64], sizes = [48, 8], strides = [1, 1]} : vector<48x96xf32> to vector<48x8xf32>
    %cst_66 = arith.constant dense<0.000000e+00> : vector<48x48xf32>
    %71 = tpu.matmul %68, %69, %cst_66 {dimension_numbers = #tpu.dot_dimension_numbers<[1], [1], [0], [0], [0, 0, 1, 0], [], []>} : vector<48x8xf32>, vector<48x8xf32>, vector<48x48xf32> -> vector<48x48xf32>
    %72 = arith.addf %71, %56 : vector<48x48xf32>
    %cst_67 = arith.constant dense<0xFF800000> : vector<48xf32>
    %73 = vector.multi_reduction <maximumf>, %72, %cst_67 [1] : vector<48x48xf32> to vector<48xf32>
    %74 = vector.shape_cast %73 : vector<48xf32> to vector<48x1xf32>
    %75 = vector.broadcast %74 : vector<48x1xf32> to vector<48x48xf32>
    %76 = arith.subf %72, %75 : vector<48x48xf32>
    %77 = math.exp %76 : vector<48x48xf32>
    %cst_68 = arith.constant dense<0.000000e+00> : vector<48xf32>
    %78 = vector.multi_reduction <add>, %77, %cst_68 [1] : vector<48x48xf32> to vector<48xf32>
    %79 = vector.shape_cast %78 : vector<48xf32> to vector<48x1xf32>
    %80 = vector.broadcast %79 : vector<48x1xf32> to vector<48x48xf32>
    %81 = arith.divf %77, %80 : vector<48x48xf32>
    %cst_69 = arith.constant dense<0.000000e+00> : vector<48x8xf32>
    %82 = tpu.matmul %81, %70, %cst_69 {dimension_numbers = #tpu.dot_dimension_numbers<[1], [0], [0], [1], [0, 0, 1, 1], [], []>} : vector<48x48xf32>, vector<48x8xf32>, vector<48x8xf32> -> vector<48x8xf32>
    %83 = vector.extract_strided_slice %65 {offsets = [0, 0], sizes = [8, 32], strides = [1, 1]} : vector<32x32xf32> to vector<8x32xf32>
    %cst_70 = arith.constant dense<0.000000e+00> : vector<48x32xf32>
    %84 = tpu.matmul %82, %83, %cst_70 {dimension_numbers = #tpu.dot_dimension_numbers<[1], [0], [0], [1], [0, 0, 1, 1], [], []>} : vector<48x8xf32>, vector<8x32xf32>, vector<48x32xf32> -> vector<48x32xf32>
    %85 = vector.broadcast %67 : vector<1x32xf32> to vector<48x32xf32>
    %86 = arith.addf %85, %84 : vector<48x32xf32>
    %87 = vector.extract_strided_slice %63 {offsets = [0, 8], sizes = [48, 8], strides = [1, 1]} : vector<48x96xf32> to vector<48x8xf32>
    %88 = vector.extract_strided_slice %63 {offsets = [0, 40], sizes = [48, 8], strides = [1, 1]} : vector<48x96xf32> to vector<48x8xf32>
    %89 = vector.extract_strided_slice %63 {offsets = [0, 72], sizes = [48, 8], strides = [1, 1]} : vector<48x96xf32> to vector<48x8xf32>
    %cst_71 = arith.constant dense<0.000000e+00> : vector<48x48xf32>
    %90 = tpu.matmul %87, %88, %cst_71 {dimension_numbers = #tpu.dot_dimension_numbers<[1], [1], [0], [0], [0, 0, 1, 0], [], []>} : vector<48x8xf32>, vector<48x8xf32>, vector<48x48xf32> -> vector<48x48xf32>
    %91 = arith.addf %90, %56 : vector<48x48xf32>
    %cst_72 = arith.constant dense<0xFF800000> : vector<48xf32>
    %92 = vector.multi_reduction <maximumf>, %91, %cst_72 [1] : vector<48x48xf32> to vector<48xf32>
    %93 = vector.shape_cast %92 : vector<48xf32> to vector<48x1xf32>
    %94 = vector.broadcast %93 : vector<48x1xf32> to vector<48x48xf32>
    %95 = arith.subf %91, %94 : vector<48x48xf32>
    %96 = math.exp %95 : vector<48x48xf32>
    %cst_73 = arith.constant dense<0.000000e+00> : vector<48xf32>
    %97 = vector.multi_reduction <add>, %96, %cst_73 [1] : vector<48x48xf32> to vector<48xf32>
    %98 = vector.shape_cast %97 : vector<48xf32> to vector<48x1xf32>
    %99 = vector.broadcast %98 : vector<48x1xf32> to vector<48x48xf32>
    %100 = arith.divf %96, %99 : vector<48x48xf32>
    %cst_74 = arith.constant dense<0.000000e+00> : vector<48x8xf32>
    %101 = tpu.matmul %100, %89, %cst_74 {dimension_numbers = #tpu.dot_dimension_numbers<[1], [0], [0], [1], [0, 0, 1, 1], [], []>} : vector<48x48xf32>, vector<48x8xf32>, vector<48x8xf32> -> vector<48x8xf32>
    %102 = vector.extract_strided_slice %65 {offsets = [8, 0], sizes = [8, 32], strides = [1, 1]} : vector<32x32xf32> to vector<8x32xf32>
    %cst_75 = arith.constant dense<0.000000e+00> : vector<48x32xf32>
    %103 = tpu.matmul %101, %102, %cst_75 {dimension_numbers = #tpu.dot_dimension_numbers<[1], [0], [0], [1], [0, 0, 1, 1], [], []>} : vector<48x8xf32>, vector<8x32xf32>, vector<48x32xf32> -> vector<48x32xf32>
    %104 = arith.addf %86, %103 : vector<48x32xf32>
    %105 = vector.extract_strided_slice %63 {offsets = [0, 16], sizes = [48, 8], strides = [1, 1]} : vector<48x96xf32> to vector<48x8xf32>
    %106 = vector.extract_strided_slice %63 {offsets = [0, 48], sizes = [48, 8], strides = [1, 1]} : vector<48x96xf32> to vector<48x8xf32>
    %107 = vector.extract_strided_slice %63 {offsets = [0, 80], sizes = [48, 8], strides = [1, 1]} : vector<48x96xf32> to vector<48x8xf32>
    %cst_76 = arith.constant dense<0.000000e+00> : vector<48x48xf32>
    %108 = tpu.matmul %105, %106, %cst_76 {dimension_numbers = #tpu.dot_dimension_numbers<[1], [1], [0], [0], [0, 0, 1, 0], [], []>} : vector<48x8xf32>, vector<48x8xf32>, vector<48x48xf32> -> vector<48x48xf32>
    %109 = arith.addf %108, %56 : vector<48x48xf32>
    %cst_77 = arith.constant dense<0xFF800000> : vector<48xf32>
    %110 = vector.multi_reduction <maximumf>, %109, %cst_77 [1] : vector<48x48xf32> to vector<48xf32>
    %111 = vector.shape_cast %110 : vector<48xf32> to vector<48x1xf32>
    %112 = vector.broadcast %111 : vector<48x1xf32> to vector<48x48xf32>
    %113 = arith.subf %109, %112 : vector<48x48xf32>
    %114 = math.exp %113 : vector<48x48xf32>
    %cst_78 = arith.constant dense<0.000000e+00> : vector<48xf32>
    %115 = vector.multi_reduction <add>, %114, %cst_78 [1] : vector<48x48xf32> to vector<48xf32>
    %116 = vector.shape_cast %115 : vector<48xf32> to vector<48x1xf32>
    %117 = vector.broadcast %116 : vector<48x1xf32> to vector<48x48xf32>
    %118 = arith.divf %114, %117 : vector<48x48xf32>
    %cst_79 = arith.constant dense<0.000000e+00> : vector<48x8xf32>
    %119 = tpu.matmul %118, %107, %cst_79 {dimension_numbers = #tpu.dot_dimension_numbers<[1], [0], [0], [1], [0, 0, 1, 1], [], []>} : vector<48x48xf32>, vector<48x8xf32>, vector<48x8xf32> -> vector<48x8xf32>
    %120 = vector.extract_strided_slice %65 {offsets = [16, 0], sizes = [8, 32], strides = [1, 1]} : vector<32x32xf32> to vector<8x32xf32>
    %cst_80 = arith.constant dense<0.000000e+00> : vector<48x32xf32>
    %121 = tpu.matmul %119, %120, %cst_80 {dimension_numbers = #tpu.dot_dimension_numbers<[1], [0], [0], [1], [0, 0, 1, 1], [], []>} : vector<48x8xf32>, vector<8x32xf32>, vector<48x32xf32> -> vector<48x32xf32>
    %122 = arith.addf %104, %121 : vector<48x32xf32>
    %123 = vector.extract_strided_slice %63 {offsets = [0, 24], sizes = [48, 8], strides = [1, 1]} : vector<48x96xf32> to vector<48x8xf32>
    %124 = vector.extract_strided_slice %63 {offsets = [0, 56], sizes = [48, 8], strides = [1, 1]} : vector<48x96xf32> to vector<48x8xf32>
    %125 = vector.extract_strided_slice %63 {offsets = [0, 88], sizes = [48, 8], strides = [1, 1]} : vector<48x96xf32> to vector<48x8xf32>
    %cst_81 = arith.constant dense<0.000000e+00> : vector<48x48xf32>
    %126 = tpu.matmul %123, %124, %cst_81 {dimension_numbers = #tpu.dot_dimension_numbers<[1], [1], [0], [0], [0, 0, 1, 0], [], []>} : vector<48x8xf32>, vector<48x8xf32>, vector<48x48xf32> -> vector<48x48xf32>
    %127 = arith.addf %126, %56 : vector<48x48xf32>
    %cst_82 = arith.constant dense<0xFF800000> : vector<48xf32>
    %128 = vector.multi_reduction <maximumf>, %127, %cst_82 [1] : vector<48x48xf32> to vector<48xf32>
    %129 = vector.shape_cast %128 : vector<48xf32> to vector<48x1xf32>
    %130 = vector.broadcast %129 : vector<48x1xf32> to vector<48x48xf32>
    %131 = arith.subf %127, %130 : vector<48x48xf32>
    %132 = math.exp %131 : vector<48x48xf32>
    %cst_83 = arith.constant dense<0.000000e+00> : vector<48xf32>
    %133 = vector.multi_reduction <add>, %132, %cst_83 [1] : vector<48x48xf32> to vector<48xf32>
    %134 = vector.shape_cast %133 : vector<48xf32> to vector<48x1xf32>
    %135 = vector.broadcast %134 : vector<48x1xf32> to vector<48x48xf32>
    %136 = arith.divf %132, %135 : vector<48x48xf32>
    %cst_84 = arith.constant dense<0.000000e+00> : vector<48x8xf32>
    %137 = tpu.matmul %136, %125, %cst_84 {dimension_numbers = #tpu.dot_dimension_numbers<[1], [0], [0], [1], [0, 0, 1, 1], [], []>} : vector<48x48xf32>, vector<48x8xf32>, vector<48x8xf32> -> vector<48x8xf32>
    %138 = vector.extract_strided_slice %65 {offsets = [24, 0], sizes = [8, 32], strides = [1, 1]} : vector<32x32xf32> to vector<8x32xf32>
    %cst_85 = arith.constant dense<0.000000e+00> : vector<48x32xf32>
    %139 = tpu.matmul %137, %138, %cst_85 {dimension_numbers = #tpu.dot_dimension_numbers<[1], [0], [0], [1], [0, 0, 1, 1], [], []>} : vector<48x8xf32>, vector<8x32xf32>, vector<48x32xf32> -> vector<48x32xf32>
    %140 = arith.addf %122, %139 : vector<48x32xf32>
    %141 = arith.addf %55, %140 : vector<48x32xf32>
    %c0_86 = arith.constant 0 : index
    %c0_87 = arith.constant 0 : index
    %c0_88 = arith.constant 0 : index
    %142 = vector.load %arg26[%c0_86, %c0_87, %c0_88] : memref<2x1x32xf32, #tpu.memory_space<vmem>>, vector<1x1x32xf32>
    %143 = vector.shape_cast %142 : vector<1x1x32xf32> to vector<1x32xf32>
    %c0_89 = arith.constant 0 : index
    %c0_90 = arith.constant 0 : index
    %c0_91 = arith.constant 0 : index
    %144 = vector.load %arg27[%c0_89, %c0_90, %c0_91] : memref<2x1x32xf32, #tpu.memory_space<vmem>>, vector<1x1x32xf32>
    %145 = vector.shape_cast %144 : vector<1x1x32xf32> to vector<1x32xf32>
    %cst_92 = arith.constant dense<0.000000e+00> : vector<48xf32>
    %146 = vector.multi_reduction <add>, %141, %cst_92 [1] : vector<48x32xf32> to vector<48xf32>
    %147 = vector.shape_cast %146 : vector<48xf32> to vector<48x1xf32>
    %cst_93 = arith.constant 3.200000e+01 : f32
    %148 = vector.broadcast %cst_93 : f32 to vector<48x1xf32>
    %149 = arith.divf %147, %148 : vector<48x1xf32>
    %150 = vector.broadcast %149 : vector<48x1xf32> to vector<48x32xf32>
    %151 = arith.subf %141, %150 : vector<48x32xf32>
    %152 = arith.mulf %151, %151 : vector<48x32xf32>
    %cst_94 = arith.constant dense<0.000000e+00> : vector<48xf32>
    %153 = vector.multi_reduction <add>, %152, %cst_94 [1] : vector<48x32xf32> to vector<48xf32>
    %154 = vector.shape_cast %153 : vector<48xf32> to vector<48x1xf32>
    %cst_95 = arith.constant 3.200000e+01 : f32
    %155 = vector.broadcast %cst_95 : f32 to vector<48x1xf32>
    %156 = arith.divf %154, %155 : vector<48x1xf32>
    %157 = vector.broadcast %149 : vector<48x1xf32> to vector<48x32xf32>
    %158 = arith.subf %141, %157 : vector<48x32xf32>
    %cst_96 = arith.constant 9.99999974E-6 : f32
    %159 = vector.broadcast %cst_96 : f32 to vector<48x1xf32>
    %160 = arith.addf %156, %159 : vector<48x1xf32>
    %161 = math.rsqrt %160 : vector<48x1xf32>
    %162 = vector.broadcast %161 : vector<48x1xf32> to vector<48x32xf32>
    %163 = arith.mulf %158, %162 : vector<48x32xf32>
    %164 = vector.broadcast %143 : vector<1x32xf32> to vector<48x32xf32>
    %165 = arith.mulf %163, %164 : vector<48x32xf32>
    %166 = vector.broadcast %145 : vector<1x32xf32> to vector<48x32xf32>
    %167 = arith.addf %165, %166 : vector<48x32xf32>
    %c0_97 = arith.constant 0 : index
    %c0_98 = arith.constant 0 : index
    %c0_99 = arith.constant 0 : index
    %168 = vector.load %arg22[%c0_97, %c0_98, %c0_99] : memref<2x32x32xf32, #tpu.memory_space<vmem>>, vector<1x32x32xf32>
    %169 = vector.shape_cast %168 : vector<1x32x32xf32> to vector<32x32xf32>
    %cst_100 = arith.constant dense<0.000000e+00> : vector<48x32xf32>
    %170 = tpu.matmul %167, %169, %cst_100 {dimension_numbers = #tpu.dot_dimension_numbers<[1], [0], [0], [1], [0, 0, 1, 1], [], []>} : vector<48x32xf32>, vector<32x32xf32>, vector<48x32xf32> -> vector<48x32xf32>
    %c0_101 = arith.constant 0 : index
    %c0_102 = arith.constant 0 : index
    %c0_103 = arith.constant 0 : index
    %171 = vector.load %arg23[%c0_101, %c0_102, %c0_103] : memref<2x1x32xf32, #tpu.memory_space<vmem>>, vector<1x1x32xf32>
    %172 = vector.shape_cast %171 : vector<1x1x32xf32> to vector<1x32xf32>
    %173 = vector.broadcast %172 : vector<1x32xf32> to vector<48x32xf32>
    %174 = arith.addf %170, %173 : vector<48x32xf32>
    %cst_104 = arith.constant 0.000000e+00 : f32
    %175 = vector.broadcast %cst_104 : f32 to vector<48x32xf32>
    %176 = arith.maximumf %174, %175 : vector<48x32xf32>
    %c0_105 = arith.constant 0 : index
    %c0_106 = arith.constant 0 : index
    %c0_107 = arith.constant 0 : index
    %177 = vector.load %arg24[%c0_105, %c0_106, %c0_107] : memref<2x32x32xf32, #tpu.memory_space<vmem>>, vector<1x32x32xf32>
    %178 = vector.shape_cast %177 : vector<1x32x32xf32> to vector<32x32xf32>
    %cst_108 = arith.constant dense<0.000000e+00> : vector<48x32xf32>
    %179 = tpu.matmul %176, %178, %cst_108 {dimension_numbers = #tpu.dot_dimension_numbers<[1], [0], [0], [1], [0, 0, 1, 1], [], []>} : vector<48x32xf32>, vector<32x32xf32>, vector<48x32xf32> -> vector<48x32xf32>
    %c0_109 = arith.constant 0 : index
    %c0_110 = arith.constant 0 : index
    %c0_111 = arith.constant 0 : index
    %180 = vector.load %arg25[%c0_109, %c0_110, %c0_111] : memref<2x1x32xf32, #tpu.memory_space<vmem>>, vector<1x1x32xf32>
    %181 = vector.shape_cast %180 : vector<1x1x32xf32> to vector<1x32xf32>
    %182 = vector.broadcast %181 : vector<1x32xf32> to vector<48x32xf32>
    %183 = arith.addf %179, %182 : vector<48x32xf32>
    %184 = arith.addf %167, %183 : vector<48x32xf32>
    %c0_112 = arith.constant 0 : index
    %c0_113 = arith.constant 0 : index
    %c0_114 = arith.constant 0 : index
    %185 = vector.load %arg28[%c0_112, %c0_113, %c0_114] : memref<2x1x32xf32, #tpu.memory_space<vmem>>, vector<1x1x32xf32>
    %186 = vector.shape_cast %185 : vector<1x1x32xf32> to vector<1x32xf32>
    %c0_115 = arith.constant 0 : index
    %c0_116 = arith.constant 0 : index
    %c0_117 = arith.constant 0 : index
    %187 = vector.load %arg29[%c0_115, %c0_116, %c0_117] : memref<2x1x32xf32, #tpu.memory_space<vmem>>, vector<1x1x32xf32>
    %188 = vector.shape_cast %187 : vector<1x1x32xf32> to vector<1x32xf32>
    %cst_118 = arith.constant dense<0.000000e+00> : vector<48xf32>
    %189 = vector.multi_reduction <add>, %184, %cst_118 [1] : vector<48x32xf32> to vector<48xf32>
    %190 = vector.shape_cast %189 : vector<48xf32> to vector<48x1xf32>
    %cst_119 = arith.constant 3.200000e+01 : f32
    %191 = vector.broadcast %cst_119 : f32 to vector<48x1xf32>
    %192 = arith.divf %190, %191 : vector<48x1xf32>
    %193 = vector.broadcast %192 : vector<48x1xf32> to vector<48x32xf32>
    %194 = arith.subf %184, %193 : vector<48x32xf32>
    %195 = arith.mulf %194, %194 : vector<48x32xf32>
    %cst_120 = arith.constant dense<0.000000e+00> : vector<48xf32>
    %196 = vector.multi_reduction <add>, %195, %cst_120 [1] : vector<48x32xf32> to vector<48xf32>
    %197 = vector.shape_cast %196 : vector<48xf32> to vector<48x1xf32>
    %cst_121 = arith.constant 3.200000e+01 : f32
    %198 = vector.broadcast %cst_121 : f32 to vector<48x1xf32>
    %199 = arith.divf %197, %198 : vector<48x1xf32>
    %200 = vector.broadcast %192 : vector<48x1xf32> to vector<48x32xf32>
    %201 = arith.subf %184, %200 : vector<48x32xf32>
    %cst_122 = arith.constant 9.99999974E-6 : f32
    %202 = vector.broadcast %cst_122 : f32 to vector<48x1xf32>
    %203 = arith.addf %199, %202 : vector<48x1xf32>
    %204 = math.rsqrt %203 : vector<48x1xf32>
    %205 = vector.broadcast %204 : vector<48x1xf32> to vector<48x32xf32>
    %206 = arith.mulf %201, %205 : vector<48x32xf32>
    %207 = vector.broadcast %186 : vector<1x32xf32> to vector<48x32xf32>
    %208 = arith.mulf %206, %207 : vector<48x32xf32>
    %209 = vector.broadcast %188 : vector<1x32xf32> to vector<48x32xf32>
    %210 = arith.addf %208, %209 : vector<48x32xf32>
    %c1 = arith.constant 1 : index
    %c0_123 = arith.constant 0 : index
    %c0_124 = arith.constant 0 : index
    %211 = vector.load %arg18[%c1, %c0_123, %c0_124] : memref<2x32x96xf32, #tpu.memory_space<vmem>>, vector<1x32x96xf32>
    %212 = vector.shape_cast %211 : vector<1x32x96xf32> to vector<32x96xf32>
    %cst_125 = arith.constant dense<0.000000e+00> : vector<48x96xf32>
    %213 = tpu.matmul %210, %212, %cst_125 {dimension_numbers = #tpu.dot_dimension_numbers<[1], [0], [0], [1], [0, 0, 1, 1], [], []>} : vector<48x32xf32>, vector<32x96xf32>, vector<48x96xf32> -> vector<48x96xf32>
    %c1_126 = arith.constant 1 : index
    %c0_127 = arith.constant 0 : index
    %c0_128 = arith.constant 0 : index
    %214 = vector.load %arg19[%c1_126, %c0_127, %c0_128] : memref<2x1x96xf32, #tpu.memory_space<vmem>>, vector<1x1x96xf32>
    %215 = vector.shape_cast %214 : vector<1x1x96xf32> to vector<1x96xf32>
    %216 = vector.broadcast %215 : vector<1x96xf32> to vector<48x96xf32>
    %217 = arith.addf %213, %216 : vector<48x96xf32>
    %c1_129 = arith.constant 1 : index
    %c0_130 = arith.constant 0 : index
    %c0_131 = arith.constant 0 : index
    %218 = vector.load %arg20[%c1_129, %c0_130, %c0_131] : memref<2x32x32xf32, #tpu.memory_space<vmem>>, vector<1x32x32xf32>
    %219 = vector.shape_cast %218 : vector<1x32x32xf32> to vector<32x32xf32>
    %c1_132 = arith.constant 1 : index
    %c0_133 = arith.constant 0 : index
    %c0_134 = arith.constant 0 : index
    %220 = vector.load %arg21[%c1_132, %c0_133, %c0_134] : memref<2x1x32xf32, #tpu.memory_space<vmem>>, vector<1x1x32xf32>
    %221 = vector.shape_cast %220 : vector<1x1x32xf32> to vector<1x32xf32>
    %222 = vector.extract_strided_slice %217 {offsets = [0, 0], sizes = [48, 8], strides = [1, 1]} : vector<48x96xf32> to vector<48x8xf32>
    %223 = vector.extract_strided_slice %217 {offsets = [0, 32], sizes = [48, 8], strides = [1, 1]} : vector<48x96xf32> to vector<48x8xf32>
    %224 = vector.extract_strided_slice %217 {offsets = [0, 64], sizes = [48, 8], strides = [1, 1]} : vector<48x96xf32> to vector<48x8xf32>
    %cst_135 = arith.constant dense<0.000000e+00> : vector<48x48xf32>
    %225 = tpu.matmul %222, %223, %cst_135 {dimension_numbers = #tpu.dot_dimension_numbers<[1], [1], [0], [0], [0, 0, 1, 0], [], []>} : vector<48x8xf32>, vector<48x8xf32>, vector<48x48xf32> -> vector<48x48xf32>
    %226 = arith.addf %225, %56 : vector<48x48xf32>
    %cst_136 = arith.constant dense<0xFF800000> : vector<48xf32>
    %227 = vector.multi_reduction <maximumf>, %226, %cst_136 [1] : vector<48x48xf32> to vector<48xf32>
    %228 = vector.shape_cast %227 : vector<48xf32> to vector<48x1xf32>
    %229 = vector.broadcast %228 : vector<48x1xf32> to vector<48x48xf32>
    %230 = arith.subf %226, %229 : vector<48x48xf32>
    %231 = math.exp %230 : vector<48x48xf32>
    %cst_137 = arith.constant dense<0.000000e+00> : vector<48xf32>
    %232 = vector.multi_reduction <add>, %231, %cst_137 [1] : vector<48x48xf32> to vector<48xf32>
    %233 = vector.shape_cast %232 : vector<48xf32> to vector<48x1xf32>
    %234 = vector.broadcast %233 : vector<48x1xf32> to vector<48x48xf32>
    %235 = arith.divf %231, %234 : vector<48x48xf32>
    %cst_138 = arith.constant dense<0.000000e+00> : vector<48x8xf32>
    %236 = tpu.matmul %235, %224, %cst_138 {dimension_numbers = #tpu.dot_dimension_numbers<[1], [0], [0], [1], [0, 0, 1, 1], [], []>} : vector<48x48xf32>, vector<48x8xf32>, vector<48x8xf32> -> vector<48x8xf32>
    %237 = vector.extract_strided_slice %219 {offsets = [0, 0], sizes = [8, 32], strides = [1, 1]} : vector<32x32xf32> to vector<8x32xf32>
    %cst_139 = arith.constant dense<0.000000e+00> : vector<48x32xf32>
    %238 = tpu.matmul %236, %237, %cst_139 {dimension_numbers = #tpu.dot_dimension_numbers<[1], [0], [0], [1], [0, 0, 1, 1], [], []>} : vector<48x8xf32>, vector<8x32xf32>, vector<48x32xf32> -> vector<48x32xf32>
    %239 = vector.broadcast %221 : vector<1x32xf32> to vector<48x32xf32>
    %240 = arith.addf %239, %238 : vector<48x32xf32>
    %241 = vector.extract_strided_slice %217 {offsets = [0, 8], sizes = [48, 8], strides = [1, 1]} : vector<48x96xf32> to vector<48x8xf32>
    %242 = vector.extract_strided_slice %217 {offsets = [0, 40], sizes = [48, 8], strides = [1, 1]} : vector<48x96xf32> to vector<48x8xf32>
    %243 = vector.extract_strided_slice %217 {offsets = [0, 72], sizes = [48, 8], strides = [1, 1]} : vector<48x96xf32> to vector<48x8xf32>
    %cst_140 = arith.constant dense<0.000000e+00> : vector<48x48xf32>
    %244 = tpu.matmul %241, %242, %cst_140 {dimension_numbers = #tpu.dot_dimension_numbers<[1], [1], [0], [0], [0, 0, 1, 0], [], []>} : vector<48x8xf32>, vector<48x8xf32>, vector<48x48xf32> -> vector<48x48xf32>
    %245 = arith.addf %244, %56 : vector<48x48xf32>
    %cst_141 = arith.constant dense<0xFF800000> : vector<48xf32>
    %246 = vector.multi_reduction <maximumf>, %245, %cst_141 [1] : vector<48x48xf32> to vector<48xf32>
    %247 = vector.shape_cast %246 : vector<48xf32> to vector<48x1xf32>
    %248 = vector.broadcast %247 : vector<48x1xf32> to vector<48x48xf32>
    %249 = arith.subf %245, %248 : vector<48x48xf32>
    %250 = math.exp %249 : vector<48x48xf32>
    %cst_142 = arith.constant dense<0.000000e+00> : vector<48xf32>
    %251 = vector.multi_reduction <add>, %250, %cst_142 [1] : vector<48x48xf32> to vector<48xf32>
    %252 = vector.shape_cast %251 : vector<48xf32> to vector<48x1xf32>
    %253 = vector.broadcast %252 : vector<48x1xf32> to vector<48x48xf32>
    %254 = arith.divf %250, %253 : vector<48x48xf32>
    %cst_143 = arith.constant dense<0.000000e+00> : vector<48x8xf32>
    %255 = tpu.matmul %254, %243, %cst_143 {dimension_numbers = #tpu.dot_dimension_numbers<[1], [0], [0], [1], [0, 0, 1, 1], [], []>} : vector<48x48xf32>, vector<48x8xf32>, vector<48x8xf32> -> vector<48x8xf32>
    %256 = vector.extract_strided_slice %219 {offsets = [8, 0], sizes = [8, 32], strides = [1, 1]} : vector<32x32xf32> to vector<8x32xf32>
    %cst_144 = arith.constant dense<0.000000e+00> : vector<48x32xf32>
    %257 = tpu.matmul %255, %256, %cst_144 {dimension_numbers = #tpu.dot_dimension_numbers<[1], [0], [0], [1], [0, 0, 1, 1], [], []>} : vector<48x8xf32>, vector<8x32xf32>, vector<48x32xf32> -> vector<48x32xf32>
    %258 = arith.addf %240, %257 : vector<48x32xf32>
    %259 = vector.extract_strided_slice %217 {offsets = [0, 16], sizes = [48, 8], strides = [1, 1]} : vector<48x96xf32> to vector<48x8xf32>
    %260 = vector.extract_strided_slice %217 {offsets = [0, 48], sizes = [48, 8], strides = [1, 1]} : vector<48x96xf32> to vector<48x8xf32>
    %261 = vector.extract_strided_slice %217 {offsets = [0, 80], sizes = [48, 8], strides = [1, 1]} : vector<48x96xf32> to vector<48x8xf32>
    %cst_145 = arith.constant dense<0.000000e+00> : vector<48x48xf32>
    %262 = tpu.matmul %259, %260, %cst_145 {dimension_numbers = #tpu.dot_dimension_numbers<[1], [1], [0], [0], [0, 0, 1, 0], [], []>} : vector<48x8xf32>, vector<48x8xf32>, vector<48x48xf32> -> vector<48x48xf32>
    %263 = arith.addf %262, %56 : vector<48x48xf32>
    %cst_146 = arith.constant dense<0xFF800000> : vector<48xf32>
    %264 = vector.multi_reduction <maximumf>, %263, %cst_146 [1] : vector<48x48xf32> to vector<48xf32>
    %265 = vector.shape_cast %264 : vector<48xf32> to vector<48x1xf32>
    %266 = vector.broadcast %265 : vector<48x1xf32> to vector<48x48xf32>
    %267 = arith.subf %263, %266 : vector<48x48xf32>
    %268 = math.exp %267 : vector<48x48xf32>
    %cst_147 = arith.constant dense<0.000000e+00> : vector<48xf32>
    %269 = vector.multi_reduction <add>, %268, %cst_147 [1] : vector<48x48xf32> to vector<48xf32>
    %270 = vector.shape_cast %269 : vector<48xf32> to vector<48x1xf32>
    %271 = vector.broadcast %270 : vector<48x1xf32> to vector<48x48xf32>
    %272 = arith.divf %268, %271 : vector<48x48xf32>
    %cst_148 = arith.constant dense<0.000000e+00> : vector<48x8xf32>
    %273 = tpu.matmul %272, %261, %cst_148 {dimension_numbers = #tpu.dot_dimension_numbers<[1], [0], [0], [1], [0, 0, 1, 1], [], []>} : vector<48x48xf32>, vector<48x8xf32>, vector<48x8xf32> -> vector<48x8xf32>
    %274 = vector.extract_strided_slice %219 {offsets = [16, 0], sizes = [8, 32], strides = [1, 1]} : vector<32x32xf32> to vector<8x32xf32>
    %cst_149 = arith.constant dense<0.000000e+00> : vector<48x32xf32>
    %275 = tpu.matmul %273, %274, %cst_149 {dimension_numbers = #tpu.dot_dimension_numbers<[1], [0], [0], [1], [0, 0, 1, 1], [], []>} : vector<48x8xf32>, vector<8x32xf32>, vector<48x32xf32> -> vector<48x32xf32>
    %276 = arith.addf %258, %275 : vector<48x32xf32>
    %277 = vector.extract_strided_slice %217 {offsets = [0, 24], sizes = [48, 8], strides = [1, 1]} : vector<48x96xf32> to vector<48x8xf32>
    %278 = vector.extract_strided_slice %217 {offsets = [0, 56], sizes = [48, 8], strides = [1, 1]} : vector<48x96xf32> to vector<48x8xf32>
    %279 = vector.extract_strided_slice %217 {offsets = [0, 88], sizes = [48, 8], strides = [1, 1]} : vector<48x96xf32> to vector<48x8xf32>
    %cst_150 = arith.constant dense<0.000000e+00> : vector<48x48xf32>
    %280 = tpu.matmul %277, %278, %cst_150 {dimension_numbers = #tpu.dot_dimension_numbers<[1], [1], [0], [0], [0, 0, 1, 0], [], []>} : vector<48x8xf32>, vector<48x8xf32>, vector<48x48xf32> -> vector<48x48xf32>
    %281 = arith.addf %280, %56 : vector<48x48xf32>
    %cst_151 = arith.constant dense<0xFF800000> : vector<48xf32>
    %282 = vector.multi_reduction <maximumf>, %281, %cst_151 [1] : vector<48x48xf32> to vector<48xf32>
    %283 = vector.shape_cast %282 : vector<48xf32> to vector<48x1xf32>
    %284 = vector.broadcast %283 : vector<48x1xf32> to vector<48x48xf32>
    %285 = arith.subf %281, %284 : vector<48x48xf32>
    %286 = math.exp %285 : vector<48x48xf32>
    %cst_152 = arith.constant dense<0.000000e+00> : vector<48xf32>
    %287 = vector.multi_reduction <add>, %286, %cst_152 [1] : vector<48x48xf32> to vector<48xf32>
    %288 = vector.shape_cast %287 : vector<48xf32> to vector<48x1xf32>
    %289 = vector.broadcast %288 : vector<48x1xf32> to vector<48x48xf32>
    %290 = arith.divf %286, %289 : vector<48x48xf32>
    %cst_153 = arith.constant dense<0.000000e+00> : vector<48x8xf32>
    %291 = tpu.matmul %290, %279, %cst_153 {dimension_numbers = #tpu.dot_dimension_numbers<[1], [0], [0], [1], [0, 0, 1, 1], [], []>} : vector<48x48xf32>, vector<48x8xf32>, vector<48x8xf32> -> vector<48x8xf32>
    %292 = vector.extract_strided_slice %219 {offsets = [24, 0], sizes = [8, 32], strides = [1, 1]} : vector<32x32xf32> to vector<8x32xf32>
    %cst_154 = arith.constant dense<0.000000e+00> : vector<48x32xf32>
    %293 = tpu.matmul %291, %292, %cst_154 {dimension_numbers = #tpu.dot_dimension_numbers<[1], [0], [0], [1], [0, 0, 1, 1], [], []>} : vector<48x8xf32>, vector<8x32xf32>, vector<48x32xf32> -> vector<48x32xf32>
    %294 = arith.addf %276, %293 : vector<48x32xf32>
    %295 = arith.addf %210, %294 : vector<48x32xf32>
    %c1_155 = arith.constant 1 : index
    %c0_156 = arith.constant 0 : index
    %c0_157 = arith.constant 0 : index
    %296 = vector.load %arg26[%c1_155, %c0_156, %c0_157] : memref<2x1x32xf32, #tpu.memory_space<vmem>>, vector<1x1x32xf32>
    %297 = vector.shape_cast %296 : vector<1x1x32xf32> to vector<1x32xf32>
    %c1_158 = arith.constant 1 : index
    %c0_159 = arith.constant 0 : index
    %c0_160 = arith.constant 0 : index
    %298 = vector.load %arg27[%c1_158, %c0_159, %c0_160] : memref<2x1x32xf32, #tpu.memory_space<vmem>>, vector<1x1x32xf32>
    %299 = vector.shape_cast %298 : vector<1x1x32xf32> to vector<1x32xf32>
    %cst_161 = arith.constant dense<0.000000e+00> : vector<48xf32>
    %300 = vector.multi_reduction <add>, %295, %cst_161 [1] : vector<48x32xf32> to vector<48xf32>
    %301 = vector.shape_cast %300 : vector<48xf32> to vector<48x1xf32>
    %cst_162 = arith.constant 3.200000e+01 : f32
    %302 = vector.broadcast %cst_162 : f32 to vector<48x1xf32>
    %303 = arith.divf %301, %302 : vector<48x1xf32>
    %304 = vector.broadcast %303 : vector<48x1xf32> to vector<48x32xf32>
    %305 = arith.subf %295, %304 : vector<48x32xf32>
    %306 = arith.mulf %305, %305 : vector<48x32xf32>
    %cst_163 = arith.constant dense<0.000000e+00> : vector<48xf32>
    %307 = vector.multi_reduction <add>, %306, %cst_163 [1] : vector<48x32xf32> to vector<48xf32>
    %308 = vector.shape_cast %307 : vector<48xf32> to vector<48x1xf32>
    %cst_164 = arith.constant 3.200000e+01 : f32
    %309 = vector.broadcast %cst_164 : f32 to vector<48x1xf32>
    %310 = arith.divf %308, %309 : vector<48x1xf32>
    %311 = vector.broadcast %303 : vector<48x1xf32> to vector<48x32xf32>
    %312 = arith.subf %295, %311 : vector<48x32xf32>
    %cst_165 = arith.constant 9.99999974E-6 : f32
    %313 = vector.broadcast %cst_165 : f32 to vector<48x1xf32>
    %314 = arith.addf %310, %313 : vector<48x1xf32>
    %315 = math.rsqrt %314 : vector<48x1xf32>
    %316 = vector.broadcast %315 : vector<48x1xf32> to vector<48x32xf32>
    %317 = arith.mulf %312, %316 : vector<48x32xf32>
    %318 = vector.broadcast %297 : vector<1x32xf32> to vector<48x32xf32>
    %319 = arith.mulf %317, %318 : vector<48x32xf32>
    %320 = vector.broadcast %299 : vector<1x32xf32> to vector<48x32xf32>
    %321 = arith.addf %319, %320 : vector<48x32xf32>
    %c1_166 = arith.constant 1 : index
    %c0_167 = arith.constant 0 : index
    %c0_168 = arith.constant 0 : index
    %322 = vector.load %arg22[%c1_166, %c0_167, %c0_168] : memref<2x32x32xf32, #tpu.memory_space<vmem>>, vector<1x32x32xf32>
    %323 = vector.shape_cast %322 : vector<1x32x32xf32> to vector<32x32xf32>
    %cst_169 = arith.constant dense<0.000000e+00> : vector<48x32xf32>
    %324 = tpu.matmul %321, %323, %cst_169 {dimension_numbers = #tpu.dot_dimension_numbers<[1], [0], [0], [1], [0, 0, 1, 1], [], []>} : vector<48x32xf32>, vector<32x32xf32>, vector<48x32xf32> -> vector<48x32xf32>
    %c1_170 = arith.constant 1 : index
    %c0_171 = arith.constant 0 : index
    %c0_172 = arith.constant 0 : index
    %325 = vector.load %arg23[%c1_170, %c0_171, %c0_172] : memref<2x1x32xf32, #tpu.memory_space<vmem>>, vector<1x1x32xf32>
    %326 = vector.shape_cast %325 : vector<1x1x32xf32> to vector<1x32xf32>
    %327 = vector.broadcast %326 : vector<1x32xf32> to vector<48x32xf32>
    %328 = arith.addf %324, %327 : vector<48x32xf32>
    %cst_173 = arith.constant 0.000000e+00 : f32
    %329 = vector.broadcast %cst_173 : f32 to vector<48x32xf32>
    %330 = arith.maximumf %328, %329 : vector<48x32xf32>
    %c1_174 = arith.constant 1 : index
    %c0_175 = arith.constant 0 : index
    %c0_176 = arith.constant 0 : index
    %331 = vector.load %arg24[%c1_174, %c0_175, %c0_176] : memref<2x32x32xf32, #tpu.memory_space<vmem>>, vector<1x32x32xf32>
    %332 = vector.shape_cast %331 : vector<1x32x32xf32> to vector<32x32xf32>
    %cst_177 = arith.constant dense<0.000000e+00> : vector<48x32xf32>
    %333 = tpu.matmul %330, %332, %cst_177 {dimension_numbers = #tpu.dot_dimension_numbers<[1], [0], [0], [1], [0, 0, 1, 1], [], []>} : vector<48x32xf32>, vector<32x32xf32>, vector<48x32xf32> -> vector<48x32xf32>
    %c1_178 = arith.constant 1 : index
    %c0_179 = arith.constant 0 : index
    %c0_180 = arith.constant 0 : index
    %334 = vector.load %arg25[%c1_178, %c0_179, %c0_180] : memref<2x1x32xf32, #tpu.memory_space<vmem>>, vector<1x1x32xf32>
    %335 = vector.shape_cast %334 : vector<1x1x32xf32> to vector<1x32xf32>
    %336 = vector.broadcast %335 : vector<1x32xf32> to vector<48x32xf32>
    %337 = arith.addf %333, %336 : vector<48x32xf32>
    %338 = arith.addf %321, %337 : vector<48x32xf32>
    %c1_181 = arith.constant 1 : index
    %c0_182 = arith.constant 0 : index
    %c0_183 = arith.constant 0 : index
    %339 = vector.load %arg28[%c1_181, %c0_182, %c0_183] : memref<2x1x32xf32, #tpu.memory_space<vmem>>, vector<1x1x32xf32>
    %340 = vector.shape_cast %339 : vector<1x1x32xf32> to vector<1x32xf32>
    %c1_184 = arith.constant 1 : index
    %c0_185 = arith.constant 0 : index
    %c0_186 = arith.constant 0 : index
    %341 = vector.load %arg29[%c1_184, %c0_185, %c0_186] : memref<2x1x32xf32, #tpu.memory_space<vmem>>, vector<1x1x32xf32>
    %342 = vector.shape_cast %341 : vector<1x1x32xf32> to vector<1x32xf32>
    %cst_187 = arith.constant dense<0.000000e+00> : vector<48xf32>
    %343 = vector.multi_reduction <add>, %338, %cst_187 [1] : vector<48x32xf32> to vector<48xf32>
    %344 = vector.shape_cast %343 : vector<48xf32> to vector<48x1xf32>
    %cst_188 = arith.constant 3.200000e+01 : f32
    %345 = vector.broadcast %cst_188 : f32 to vector<48x1xf32>
    %346 = arith.divf %344, %345 : vector<48x1xf32>
    %347 = vector.broadcast %346 : vector<48x1xf32> to vector<48x32xf32>
    %348 = arith.subf %338, %347 : vector<48x32xf32>
    %349 = arith.mulf %348, %348 : vector<48x32xf32>
    %cst_189 = arith.constant dense<0.000000e+00> : vector<48xf32>
    %350 = vector.multi_reduction <add>, %349, %cst_189 [1] : vector<48x32xf32> to vector<48xf32>
    %351 = vector.shape_cast %350 : vector<48xf32> to vector<48x1xf32>
    %cst_190 = arith.constant 3.200000e+01 : f32
    %352 = vector.broadcast %cst_190 : f32 to vector<48x1xf32>
    %353 = arith.divf %351, %352 : vector<48x1xf32>
    %354 = vector.broadcast %346 : vector<48x1xf32> to vector<48x32xf32>
    %355 = arith.subf %338, %354 : vector<48x32xf32>
    %cst_191 = arith.constant 9.99999974E-6 : f32
    %356 = vector.broadcast %cst_191 : f32 to vector<48x1xf32>
    %357 = arith.addf %353, %356 : vector<48x1xf32>
    %358 = math.rsqrt %357 : vector<48x1xf32>
    %359 = vector.broadcast %358 : vector<48x1xf32> to vector<48x32xf32>
    %360 = arith.mulf %355, %359 : vector<48x32xf32>
    %361 = vector.broadcast %340 : vector<1x32xf32> to vector<48x32xf32>
    %362 = arith.mulf %360, %361 : vector<48x32xf32>
    %363 = vector.broadcast %342 : vector<1x32xf32> to vector<48x32xf32>
    %364 = arith.addf %362, %363 : vector<48x32xf32>
    %c0_192 = arith.constant 0 : index
    %c0_193 = arith.constant 0 : index
    %365 = vector.load %arg37[%c0_192, %c0_193] : memref<48x32xf32, #tpu.memory_space<vmem>>, vector<48x32xf32>
    tpu.vector_store %arg37[%c0_192, %c0_193], %364 {strides = array<i32>} : memref<48x32xf32, #tpu.memory_space<vmem>>, vector<48x32xf32>,
    %c22 = arith.constant 22 : index
    %c0_194 = arith.constant 0 : index
    %366 = vector.load %arg37[%c22, %c0_194] : memref<48x32xf32, #tpu.memory_space<vmem>>, vector<1x32xf32>
    %c46 = arith.constant 46 : index
    %c0_195 = arith.constant 0 : index
    %367 = vector.load %arg37[%c46, %c0_195] : memref<48x32xf32, #tpu.memory_space<vmem>>, vector<1x32xf32>
    %368 = tpu.concatenate %366, %367 in 0 : vector<1x32xf32>, vector<1x32xf32> -> vector<2x32xf32>
    %c0_196 = arith.constant 0 : index
    %c0_197 = arith.constant 0 : index
    %369 = vector.load %arg30[%c0_196, %c0_197] : memref<1x32xf32, #tpu.memory_space<vmem>>, vector<1x32xf32>
    %c0_198 = arith.constant 0 : index
    %c0_199 = arith.constant 0 : index
    %370 = vector.load %arg31[%c0_198, %c0_199] : memref<1x32xf32, #tpu.memory_space<vmem>>, vector<1x32xf32>
    %cst_200 = arith.constant dense<0.000000e+00> : vector<2xf32>
    %371 = vector.multi_reduction <add>, %368, %cst_200 [1] : vector<2x32xf32> to vector<2xf32>
    %372 = vector.shape_cast %371 : vector<2xf32> to vector<2x1xf32>
    %cst_201 = arith.constant 3.200000e+01 : f32
    %373 = vector.broadcast %cst_201 : f32 to vector<2x1xf32>
    %374 = arith.divf %372, %373 : vector<2x1xf32>
    %375 = vector.broadcast %374 : vector<2x1xf32> to vector<2x32xf32>
    %376 = arith.subf %368, %375 : vector<2x32xf32>
    %377 = arith.mulf %376, %376 : vector<2x32xf32>
    %cst_202 = arith.constant dense<0.000000e+00> : vector<2xf32>
    %378 = vector.multi_reduction <add>, %377, %cst_202 [1] : vector<2x32xf32> to vector<2xf32>
    %379 = vector.shape_cast %378 : vector<2xf32> to vector<2x1xf32>
    %cst_203 = arith.constant 3.200000e+01 : f32
    %380 = vector.broadcast %cst_203 : f32 to vector<2x1xf32>
    %381 = arith.divf %379, %380 : vector<2x1xf32>
    %382 = vector.broadcast %374 : vector<2x1xf32> to vector<2x32xf32>
    %383 = arith.subf %368, %382 : vector<2x32xf32>
    %cst_204 = arith.constant 9.99999974E-6 : f32
    %384 = vector.broadcast %cst_204 : f32 to vector<2x1xf32>
    %385 = arith.addf %381, %384 : vector<2x1xf32>
    %386 = math.rsqrt %385 : vector<2x1xf32>
    %387 = vector.broadcast %386 : vector<2x1xf32> to vector<2x32xf32>
    %388 = arith.mulf %383, %387 : vector<2x32xf32>
    %389 = vector.broadcast %369 : vector<1x32xf32> to vector<2x32xf32>
    %390 = arith.mulf %388, %389 : vector<2x32xf32>
    %391 = vector.broadcast %370 : vector<1x32xf32> to vector<2x32xf32>
    %392 = arith.addf %390, %391 : vector<2x32xf32>
    %c0_205 = arith.constant 0 : index
    %c0_206 = arith.constant 0 : index
    %393 = vector.load %arg32[%c0_205, %c0_206] : memref<32x32xf32, #tpu.memory_space<vmem>>, vector<32x32xf32>
    %cst_207 = arith.constant dense<0.000000e+00> : vector<2x32xf32>
    %394 = tpu.matmul %392, %393, %cst_207 {dimension_numbers = #tpu.dot_dimension_numbers<[1], [0], [0], [1], [0, 0, 1, 1], [], []>} : vector<2x32xf32>, vector<32x32xf32>, vector<2x32xf32> -> vector<2x32xf32>
    %c0_208 = arith.constant 0 : index
    %c0_209 = arith.constant 0 : index
    %395 = vector.load %arg33[%c0_208, %c0_209] : memref<1x32xf32, #tpu.memory_space<vmem>>, vector<1x32xf32>
    %396 = vector.broadcast %395 : vector<1x32xf32> to vector<2x32xf32>
    %397 = arith.addf %394, %396 : vector<2x32xf32>
    %cst_210 = arith.constant 0.000000e+00 : f32
    %398 = vector.broadcast %cst_210 : f32 to vector<2x32xf32>
    %399 = arith.maximumf %397, %398 : vector<2x32xf32>
    %c0_211 = arith.constant 0 : index
    %c0_212 = arith.constant 0 : index
    %400 = vector.load %arg34[%c0_211, %c0_212] : memref<32x1xf32, #tpu.memory_space<vmem>>, vector<32x1xf32>
    %cst_213 = arith.constant dense<0.000000e+00> : vector<2x1xf32>
    %401 = tpu.matmul %399, %400, %cst_213 {dimension_numbers = #tpu.dot_dimension_numbers<[1], [0], [0], [1], [0, 0, 1, 1], [], []>} : vector<2x32xf32>, vector<32x1xf32>, vector<2x1xf32> -> vector<2x1xf32>
    %c0_214 = arith.constant 0 : index
    %c0_215 = arith.constant 0 : index
    %402 = vector.load %arg35[%c0_214, %c0_215] : memref<1x1xf32, #tpu.memory_space<vmem>>, vector<1x1xf32>
    %403 = vector.broadcast %402 : vector<1x1xf32> to vector<2x1xf32>
    %404 = arith.addf %401, %403 : vector<2x1xf32>
    %405 = arith.negf %404 : vector<2x1xf32>
    %406 = math.exp %405 : vector<2x1xf32>
    %cst_216 = arith.constant 1.000000e+00 : f32
    %407 = vector.broadcast %cst_216 : f32 to vector<2x1xf32>
    %408 = arith.addf %407, %406 : vector<2x1xf32>
    %409 = arith.divf %407, %408 : vector<2x1xf32>
    %c0_217 = arith.constant 0 : index
    %c0_218 = arith.constant 0 : index
    %410 = vector.load %arg36[%c0_217, %c0_218] : memref<2x1xf32, #tpu.memory_space<vmem>>, vector<2x1xf32>
    tpu.vector_store %arg36[%c0_217, %c0_218], %409 {strides = array<i32>} : memref<2x1xf32, #tpu.memory_space<vmem>>, vector<2x1xf32>,
    return
  }
  func.func @transform_0(%arg0: i32) -> (i32, i32) {
    %c0_i32 = arith.constant 0 : i32
    %c0_i32_0 = arith.constant 0 : i32
    %c0_i32_1 = arith.constant 0 : i32
    return %c0_i32, %c0_i32_0 : i32, i32
  }
  func.func @transform_1(%arg0: i32) -> (i32, i32) {
    %c0_i32 = arith.constant 0 : i32
    %c0_i32_0 = arith.constant 0 : i32
    %c0_i32_1 = arith.constant 0 : i32
    return %c0_i32, %c0_i32_0 : i32, i32
  }
  func.func @transform_2(%arg0: i32) -> (i32, i32) {
    %c0_i32 = arith.constant 0 : i32
    %c0_i32_0 = arith.constant 0 : i32
    %c0_i32_1 = arith.constant 0 : i32
    return %c0_i32, %c0_i32_0 : i32, i32
  }
  func.func @transform_3(%arg0: i32) -> (i32, i32) {
    %c0_i32 = arith.constant 0 : i32
    %c0_i32_0 = arith.constant 0 : i32
    %c0_i32_1 = arith.constant 0 : i32
    return %c0_i32, %c0_i32_0 : i32, i32
  }
  func.func @transform_4(%arg0: i32) -> (i32, i32) {
    %c0_i32 = arith.constant 0 : i32
    %c0_i32_0 = arith.constant 0 : i32
    %c0_i32_1 = arith.constant 0 : i32
    return %c0_i32, %c0_i32_0 : i32, i32
  }
  func.func @transform_5(%arg0: i32) -> (i32, i32) {
    %c0_i32 = arith.constant 0 : i32
    %c0_i32_0 = arith.constant 0 : i32
    %c0_i32_1 = arith.constant 0 : i32
    return %c0_i32, %c0_i32_0 : i32, i32
  }
  func.func @transform_6(%arg0: i32) -> (i32, i32) {
    %c0_i32 = arith.constant 0 : i32
    %c0_i32_0 = arith.constant 0 : i32
    %c0_i32_1 = arith.constant 0 : i32
    return %c0_i32, %c0_i32_0 : i32, i32
  }
  func.func @transform_7(%arg0: i32) -> (i32, i32) {
    %c0_i32 = arith.constant 0 : i32
    %c0_i32_0 = arith.constant 0 : i32
    %c0_i32_1 = arith.constant 0 : i32
    return %c0_i32, %c0_i32_0 : i32, i32
  }
  func.func @transform_8(%arg0: i32) -> (i32, i32) {
    %c0_i32 = arith.constant 0 : i32
    %c0_i32_0 = arith.constant 0 : i32
    %c0_i32_1 = arith.constant 0 : i32
    return %c0_i32, %c0_i32_0 : i32, i32
  }
  func.func @transform_9(%arg0: i32) -> (i32, i32) {
    %c0_i32 = arith.constant 0 : i32
    %c0_i32_0 = arith.constant 0 : i32
    %c0_i32_1 = arith.constant 0 : i32
    return %c0_i32, %c0_i32_0 : i32, i32
  }
  func.func @transform_10(%arg0: i32) -> (i32, i32) {
    %c0_i32 = arith.constant 0 : i32
    %c0_i32_0 = arith.constant 0 : i32
    %c0_i32_1 = arith.constant 0 : i32
    return %c0_i32, %c0_i32_0 : i32, i32
  }
  func.func @transform_11(%arg0: i32) -> (i32, i32) {
    %c0_i32 = arith.constant 0 : i32
    %c0_i32_0 = arith.constant 0 : i32
    %c0_i32_1 = arith.constant 0 : i32
    return %c0_i32, %c0_i32_0 : i32, i32
  }
  func.func @transform_12(%arg0: i32) -> (i32, i32) {
    %c0_i32 = arith.constant 0 : i32
    %c0_i32_0 = arith.constant 0 : i32
    %c0_i32_1 = arith.constant 0 : i32
    return %c0_i32, %c0_i32_0 : i32, i32
  }
  func.func @transform_13(%arg0: i32) -> (i32, i32) {
    %c0_i32 = arith.constant 0 : i32
    %c0_i32_0 = arith.constant 0 : i32
    %c0_i32_1 = arith.constant 0 : i32
    return %c0_i32, %c0_i32_0 : i32, i32
  }
  func.func @transform_14(%arg0: i32) -> (i32, i32) {
    %c0_i32 = arith.constant 0 : i32
    %c0_i32_0 = arith.constant 0 : i32
    %c0_i32_1 = arith.constant 0 : i32
    return %c0_i32, %c0_i32_0 : i32, i32
  }
  func.func @transform_15(%arg0: i32) -> (i32, i32) {
    %c0_i32 = arith.constant 0 : i32
    %c0_i32_0 = arith.constant 0 : i32
    %c0_i32_1 = arith.constant 0 : i32
    return %c0_i32, %c0_i32_0 : i32, i32
  }
  func.func @transform_16(%arg0: i32) -> (i32, i32) {
    %c0_i32 = arith.constant 0 : i32
    %c0_i32_0 = arith.constant 0 : i32
    %c0_i32_1 = arith.constant 0 : i32
    return %c0_i32, %c0_i32_0 : i32, i32
  }
  func.func @transform_17(%arg0: i32) -> (i32, i32, i32) {
    %c0_i32 = arith.constant 0 : i32
    %c0_i32_0 = arith.constant 0 : i32
    %c0_i32_1 = arith.constant 0 : i32
    %c0_i32_2 = arith.constant 0 : i32
    return %c0_i32, %c0_i32_0, %c0_i32_1 : i32, i32, i32
  }
  func.func @transform_18(%arg0: i32) -> (i32, i32, i32) {
    %c0_i32 = arith.constant 0 : i32
    %c0_i32_0 = arith.constant 0 : i32
    %c0_i32_1 = arith.constant 0 : i32
    %c0_i32_2 = arith.constant 0 : i32
    return %c0_i32, %c0_i32_0, %c0_i32_1 : i32, i32, i32
  }
  func.func @transform_19(%arg0: i32) -> (i32, i32, i32) {
    %c0_i32 = arith.constant 0 : i32
    %c0_i32_0 = arith.constant 0 : i32
    %c0_i32_1 = arith.constant 0 : i32
    %c0_i32_2 = arith.constant 0 : i32
    return %c0_i32, %c0_i32_0, %c0_i32_1 : i32, i32, i32
  }
  func.func @transform_20(%arg0: i32) -> (i32, i32, i32) {
    %c0_i32 = arith.constant 0 : i32
    %c0_i32_0 = arith.constant 0 : i32
    %c0_i32_1 = arith.constant 0 : i32
    %c0_i32_2 = arith.constant 0 : i32
    return %c0_i32, %c0_i32_0, %c0_i32_1 : i32, i32, i32
  }
  func.func @transform_21(%arg0: i32) -> (i32, i32, i32) {
    %c0_i32 = arith.constant 0 : i32
    %c0_i32_0 = arith.constant 0 : i32
    %c0_i32_1 = arith.constant 0 : i32
    %c0_i32_2 = arith.constant 0 : i32
    return %c0_i32, %c0_i32_0, %c0_i32_1 : i32, i32, i32
  }
  func.func @transform_22(%arg0: i32) -> (i32, i32, i32) {
    %c0_i32 = arith.constant 0 : i32
    %c0_i32_0 = arith.constant 0 : i32
    %c0_i32_1 = arith.constant 0 : i32
    %c0_i32_2 = arith.constant 0 : i32
    return %c0_i32, %c0_i32_0, %c0_i32_1 : i32, i32, i32
  }
  func.func @transform_23(%arg0: i32) -> (i32, i32, i32) {
    %c0_i32 = arith.constant 0 : i32
    %c0_i32_0 = arith.constant 0 : i32
    %c0_i32_1 = arith.constant 0 : i32
    %c0_i32_2 = arith.constant 0 : i32
    return %c0_i32, %c0_i32_0, %c0_i32_1 : i32, i32, i32
  }
  func.func @transform_24(%arg0: i32) -> (i32, i32, i32) {
    %c0_i32 = arith.constant 0 : i32
    %c0_i32_0 = arith.constant 0 : i32
    %c0_i32_1 = arith.constant 0 : i32
    %c0_i32_2 = arith.constant 0 : i32
    return %c0_i32, %c0_i32_0, %c0_i32_1 : i32, i32, i32
  }
  func.func @transform_25(%arg0: i32) -> (i32, i32, i32) {
    %c0_i32 = arith.constant 0 : i32
    %c0_i32_0 = arith.constant 0 : i32
    %c0_i32_1 = arith.constant 0 : i32
    %c0_i32_2 = arith.constant 0 : i32
    return %c0_i32, %c0_i32_0, %c0_i32_1 : i32, i32, i32
  }
  func.func @transform_26(%arg0: i32) -> (i32, i32, i32) {
    %c0_i32 = arith.constant 0 : i32
    %c0_i32_0 = arith.constant 0 : i32
    %c0_i32_1 = arith.constant 0 : i32
    %c0_i32_2 = arith.constant 0 : i32
    return %c0_i32, %c0_i32_0, %c0_i32_1 : i32, i32, i32
  }
  func.func @transform_27(%arg0: i32) -> (i32, i32, i32) {
    %c0_i32 = arith.constant 0 : i32
    %c0_i32_0 = arith.constant 0 : i32
    %c0_i32_1 = arith.constant 0 : i32
    %c0_i32_2 = arith.constant 0 : i32
    return %c0_i32, %c0_i32_0, %c0_i32_1 : i32, i32, i32
  }
  func.func @transform_28(%arg0: i32) -> (i32, i32, i32) {
    %c0_i32 = arith.constant 0 : i32
    %c0_i32_0 = arith.constant 0 : i32
    %c0_i32_1 = arith.constant 0 : i32
    %c0_i32_2 = arith.constant 0 : i32
    return %c0_i32, %c0_i32_0, %c0_i32_1 : i32, i32, i32
  }
  func.func @transform_29(%arg0: i32) -> (i32, i32) {
    %c0_i32 = arith.constant 0 : i32
    %c0_i32_0 = arith.constant 0 : i32
    %c0_i32_1 = arith.constant 0 : i32
    return %c0_i32, %c0_i32_0 : i32, i32
  }
  func.func @transform_30(%arg0: i32) -> (i32, i32) {
    %c0_i32 = arith.constant 0 : i32
    %c0_i32_0 = arith.constant 0 : i32
    %c0_i32_1 = arith.constant 0 : i32
    return %c0_i32, %c0_i32_0 : i32, i32
  }
  func.func @transform_31(%arg0: i32) -> (i32, i32) {
    %c0_i32 = arith.constant 0 : i32
    %c0_i32_0 = arith.constant 0 : i32
    %c0_i32_1 = arith.constant 0 : i32
    return %c0_i32, %c0_i32_0 : i32, i32
  }
  func.func @transform_32(%arg0: i32) -> (i32, i32) {
    %c0_i32 = arith.constant 0 : i32
    %c0_i32_0 = arith.constant 0 : i32
    %c0_i32_1 = arith.constant 0 : i32
    return %c0_i32, %c0_i32_0 : i32, i32
  }
  func.func @transform_33(%arg0: i32) -> (i32, i32) {
    %c0_i32 = arith.constant 0 : i32
    %c0_i32_0 = arith.constant 0 : i32
    %c0_i32_1 = arith.constant 0 : i32
    return %c0_i32, %c0_i32_0 : i32, i32
  }
  func.func @transform_34(%arg0: i32) -> (i32, i32) {
    %c0_i32 = arith.constant 0 : i32
    %c0_i32_0 = arith.constant 0 : i32
    %c0_i32_1 = arith.constant 0 : i32
    return %c0_i32, %c0_i32_0 : i32, i32
  }
  func.func @transform_35(%arg0: i32) -> (i32, i32) {
    %c0_i32 = arith.constant 0 : i32
    %c0_i32_0 = arith.constant 0 : i32
    %c0_i32_1 = arith.constant 0 : i32
    return %c0_i32, %c0_i32_0 : i32, i32
  }
}

</mosaic_0001>

<bundles_post_ra>
// kernel: tile.18
= control target key start
LH: loop header
LB: loop body
LE: loop exit
PB: predicated region body
PF: predicated region fallthrough
CT: control target
= control target key end

     0   :  { %v13_v2 = vmov 0   ;;  %s30_s0 = inlined_call_operand.vmem [shape: pred[24], index: 0, kind: input, shape index: {}]   ;;  %s31_s1 = inlined_call_operand.vmem [shape: pred[2,24], index: 1, kind: output, shape index: {}]  }
   0x1   :  { %v4_v0 = vld [vmem:[%s30_s0] ss:$0 sm:$0xff] }
   0x2   :  { %v7_v1 = vand.u32 255, %v4_v0 }
   0x4   :  { %v8_v3 = vpack.c.b16 %v13_v2, %v7_v1 }
   0x6   :  { %v9_v4 = vpack.c.b8 %v13_v2, %v8_v3 }
   0x8   :  { %11 = vst [vmem:[%s31_s1] sm:$0x1] %v9_v4 }

// kernel: eq.8
= control target key start
LH: loop header
LB: loop body
LE: loop exit
PB: predicated region body
PF: predicated region fallthrough
CT: control target
= control target key end

     0   :  { %vm7_vm0 = vcmask 195584   ;;  %vm13_vm1 = vcmask 392384   ;;  %s39_s0 = inlined_call_operand.vmem [shape: s32[2,24], index: 0, kind: input, shape index: {}]   ;;  %s40_s1 = inlined_call_operand.vmem [shape: s32[48], index: 1, kind: output, shape index: {}]  }
   0x1   :  { %v4_v0 = vld [vmem:[%s39_s0] sm:$0x3]  ;;  %s22_s0 = smov 24  }
   0x2   :  { %5 = vst [vmem:[#allocation1] sm:$0x3] %v4_v0 }
   0x9   :  { %v10_v1 = vld [vmem:[#allocation1 + $0x1] sm:$0x1]   ;;  %v6_v2 = vld [vmem:[#allocation1] sm:$0x1]  }
   0xa   :  { %11 = vrot.lane.b32.xlu0 %v10_v1, %s22_s0  ;;  %8 = vst.msk [vmem:[#allocation0] sm:$0x1] %vm7_vm0, %v6_v2  }
  0x7c   :  { %v12_v3 = vpop.permute.xlu0 %11  }
  0x7d   :  { %14 = vst.msk [vmem:[#allocation0] sm:$0x1] %vm13_vm1, %v12_v3  }
  0x84   :  { %v18_v4 = vld [vmem:[#allocation0] sm:$0x1] }
  0x85   :  { %20 = vst [vmem:[%s40_s1] sm:$0x1] %v18_v4 }

// kernel: transformer_ut_forward.1
= control target key start
LH: loop header
LB: loop body
LE: loop exit
PB: predicated region body
PF: predicated region fallthrough
CT: control target
= control target key end

     0   :  { %v8083_v0 = vmov 0.0   ;;  %s8084_s3 = smov 5   ;;  %vm8085_vm0 = vmmov 0   ;;  %s8086_s10 = smov 9   ;;  %v8087_v1 = vmov 0.0|0.0   ;;  %vm169_vm1 = vcmask 1044480   ;;  %s9673_s0 = inlined_call_operand.smem [shape: u32[36], index: -1, kind: input, shape index: {}] }
   0x1   :  { %6557 = vmatprep.subr.mxu0 %v8083_v0  ;;  %s5884_s6 = sld [smem:[%s9673_s0 + %s8084_s3]]   ;;  %6559 = vmatprep.mubr.msk.f32.mxu0 %vm8085_vm0, %v8083_v0  ;;  %s8088_s14 = smov 13   ;;  %vm159_vm2 = vcmask 39936   ;;  %vm547_vm3 = vcmask 1041408   ;;  %vm370_vm4 = vcmask 1045504   ;;  %vm8090_vm5 = vmmov 1  }
   0x2   :  { %s8147_s9 = sld [smem:[%s9673_s0]]   ;;  %6576 = vmatprep.mubr.msk.f32.mxu1 %vm8085_vm0, %v8083_v0  ;;  %7167 = vmatprep.subr.bf16.mxu1 %v8087_v1  ;;  %s8089_s18 = smov 7   ;;  %vm8166_vm6 = vmpackc.low %vm547_vm3, %vm8090_vm5  ;;  %vm366_vm7 = vcmask 48128   ;;  %vm540_vm8 = vcmask 80896   ;;  %vm267_vm9 = vcmask 261120   ;;  %vm727_vm10 = vcmask 257024  }
   0x3   :  { %s5888_s13 = sld [smem:[%s9673_s0 + %s8086_s10]]   ;;  %s8091_s22 = smov 1   ;;  %720 = vst.msk [vmem:[#allocation2] sm:$0xff] %vm267_vm9, %v8083_v0  ;;  %721 = vst.msk [vmem:[#allocation2 + $0x8] sm:$0xff] %vm267_vm9, %v8083_v0  ;;  %vm732_vm11 = vcmask 261124   ;;  %vm730_vm12 = vcmask 259072   ;;  %vm736_vm13 = vcmask 261126  }
   0x4   :  { %s5892_s17 = sld [smem:[%s9673_s0 + %s8088_s14]]   ;;  %s8092_s26 = smov 2   ;;  %722 = vst.msk [vmem:[#allocation2 + $0x10] sm:$0xff] %vm267_vm9, %v8083_v0  ;;  %723 = vst.msk [vmem:[#allocation2 + $0x18] sm:$0xff] %vm267_vm9, %v8083_v0  ;;  %vm910_vm14 = vcmask 64512   ;;  %vm5671_vm3 = vcmask 254976  }
   0x5   :  { %s8161_s21 = sld [smem:[%s9673_s0 + %s8089_s18]]   ;;  %724 = vst.msk [vmem:[#allocation2 + $0x20] sm:$0xff] %vm267_vm9, %v8083_v0  ;;  %725 = vst.msk [vmem:[#allocation2 + $0x28] sm:$0xff] %vm267_vm9, %v8083_v0  ;;  %s8093_s30 = smov 15  }
   0x6   :  { %s5880_s25 = sld [smem:[%s9673_s0 + %s8091_s22]]   ;;  %s8094_s4 = smov 6   ;;  %vm8354_vm15 = vmpackc.low %vm910_vm14, %vm910_vm14 }
   0x7   :  { %v151_v2 = vld [vmem:[%s5884_s6] sm:$0x1f]  ;;  %s5881_s29 = sld [smem:[%s9673_s0 + %s8092_s26]]   ;;  %s8095_s8 = smov 11  }
   0x8   :  { %v148_v3 = vld [vmem:[%s8147_s9] sm:$0xff]  ;;  %6558 = vmatpush3.msk.msra.mxu0 %vm169_vm1, %v151_v2  ;;  %v149_v6 = vld [vmem:[%s8147_s9 + $0x8] sm:$0xff]  ;;  %v150_v13 = vld [vmem:[%s8147_s9 + $0x10] sm:$0xff]  ;;  %s5894_s3 = sld [smem:[%s9673_s0 + %s8093_s30]]   ;;  %s8096_s12 = smov 10   ;;  %vm1030_vm1 = vcmask 392192  }
   0x9   :  { %v358_v4 = vld [vmem:[%s5888_s13] sm:$0x3f]  ;;  %6560 = vmatmul.mubr.msk.f32.vlgmr.msra.gmra.mrb[0].mxu0 %vm159_vm2, %v148_v3  ;;  %6585 = vmatprep.subr.mxu0 %v8083_v0  ;;  %s5885_s7 = sld [smem:[%s9673_s0 + %s8094_s4]]   ;;  %s8097_s16 = smov 14  }
   0xa   :  { %6586 = vmatpush3.msk.msra.mxu0 %vm370_vm4, %v358_v4  ;;  %6562 = vmatprep.mubr.msk.f32.mxu0 %vm8085_vm0, %v8083_v0  ;;  %v531_v7 = vld [vmem:[%s5892_s17] sm:$0xff]  ;;  %v532_v8 = vld [vmem:[%s5892_s17 + $0x8] sm:$0x3]  ;;  %s5890_s11 = sld [smem:[%s9673_s0 + %s8095_s8]]   ;;  %s8098_s20 = smov 17  }
   0xb   :  { %v7179_v9 = vpack.c.bf16 %v532_v8, %v531_v7  ;;  %v256_v10 = vld [vmem:[%s8161_s21] sm:$0xff]  ;;  %v257_v11 = vld [vmem:[%s8161_s21 + $0x8] sm:$0xff]  ;;  %v258_v17 = vld [vmem:[%s8161_s21 + $0x10] sm:$0xff]  ;;  %s5889_s15 = sld [smem:[%s9673_s0 + %s8096_s12]]   ;;  %s8099_s24 = smov 8  }
   0xc   :  { %v7168_v12 = vpack.c.bf16 %v257_v11, %v256_v10  ;;  %v357_v14 = vld [vmem:[%s5880_s25] sm:$0xff]  ;;  %v259_v18 = vld [vmem:[%s8161_s21 + $0x18] sm:$0xff]  ;;  %s5893_s19 = sld [smem:[%s9673_s0 + %s8097_s16]]   ;;  %s8100_s28 = smov 3  }
   0xd   :  { %6563 = vmatmul.mubr.msk.f32.gmra.mrb[2].mxu0 %vm159_vm2, %v149_v6  ;;  %7181 = vmatprep.subr.msk.bf16.mxu0 %vm8166_vm6, %v7179_v9  ;;  %v529_v15 = vld [vmem:[%s5881_s29] sm:$0xff]  ;;  %v530_v16 = vld [vmem:[%s5881_s29 + $0x8] sm:$0xf]  ;;  %v7171_v19 = vpack.c.bf16 %v259_v18, %v258_v17  ;;  %s8239_s23 = sld [smem:[%s9673_s0 + %s8098_s20]]   ;;  %s8101_s2 = smov 12  }
   0xe   :  { %6565 = vmatprep.mubr.msk.f32.mxu0 %vm8085_vm0, %v8083_v0  ;;  %7169 = vmatpush3.bf16.msra.mxu1 %v7168_v12  ;;  %v628_v20 = vld [vmem:[%s5894_s3] sm:$0xff]  ;;  %v629_v21 = vld [vmem:[%s5894_s3 + $0x8] sm:$0xff]  ;;  %v630_v23 = vld [vmem:[%s5894_s3 + $0x10] sm:$0xff]  ;;  %s5887_s27 = sld [smem:[%s9673_s0 + %s8099_s24]]   ;;  %s8102_s6 = smov 16  }
   0xf   :  { %7170 = vmatprep.subr.bf16.mxu1 %v8087_v1  ;;  %v7185_v22 = vpack.c.bf16 %v629_v21, %v628_v20  ;;  %v631_v24 = vld [vmem:[%s5894_s3 + $0x18] sm:$0xff]  ;;  %v5915_v26 = vld [vmem:[%s5885_s7] ss:$0 sm:$0xff]  ;;  %s8251_s1 = sld [smem:[%s9673_s0 + %s8100_s28]]   ;;  %s8103_s10 = smov 18  }
  0x10   :  { %v7189_v25 = vpack.c.bf16 %v631_v24, %v630_v23  ;;  %v445_v27 = vld [vmem:[%s5890_s11] sm:$0xff]  ;;  %v446_v28 = vld [vmem:[%s5890_s11 + $0x8] sm:$0xff]  ;;  %v447_v34 = vld [vmem:[%s5890_s11 + $0x10] sm:$0xff]  ;;  %s5891_s5 = sld [smem:[%s9673_s0 + %s8101_s2]]   ;;  %s8104_s14 = smov 96  }
  0x11   :  { %6566 = vmatmul.mubr.msk.f32.gmra.mrb[4].mxu0 %vm159_vm2, %v150_v13  ;;  %v7174_v32 = vpack.c.bf16 %v446_v28, %v445_v27  ;;  %v448_v35 = vld [vmem:[%s5890_s11 + $0x18] sm:$0xff]  ;;  %v5924_v44 = vld [vmem:[%s5889_s15] ss:$0 sm:$0xff]  ;;  %s5895_s9 = sld [smem:[%s9673_s0 + %s8102_s6]]   ;;  %s8105_s15 = smov 88   ;;  %vm5667_vm2 = vcmask 1040384  }
  0x12   :  { %6587 = vmatprep.mubr.msk.f32.mxu0 %vm8085_vm0, %v8083_v0  ;;  %7172 = vmatpush3.bf16.msra.mxu1 %v7171_v19  ;;  %v7177_v39 = vpack.c.bf16 %v448_v35, %v447_v34  ;;  %v5929_v49 = vld [vmem:[%s5893_s19] ss:$0 sm:$0xff]  ;;  %s8299_s13 = sld [smem:[%s9673_s0 + %s8103_s10]]   ;;  %s8106_s16 = smov 120  }
  0x13   :  { %7173 = vmatprep.subr.bf16.mxu1 %v8087_v1  ;;  %v763_v57 = vld [vmem:[%s8239_s23] sm:$0xff]  ;;  %v764_v58 = vld [vmem:[%s8239_s23 + $0x8] sm:$0xff]  ;;  %v765_v60 = vld [vmem:[%s8239_s23 + $0x10] sm:$0xff]  ;;  %s8107_s17 = smov 4   ;;  %s8108_s21 = smov 64  }
  0x14   :  { %v7193_v59 = vpack.c.bf16 %v764_v58, %v763_v57  ;;  %v766_v61 = vld [vmem:[%s8239_s23 + $0x18] sm:$0xff]  ;;  %v5920_v63 = vld [vmem:[%s5887_s27] ss:$0 sm:$0xff]  ;;  %s8401_s20 = sld [smem:[%s9673_s0 + %s8107_s17]]   ;;  %s8109_s22 = smov 80  }
  0x15   :  { %6588 = vmatmul.mubr.msk.f32.vlgmr.msra.gmra.mrb[6].mxu0 %vm366_vm7, %v357_v14  ;;  %v7197_v62 = vpack.c.bf16 %v766_v61, %v765_v60  ;;  %v746_v23 = vld [vmem:[%s8251_s1 + $0x8] sm:$0xff]  ;;  %v748_v28 = vld [vmem:[%s8251_s1 + $0x18] sm:$0xff]  ;;  %s8110_s24 = smov 112   ;;  %s8111_s25 = smov 56  }
  0x16   :  { %7184 = vmatpush3.bf16.msk.msra.mxu0 %vm8166_vm6, %v7179_v9  ;;  %6605 = vmatprep.mubr.msk.f32.mxu0 %vm540_vm8, %v529_v15  ;;  %v745_v9 = vld [vmem:[%s8251_s1] sm:$0xff]  ;;  %s8112_s26 = smov 19   ;;  %s8113_s30 = smov 72  }
  0x17   :  { %7186 = vmatprep.subr.bf16.mxu0 %v7185_v22  ;;  %v5927_v12 = vld [vmem:[%s5891_s5] ss:$0 sm:$0xff]  ;;  %s8536_s29 = sld [smem:[%s9673_s0 + %s8112_s26]]   ;;  %s8115_s2 = smov 48  }
  0x18   :  { %v5933_v18 = vld [vmem:[%s5895_s9] ss:$0 sm:$0xff]  ;;  %s8116_s3 = smov 40   ;;  %s8117_s4 = smov 20  }
  0x19   :  { %6606 = vmatmul.mubr.msk.f32.vlgmr.msra.gmra.mrb[8].mxu0 %vm540_vm8, %v530_v16  ;;  %s8807_s7 = sld [smem:[%s9673_s0 + %s8117_s4]]   ;;  %s8118_s8 = smov 21  }
  0x1a   :  { %7188 = vmatpush3.bf16.msra.mxu0 %v7185_v22  ;;  %s8855_s11 = sld [smem:[%s9673_s0 + %s8118_s8]]   ;;  %s8119_s12 = smov 23  }
  0x1b   :  { %7190 = vmatprep.subr.bf16.mxu0 %v7189_v25  ;;  %s8864_s19 = sld [smem:[%s9673_s0 + %s8119_s12]]   ;;  %s8120_s26 = smov 25  }
  0x1c   :  { %s8871_s4 = sld [smem:[%s9673_s0 + %s8120_s26]]   ;;  %s8121_s5 = smov 26  }
  0x1d   :  { %s8876_s9 = sld [smem:[%s9673_s0 + %s8121_s5]]   ;;  %s8122_s10 = smov 22  }
  0x1e   :  { %7192 = vmatpush3.bf16.msra.mxu0 %v7189_v25  ;;  %s8906_s18 = sld [smem:[%s9673_s0 + %s8122_s10]]   ;;  %s8123_s26 = smov 24  }
  0x1f   :  { %s8918_s5 = sld [smem:[%s9673_s0 + %s8123_s26]]   ;;  %s8124_s6 = smov 27  }
  0x20   :  { %s8967_s12 = sld [smem:[%s9673_s0 + %s8124_s6]]   ;;  %s8131_s28 = smov 32  }
  0x21   :  { %s5911_s8 = sld [smem:[%s9673_s0 + %s8131_s28]]   ;;  %s8132_s10 = smov 35  }
  0x22   :  { %s5914_s17 = sld [smem:[%s9673_s0 + %s8132_s10]]  }
  0xdc   :  { %v239_v29 = vpop.f32.mrb[0].mxu0 }
  0xdd   :  { %v240_v30 = vadd.f32 %v5915_v26, %v239_v29  ;;  %v6561_v31 = vpop.f32.mrb[1].mxu0 }
  0xde   :  { %v749_v31 = vld [vmem:[%s8251_s1 + $0x20] sm:$0xff] }
  0xdf   :  { %v253_v33 = vmax.f32 %v240_v30, 0.0 }
  0xe0   :  { %v244_v36 = vpop.f32.mrb[2].mxu0 }
  0xe1   :  { %v245_v37 = vadd.f32 %v5915_v26, %v244_v36  ;;  %v6564_v38 = vpop.f32.mrb[3].mxu0  ;;  %6577 = vmatmul.mubr.msk.f32.vlgmr.msra.gmra.mrb[0].mxu1 %vm267_vm9, %v253_v33  ;;  %v750_v36 = vld [vmem:[%s8251_s1 + $0x28] sm:$0xff] }
  0xe2   :  { %7175 = vmatpush3.bf16.msra.mxu1 %v7174_v32  ;;  %6579 = vmatprep.mubr.msk.f32.mxu1 %vm8085_vm0, %v8083_v0  ;;  %v5936_v38 = vld [vmem:[%s8299_s13] ss:$0 sm:$0xff] }
  0xe3   :  { %v254_v40 = vmax.f32 %v245_v37, 0.0  ;;  %7176 = vmatprep.subr.bf16.mxu1 %v8087_v1 }
  0xe4   :  { %v249_v41 = vpop.f32.mrb[4].mxu0 }
  0xe5   :  { %v250_v42 = vadd.f32 %v5915_v26, %v249_v41  ;;  %v6567_v43 = vpop.f32.mrb[5].mxu0  ;;  %6580 = vmatmul.mubr.msk.f32.gmra.mrb[2].mxu1 %vm267_vm9, %v254_v40  ;;  %v747_v26 = vld [vmem:[%s8251_s1 + $0x10] sm:$0xff]  ;;  %s8114_s1 = smov 104  }
  0xe6   :  { %6582 = vmatprep.mubr.msk.f32.mxu1 %vm8085_vm0, %v8083_v0  ;;  %7178 = vmatpush3.bf16.msra.mxu1 %v7177_v39 }
  0xe7   :  { %v255_v45 = vmax.f32 %v250_v42, 0.0  ;;  %7194 = vmatprep.subr.bf16.mxu1 %v7193_v59 }
  0xe8   :  { %v440_v46 = vpop.f32.mrb[6].mxu0 }
  0xe9   :  { %v441_v47 = vadd.f32 %v5924_v44, %v440_v46  ;;  %6583 = vmatmul.mubr.msk.f32.gmra.mrb[4].mxu1 %vm267_vm9, %v255_v45  ;;  %v6589_v48 = vpop.f32.mrb[7].mxu0 }
  0xea   :  { %6598 = vmatprep.mubr.msk.f32.mxu1 %vm8085_vm0, %v8083_v0 }
  0xeb   :  { %v444_v50 = vmax.f32 %v441_v47, 0.0 }
  0xec   :  { %v6607_v51 = vpop.f32.mrb[8].mxu0 }
  0xed   :  { %v623_v52 = vadd.f32 %v6607_v51, %v5929_v49  ;;  %6599 = vmatmul.mubr.msk.f32.vlgmr.msra.gmra.mrb[6].mxu1 %vm267_vm9, %v444_v50  ;;  %v617_v53 = vpop.f32.mrb[9].mxu0 }
  0xee   :  { %v618_v54 = vadd.f32 %v5929_v49, %v617_v53  ;;  %7196 = vmatpush3.bf16.msra.mxu1 %v7193_v59 }
  0xef   :  { %v627_v56 = vmax.f32 %v623_v52, 0.0  ;;  %7198 = vmatprep.subr.bf16.mxu1 %v7197_v62 }
  0xf0   :  { %v626_v55 = vmax.f32 %v618_v54, 0.0 }
  0xf2   :  { %6616 = vmatprep.mubr.msk.f32.mxu0 %vm267_vm9, %v626_v55  ;;  %7200 = vmatpush3.bf16.msra.mxu1 %v7197_v62 }
  0xf3   :  { %6617 = vmatmul.mubr.msk.f32.vlgmr.msra.gmra.mrb[10].mxu0 %vm267_vm9, %v627_v56 }
 0x1b4   :  { %v343_v2 = vpop.f32.mrb[0].mxu1 }
 0x1b5   :  { %v344_v3 = vadd.f32 %v5920_v63, %v343_v2  ;;  %v6578_v4 = vpop.f32.mrb[1].mxu1 }
 0x1b7   :  { %726 = vst.msk [vmem:[#allocation2] sm:$0xff] %vm267_vm9, %v344_v3 }
 0x1b8   :  { %v348_v5 = vpop.f32.mrb[2].mxu1 }
 0x1b9   :  { %v349_v6 = vadd.f32 %v5920_v63, %v348_v5  ;;  %v6581_v7 = vpop.f32.mrb[3].mxu1 }
 0x1bb   :  { %728 = vst.msk [vmem:[#allocation2 + $0x8] sm:$0xf] %vm727_vm10, %v349_v6 }
 0x1bc   :  { %733 = vst.msk [vmem:[#allocation2 + $0x14] sm:$0xf0] %vm732_vm11, %v349_v6  ;;  %v353_v8 = vpop.f32.mrb[4].mxu1 }
 0x1bd   :  { %v354_v10 = vadd.f32 %v5920_v63, %v353_v8  ;;  %v6584_v11 = vpop.f32.mrb[5].mxu1 }
 0x1be   :  { %v739_v13 = vld [vmem:[#allocation2] sm:$0xff] }
 0x1bf   :  { %734 = vst.msk [vmem:[#allocation2 + $0x1c] sm:$0xff] %vm267_vm9, %v354_v10  ;;  %v8264_v14 = vadd.f32 %v745_v9, %v739_v13 }
 0x1c0   :  { %v525_v15 = vpop.f32.mrb[6].mxu1 }
 0x1c1   :  { %v526_v16 = vadd.f32 %v5927_v12, %v525_v15  ;;  %v6600_v17 = vpop.f32.mrb[7].mxu1  ;;  %6627 = vmatprep.mubr.msk.f32.mxu1 %vm267_vm9, %v8264_v14 }
 0x1c3   :  { %729 = vst.msk [vmem:[#allocation2 + $0xc] sm:$0xf] %vm727_vm10, %v526_v16 }
 0x1c4   :  { %735 = vst.msk [vmem:[#allocation2 + $0x20] sm:$0xf0] %vm732_vm11, %v526_v16 }
 0x1c6   :  { %v6618_v19 = vpop.f32.mrb[10].mxu0  ;;  %v742_v27 = vld [vmem:[#allocation2 + $0x18] sm:$0xff] }
 0x1c7   :  { %v717_v20 = vadd.f32 %v6618_v19, %v5933_v18  ;;  %v711_v21 = vpop.f32.mrb[11].mxu0  ;;  %v8281_v33 = vadd.f32 %v748_v28, %v742_v27 }
 0x1c8   :  { %v712_v22 = vadd.f32 %v5933_v18, %v711_v21 }
 0x1c9   :  { %738 = vst.msk [vmem:[#allocation2 + $0x2a] sm:$0xf] %vm727_vm10, %v717_v20 }
 0x1ca   :  { %731 = vst.msk [vmem:[#allocation2 + $0x10] sm:$0x3f] %vm730_vm12, %v712_v22  ;;  %v740_v24 = vld [vmem:[#allocation2 + $0x8] sm:$0xff] }
 0x1cb   :  { %737 = vst.msk [vmem:[#allocation2 + $0x22] sm:$0xc0] %vm736_vm13, %v712_v22  ;;  %v8272_v25 = vadd.f32 %v746_v23, %v740_v24  ;;  %v743_v30 = vld [vmem:[#allocation2 + $0x20] sm:$0xff]  ;;  %v8404_v24 = vld [vmem:[%s8401_s20 + $0x8] sm:$0xff] }
 0x1cc   :  { %v8285_v34 = vadd.f32 %v749_v31, %v743_v30 }
 0x1cd   :  { %6628 = vmatmul.mubr.msk.f32.vlgmr.msra.gmra.mrb[8].mxu1 %vm267_vm9, %v8272_v25 }
 0x1d1   :  { %v741_v29 = vld [vmem:[#allocation2 + $0x10] sm:$0xff] }
 0x1d2   :  { %v8279_v32 = vadd.f32 %v747_v26, %v741_v29  ;;  %v744_v35 = vld [vmem:[#allocation2 + $0x28] sm:$0xff]  ;;  %v8407_v26 = vld [vmem:[%s8401_s20] sm:$0xff] }
 0x1d3   :  { %v8292_v37 = vadd.f32 %v750_v36, %v744_v35  ;;  %v8413_v35 = vld [vmem:[%s8401_s20 + $0x10] sm:$0xff] }
 0x1d4   :  { %6630 = vmatprep.mubr.msk.f32.mxu1 %vm267_vm9, %v8279_v32 }
 0x1d5   :  { %6631 = vmatmul.mubr.msk.f32.gmra.mrb[10].mxu1 %vm267_vm9, %v8281_v33 }
 0x1d6   :  { %6633 = vmatprep.mubr.msk.f32.mxu1 %vm267_vm9, %v8285_v34 }
 0x1d9   :  { %6634 = vmatmul.mubr.msk.f32.gmra.mrb[12].mxu1 %vm267_vm9, %v8292_v37 }
 0x2a0   :  { %v6629_v39 = vpop.f32.mrb[8].mxu1 }
 0x2a1   :  { %v8302_v40 = vadd.f32 %v6629_v39, %v5936_v38  ;;  %v858_v41 = vpop.f32.mrb[9].mxu1  ;;  %v8417_v39 = vld [vmem:[%s8401_s20 + $0x18] sm:$0xff] }
 0x2a2   :  { %v8304_v42 = vadd.f32 %v5936_v38, %v858_v41 }
 0x2a4   :  { %6648 = vmatprep.mubr.msk.f32.mxu0 %vm910_vm14, %v8304_v42  ;;  %v8310_v43 = vpack.i.bf16 %v8302_v40, %v8304_v42 }
 0x2a6   :  { %7592 = vrot.lane.b32.xlu0 %v8310_v43, %s8104_s14 }
 0x2a8   :  { %v6632_v44 = vpop.f32.mrb[10].mxu1 }
 0x2a9   :  { %v8314_v45 = vadd.f32 %v6632_v44, %v5936_v38  ;;  %v868_v46 = vpop.f32.mrb[11].mxu1 }
 0x2aa   :  { %v8316_v47 = vadd.f32 %v5936_v38, %v868_v46  ;;  %v8421_v46 = vld [vmem:[%s8401_s20 + $0x20] sm:$0xff] }
 0x2ac   :  { %v6635_v48 = vpop.f32.mrb[12].mxu1  ;;  %v8320_v49 = vpack.i.bf16 %v8314_v45, %v8316_v47 }
 0x2ad   :  { %v8322_v50 = vadd.f32 %v6635_v48, %v5936_v38  ;;  %v878_v51 = vpop.f32.mrb[13].mxu1 }
 0x2ae   :  { %v8324_v52 = vadd.f32 %v5936_v38, %v878_v51  ;;  %7597 = vrot.lane.b32.xlu0 %v8320_v49, %s8104_s14 }
 0x2b0   :  { %v8330_v53 = vpack.i.bf16 %v8322_v50, %v8324_v52 }
 0x2b2   :  { %7602 = vrot.lane.b32.xlu1 %v8330_v53, %s8104_s14  ;;  %7612 = vrot.lane.b32.xlu0 %v8320_v49, %s8105_s15 }
 0x2b6   :  { %7607 = vrot.lane.b32.xlu1 %v8310_v43, %s8105_s15  ;;  %1353 = vrot.lane.b32.xlu0 %v8304_v42, %s8106_s16 }
 0x2ba   :  { %7617 = vrot.lane.b32.xlu1 %v8330_v53, %s8105_s15  ;;  %1357 = vrot.lane.b32.xlu0 %v8316_v47, %s8106_s16 }
 0x2be   :  { %1355 = vrot.lane.b32.xlu1 %v8302_v40, %s8106_s16  ;;  %1361 = vrot.lane.b32.xlu0 %v8324_v52, %s8106_s16 }
 0x2c2   :  { %1359 = vrot.lane.b32.xlu1 %v8314_v45, %s8106_s16 }
 0x2c6   :  { %1363 = vrot.lane.b32.xlu1 %v8322_v50, %s8106_s16 }
 0x318   :  { %v7593_v54 = vpop.permute.xlu0 %7592 }
 0x319   :  { %v7595_v55 = vunpack.i.h.bf16 %v7593_v54  ;;  %v7594_v56 = vunpack.i.l.bf16 %v7593_v54 }
 0x31b   :  { %v7201_v58 = vpack.c.bf16 %v7595_v55, %v7594_v56  ;;  %v8426_v55 = vld [vmem:[%s8401_s20 + $0x28] sm:$0xff] }
 0x31d   :  { %7203 = vmatprep.subr.msk.bf16.mxu0 %vm8354_vm15, %v7201_v58 }
 0x31e   :  { %7206 = vmatpush3.bf16.xpose.msk.msra.mxu0 %vm8354_vm15, %v7201_v58 }
 0x320   :  { %v7598_v59 = vpop.permute.xlu0 %7597 }
 0x321   :  { %v7600_v60 = vunpack.i.h.bf16 %v7598_v59  ;;  %v7599_v61 = vunpack.i.l.bf16 %v7598_v59 }
 0x323   :  { %v7207_v62 = vpack.c.bf16 %v7600_v60, %v7599_v61 }
 0x324   :  { %v7603_v63 = vpop.permute.xlu1 %7602  ;;  %v7613_v9 = vpop.permute.xlu0 %7612 }
 0x325   :  { %v7605_v2 = vunpack.i.h.bf16 %v7603_v63  ;;  %v7604_v3 = vunpack.i.l.bf16 %v7603_v63  ;;  %7209 = vmatprep.subr.msk.bf16.mxu0 %vm8354_vm15, %v7207_v62  ;;  %v7615_v10 = vunpack.i.h.bf16 %v7613_v9  ;;  %v7614_v11 = vunpack.i.l.bf16 %v7613_v9 }
 0x326   :  { %7212 = vmatpush3.bf16.xpose.msk.msra.mxu0 %vm8354_vm15, %v7207_v62 }
 0x327   :  { %v7213_v4 = vpack.c.bf16 %v7605_v2, %v7604_v3  ;;  %v7237_v12 = vpack.c.bf16 %v7615_v10, %v7614_v11 }
 0x328   :  { %v7608_v5 = vpop.permute.xlu1 %7607  ;;  %v1354_v17 = vpop.permute.xlu0 %1353 }
 0x329   :  { %v7610_v6 = vunpack.i.h.bf16 %v7608_v5  ;;  %v7609_v7 = vunpack.i.l.bf16 %v7608_v5  ;;  %7215 = vmatprep.subr.msk.bf16.mxu0 %vm8354_vm15, %v7213_v4 }
 0x32b   :  { %v7231_v8 = vpack.c.bf16 %v7610_v6, %v7609_v7 }
 0x32c   :  { %v7618_v13 = vpop.permute.xlu1 %7617  ;;  %v1358_v20 = vpop.permute.xlu0 %1357 }
 0x32d   :  { %v7620_v15 = vunpack.i.h.bf16 %v7618_v13  ;;  %v7619_v16 = vunpack.i.l.bf16 %v7618_v13 }
 0x32e   :  { %7218 = vmatpush3.bf16.xpose.msk.msra.mxu0 %vm8354_vm15, %v7213_v4 }
 0x32f   :  { %7233 = vmatprep.subr.msk.bf16.mxu0 %vm8354_vm15, %v7231_v8  ;;  %v7243_v18 = vpack.c.bf16 %v7620_v15, %v7619_v16 }
 0x330   :  { %v1356_v19 = vpop.permute.xlu1 %1355  ;;  %v1362_v22 = vpop.permute.xlu0 %1361 }
 0x334   :  { %v1360_v21 = vpop.permute.xlu1 %1359 }
 0x335   :  { %6649 = vmatmul.mubr.msk.f32.vlgmr.msra.gmra.mrb[12].mxu0 %vm910_vm14, %v8302_v40 }
 0x336   :  { %6651 = vmatprep.mubr.msk.f32.mxu0 %vm910_vm14, %v8316_v47  ;;  %7236 = vmatpush3.bf16.xpose.msk.msra.mxu0 %vm8354_vm15, %v7231_v8 }
 0x337   :  { %7239 = vmatprep.subr.msk.bf16.mxu0 %vm8354_vm15, %v7237_v12 }
 0x338   :  { %v1364_v23 = vpop.permute.xlu1 %1363 }
 0x339   :  { %6652 = vmatmul.mubr.msk.f32.gmra.mrb[14].mxu0 %vm910_vm14, %v8314_v45 }
 0x33a   :  { %6654 = vmatprep.mubr.msk.f32.mxu0 %vm910_vm14, %v8324_v52 }
 0x33d   :  { %6655 = vmatmul.mubr.msk.f32.gmra.mrb[16].mxu0 %vm910_vm14, %v8322_v50 }
 0x33e   :  { %7242 = vmatpush3.bf16.xpose.msk.msra.mxu0 %vm8354_vm15, %v7237_v12  ;;  %6701 = vmatprep.mubr.msk.f32.mxu0 %vm910_vm14, %v1354_v17 }
 0x33f   :  { %7245 = vmatprep.subr.msk.bf16.mxu0 %vm8354_vm15, %v7243_v18 }
 0x346   :  { %7248 = vmatpush3.bf16.xpose.msk.msra.mxu0 %vm8354_vm15, %v7243_v18 }
 0x34d   :  { %6702 = vmatmul.mubr.msk.f32.vlgmr.msra.gmra.mrb[18].mxu0 %vm910_vm14, %v1356_v19 }
 0x34e   :  { %6704 = vmatprep.mubr.msk.f32.mxu0 %vm910_vm14, %v1358_v20 }
 0x351   :  { %6705 = vmatmul.mubr.msk.f32.gmra.mrb[20].mxu0 %vm910_vm14, %v1360_v21 }
 0x352   :  { %6707 = vmatprep.mubr.msk.f32.mxu0 %vm910_vm14, %v1362_v22 }
 0x355   :  { %6708 = vmatmul.mubr.msk.f32.gmra.mrb[22].mxu0 %vm910_vm14, %v1364_v23 }
 0x408   :  { %v6650_v27 = vpop.f32.mrb[12].mxu0 }
 0x409   :  { %v1007_v28 = vadd.f32 %v6650_v27, %v8404_v24  ;;  %v1001_v29 = vpop.f32.mrb[13].mxu0 }
 0x40a   :  { %v1002_v30 = vadd.f32 %v1001_v29, %v8407_v26 }
 0x40b   :  { %v1034_v31 = vsel %vm1030_vm1, %v1007_v28, -inf }
 0x40c   :  { %1035 = vmax.xlane.f32.xlu1 %v1034_v31  ;;  %v6653_v36 = vpop.f32.mrb[14].mxu0  ;;  %v1031_v38 = vsel %vm1030_vm1, %v1002_v30, -inf }
 0x40d   :  { %v1011_v41 = vpop.f32.mrb[15].mxu0  ;;  %1032 = vmax.xlane.f32.xlu0 %v1031_v38  ;;  %v1017_v48 = vadd.f32 %v6653_v36, %v8417_v39 }
 0x40e   :  { %v1012_v44 = vadd.f32 %v1011_v41, %v8413_v35 }
 0x40f   :  { %v1040_v61 = vsel %vm1030_vm1, %v1017_v48, -inf }
 0x410   :  { %v6656_v51 = vpop.f32.mrb[16].mxu0  ;;  %v1037_v54 = vsel %vm1030_vm1, %v1012_v44, -inf }
 0x411   :  { %v1021_v56 = vpop.f32.mrb[17].mxu0  ;;  %1038 = vmax.xlane.f32.xlu0 %v1037_v54  ;;  %v1027_v59 = vadd.f32 %v6656_v51, %v8426_v55 }
 0x412   :  { %v1022_v58 = vadd.f32 %v1021_v56, %v8421_v46 }
 0x413   :  { %v1046_v62 = vsel %vm1030_vm1, %v1027_v59, -inf }
 0x414   :  { %v1043_v60 = vsel %vm1030_vm1, %v1022_v58, -inf }
 0x415   :  { %1044 = vmax.xlane.f32.xlu1 %v1043_v60  ;;  %1041 = vmax.xlane.f32.xlu0 %v1040_v61 }
 0x419   :  { %1047 = vmax.xlane.f32.xlu0 %v1046_v62 }
 0x420   :  { %v8433_v63 = vpop.f32.mrb[18].mxu0 }
 0x421   :  { %v8435_v2 = vpop.f32.mrb[19].mxu0 }
 0x424   :  { %v8437_v3 = vpop.f32.mrb[20].mxu0 }
 0x425   :  { %v8439_v4 = vpop.f32.mrb[21].mxu0 }
 0x426   :  { %7622 = vrot.lane.b32.xlu1 %v8310_v43, %s8108_s21 }
 0x428   :  { %v8443_v5 = vpop.f32.mrb[22].mxu0 }
 0x429   :  { %v8445_v6 = vpop.f32.mrb[23].mxu0 }
 0x499   :  { %v1036_v7 = vpop.xlane.xlu1 %1035 }
 0x49a   :  { %v1050_v8 = vsub.f32 %v1007_v28, %v1036_v7  ;;  %v1033_v9 = vpop.xlane.xlu0 %1032  ;;  %v8495_v7 = vadd.f32 %v8433_v63, %v8404_v24 }
 0x49b   :  { %v1049_v10 = vsub.f32 %v1002_v30, %v1033_v9  ;;  %v8503_v9 = vadd.f32 %v8445_v6, %v8421_v46 }
 0x49c   :  { %v1057_v11 = vmul.f32 1.442695, %v1050_v8  ;;  %v8499_v8 = vadd.f32 %v8435_v2, %v8407_v26 }
 0x49d   :  { %v1055_v12 = vmul.f32 1.442695, %v1049_v10  ;;  %v1499_v10 = vsel %vm1030_vm1, %v8495_v7, -inf  ;;  %v1508_v2 = vsel %vm1030_vm1, %v8503_v9, -inf }
 0x49e   :  { %7831 = vpow2.f32 %v1057_v11  ;;  %v1039_v13 = vpop.xlane.xlu0 %1038  ;;  %v8509_v11 = vadd.f32 %v8439_v4, %v8413_v35  ;;  %v1496_v63 = vsel %vm1030_vm1, %v8499_v8, -inf  ;;  %v8523_v4 = vadd.f32 %v8443_v5, %v8426_v55 }
 0x49f   :  { %7833 = vpow2.f32 %v1055_v12  ;;  %v1051_v15 = vsub.f32 %v1012_v44, %v1039_v13  ;;  %v8517_v12 = vadd.f32 %v8437_v3, %v8417_v39 }
 0x4a0   :  { %v1502_v6 = vsel %vm1030_vm1, %v8509_v11, -inf }
 0x4a1   :  { %v1059_v16 = vmul.f32 1.442695, %v1051_v15  ;;  %v1505_v13 = vsel %vm1030_vm1, %v8517_v12, -inf  ;;  %v1511_v15 = vsel %vm1030_vm1, %v8523_v4, -inf }
 0x4a2   :  { %v1045_v17 = vpop.xlane.xlu1 %1044  ;;  %v1042_v18 = vpop.xlane.xlu0 %1041 }
 0x4a3   :  { %7835 = vpow2.f32 %v1059_v16  ;;  %v1053_v19 = vsub.f32 %v1022_v58, %v1045_v17  ;;  %v1052_v20 = vsub.f32 %v1017_v48, %v1042_v18 }
 0x4a5   :  { %v1063_v21 = vmul.f32 1.442695, %v1053_v19  ;;  %v1061_v22 = vmul.f32 1.442695, %v1052_v20 }
 0x4a6   :  { %v7623_v23 = vpop.permute.xlu1 %7622  ;;  %v1048_v27 = vpop.xlane.xlu0 %1047 }
 0x4a7   :  { %7837 = vpow2.f32 %v1063_v21  ;;  %v7625_v28 = vunpack.i.h.bf16 %v7623_v23  ;;  %v7624_v29 = vunpack.i.l.bf16 %v7623_v23  ;;  %v1054_v30 = vsub.f32 %v1027_v59, %v1048_v27 }
 0x4a8   :  { %v8447_v31 = vpop.eup %7831  ;;  %7839 = vpow2.f32 %v1061_v22 }
 0x4a9   :  { %v8449_v36 = vpop.eup %7833  ;;  %v1065_v38 = vmul.f32 1.442695, %v1054_v30  ;;  %v1070_v41 = vsel %vm1030_vm1, %v8447_v31, 0.0  ;;  %v7219_v44 = vpack.c.bf16 %v7625_v28, %v7624_v29 }
 0x4aa   :  { %1071 = vadd.xlane.f32.xlu0 %v1070_v41  ;;  %v1067_v48 = vsel %vm1030_vm1, %v8449_v36, 0.0 }
 0x4ab   :  { %7841 = vpow2.f32 %v1065_v38  ;;  %7220 = vmatprep.subr.bf16.mxu1 %v7219_v44  ;;  %1068 = vadd.xlane.f32.xlu1 %v1067_v48 }
 0x4ac   :  { %7222 = vmatpush3.bf16.msra.mxu1 %v7219_v44 }
 0x4ad   :  { %v8455_v51 = vpop.eup %7835 }
 0x4ae   :  { %v1073_v54 = vsel %vm1030_vm1, %v8455_v51, 0.0 }
 0x4af   :  { %1074 = vadd.xlane.f32.xlu1 %v1073_v54 }
 0x4b1   :  { %v8459_v56 = vpop.eup %7837 }
 0x4b2   :  { %v8461_v58 = vpop.eup %7839  ;;  %v1079_v59 = vsel %vm1030_vm1, %v8459_v56, 0.0 }
 0x4b3   :  { %1080 = vadd.xlane.f32.xlu1 %v1079_v59  ;;  %v1076_v60 = vsel %vm1030_vm1, %v8461_v58, 0.0 }
 0x4b4   :  { %1077 = vadd.xlane.f32.xlu0 %v1076_v60 }
 0x4b5   :  { %v8467_v61 = vpop.eup %7841 }
 0x4b6   :  { %v1082_v62 = vsel %vm1030_vm1, %v8467_v61, 0.0 }
 0x4b8   :  { %1083 = vadd.xlane.f32.xlu0 %v1082_v62 }
 0x4c4   :  { %7632 = vrot.lane.b32.xlu1 %v8330_v53, %s8108_s21 }
 0x4c8   :  { %7637 = vrot.lane.b32.xlu1 %v8310_v43, %s8109_s22 }
 0x4cc   :  { %7647 = vrot.lane.b32.xlu1 %v8330_v53, %s8109_s22 }
 0x4ce   :  { %7627 = vrot.lane.b32.xlu0 %v8320_v49, %s8108_s21 }
 0x4d0   :  { %1814 = vrot.lane.b32.xlu1 %v8302_v40, %s8110_s24 }
 0x4d2   :  { %7642 = vrot.lane.b32.xlu0 %v8320_v49, %s8109_s22 }
 0x4d4   :  { %1818 = vrot.lane.b32.xlu1 %v8314_v45, %s8110_s24 }
 0x4d6   :  { %1812 = vrot.lane.b32.xlu0 %v8304_v42, %s8110_s24 }
 0x4d8   :  { %1822 = vrot.lane.b32.xlu1 %v8322_v50, %s8110_s24 }
 0x4da   :  { %1816 = vrot.lane.b32.xlu0 %v8316_v47, %s8110_s24 }
 0x4de   :  { %1820 = vrot.lane.b32.xlu0 %v8324_v52, %s8110_s24 }
 0x4fc   :  { %1500 = vmax.xlane.f32.xlu1 %v1499_v10 }
 0x4fd   :  { %1497 = vmax.xlane.f32.xlu0 %v1496_v63 }
 0x500   :  { %1509 = vmax.xlane.f32.xlu1 %v1508_v2 }
 0x501   :  { %1503 = vmax.xlane.f32.xlu0 %v1502_v6 }
 0x505   :  { %1506 = vmax.xlane.f32.xlu0 %v1505_v13 }
 0x509   :  { %1512 = vmax.xlane.f32.xlu0 %v1511_v15 }
 0x511   :  { %7652 = vrot.lane.b32.xlu1 %v8310_v43, %s8111_s25 }
 0x537   :  { %v1072_v17 = vpop.xlane.xlu0 %1071 }
 0x538   :  { %v1069_v3 = vpop.xlane.xlu1 %1068 }
 0x539   :  { %7843 = vrcp.f32 %v1069_v3  ;;  %v887_v3 = vld [vmem:[%s8536_s29] sm:$0xff] }
 0x53a   :  { %7845 = vrcp.f32 %v1072_v17 }
 0x53c   :  { %v1075_v16 = vpop.xlane.xlu1 %1074 }
 0x53d   :  { %7847 = vrcp.f32 %v1075_v16 }
 0x540   :  { %v1081_v18 = vpop.xlane.xlu1 %1080 }
 0x541   :  { %v1078_v19 = vpop.xlane.xlu0 %1077 }
 0x542   :  { %7849 = vrcp.f32 %v1078_v19 }
 0x543   :  { %v7844_v5 = vpop.eup %7843  ;;  %7851 = vrcp.f32 %v1081_v18 }
 0x544   :  { %v7633_v20 = vpop.permute.xlu1 %7632  ;;  %v1086_v21 = vmul.f32 %v7844_v5, %v8449_v36  ;;  %v7846_v2 = vpop.eup %7845 }
 0x545   :  { %v1084_v22 = vpop.xlane.xlu0 %1083  ;;  %v7635_v30 = vunpack.i.h.bf16 %v7633_v20  ;;  %v7634_v38 = vunpack.i.l.bf16 %v7633_v20  ;;  %v1088_v17 = vmul.f32 %v7846_v2, %v8447_v31 }
 0x546   :  { %6669 = vmatprep.mubr.msk.f32.mxu1 %vm1030_vm1, %v1086_v21  ;;  %7853 = vrcp.f32 %v1084_v22 }
 0x547   :  { %v7227_v10 = vpack.c.bf16 %v7635_v30, %v7634_v38  ;;  %v7848_v16 = vpop.eup %7847 }
 0x548   :  { %v7638_v23 = vpop.permute.xlu1 %7637  ;;  %v1090_v5 = vmul.f32 %v7848_v16, %v8455_v51 }
 0x549   :  { %v7640_v27 = vunpack.i.h.bf16 %v7638_v23  ;;  %v7639_v28 = vunpack.i.l.bf16 %v7638_v23  ;;  %v7628_v29 = vpop.permute.xlu0 %7627 }
 0x54a   :  { %v7630_v41 = vunpack.i.h.bf16 %v7628_v29  ;;  %v7629_v44 = vunpack.i.l.bf16 %v7628_v29 }
 0x54b   :  { %v7261_v36 = vpack.c.bf16 %v7640_v27, %v7639_v28 }
 0x54c   :  { %v7223_v48 = vpack.c.bf16 %v7630_v41, %v7629_v44  ;;  %v7648_v59 = vpop.permute.xlu1 %7647  ;;  %v7850_v18 = vpop.eup %7849 }
 0x54d   :  { %v7643_v54 = vpop.permute.xlu0 %7642  ;;  %7263 = vmatprep.subr.msk.bf16.mxu0 %vm8354_vm15, %v7261_v36  ;;  %v7650_v6 = vunpack.i.h.bf16 %v7648_v59  ;;  %v7649_v13 = vunpack.i.l.bf16 %v7648_v59  ;;  %v7852_v20 = vpop.eup %7851  ;;  %v1092_v21 = vmul.f32 %v7850_v18, %v8461_v58 }
 0x54e   :  { %v7645_v60 = vunpack.i.h.bf16 %v7643_v54  ;;  %v7644_v62 = vunpack.i.l.bf16 %v7643_v54  ;;  %7224 = vmatprep.subr.bf16.mxu1 %v7223_v48  ;;  %7266 = vmatpush3.bf16.xpose.msk.msra.mxu0 %vm8354_vm15, %v7261_v36  ;;  %v1094_v22 = vmul.f32 %v7852_v20, %v8459_v56 }
 0x54f   :  { %7226 = vmatpush3.bf16.msra.mxu1 %v7223_v48  ;;  %v7273_v19 = vpack.c.bf16 %v7650_v6, %v7649_v13 }
 0x550   :  { %v7267_v63 = vpack.c.bf16 %v7645_v60, %v7644_v62  ;;  %7228 = vmatprep.subr.bf16.mxu1 %v7227_v10  ;;  %v7854_v31 = vpop.eup %7853  ;;  %v1815_v23 = vpop.permute.xlu1 %1814 }
 0x551   :  { %v1813_v15 = vpop.permute.xlu0 %1812  ;;  %v1096_v51 = vmul.f32 %v7854_v31, %v8467_v61 }
 0x552   :  { %7269 = vmatprep.subr.msk.bf16.mxu0 %vm8354_vm15, %v7267_v63  ;;  %6754 = vmatprep.mubr.msk.f32.mxu0 %vm910_vm14, %v1813_v15 }
 0x553   :  { %7230 = vmatpush3.bf16.msra.mxu1 %v7227_v10 }
 0x554   :  { %6678 = vmatprep.subr.mxu1 %v887_v3  ;;  %v1819_v58 = vpop.permute.xlu1 %1818 }
 0x555   :  { %v1817_v27 = vpop.permute.xlu0 %1816 }
 0x556   :  { %6670 = vmatmul.mubr.msk.f32.vlgmr.msra.gmra.mrb[14].mxu1 %vm1030_vm1, %v1088_v17  ;;  %7272 = vmatpush3.bf16.xpose.msk.msra.mxu0 %vm8354_vm15, %v7267_v63 }
 0x557   :  { %6672 = vmatprep.mubr.msk.f32.mxu1 %vm1030_vm1, %v1090_v5  ;;  %7275 = vmatprep.subr.msk.bf16.mxu0 %vm8354_vm15, %v7273_v19 }
 0x558   :  { %6679 = vmatpush3.msra.mxu1 %v887_v3  ;;  %v1823_v56 = vpop.permute.xlu1 %1822 }
 0x559   :  { %v1821_v28 = vpop.permute.xlu0 %1820 }
 0x55a   :  { %6673 = vmatmul.mubr.msk.f32.gmra.mrb[16].mxu1 %vm1030_vm1, %v1092_v21 }
 0x55b   :  { %6675 = vmatprep.mubr.msk.f32.mxu1 %vm1030_vm1, %v1094_v22 }
 0x55e   :  { %6676 = vmatmul.mubr.msk.f32.gmra.mrb[18].mxu1 %vm1030_vm1, %v1096_v51  ;;  %7278 = vmatpush3.bf16.xpose.msk.msra.mxu0 %vm8354_vm15, %v7273_v19 }
 0x565   :  { %6755 = vmatmul.mubr.msk.f32.vlgmr.msra.gmra.mrb[24].mxu0 %vm910_vm14, %v1815_v23 }
 0x566   :  { %6757 = vmatprep.mubr.msk.f32.mxu0 %vm910_vm14, %v1817_v27 }
 0x569   :  { %6758 = vmatmul.mubr.msk.f32.gmra.mrb[26].mxu0 %vm910_vm14, %v1819_v58 }
 0x56a   :  { %6760 = vmatprep.mubr.msk.f32.mxu0 %vm910_vm14, %v1821_v28 }
 0x56d   :  { %6761 = vmatmul.mubr.msk.f32.gmra.mrb[28].mxu0 %vm910_vm14, %v1823_v56 }
 0x589   :  { %v1501_v61 = vpop.xlane.xlu1 %1500 }
 0x58a   :  { %v1515_v29 = vsub.f32 %v8495_v7, %v1501_v61  ;;  %v1498_v30 = vpop.xlane.xlu0 %1497 }
 0x58b   :  { %v1514_v38 = vsub.f32 %v8499_v8, %v1498_v30 }
 0x58c   :  { %v1522_v41 = vmul.f32 1.442695, %v1515_v29 }
 0x58d   :  { %v1520_v44 = vmul.f32 1.442695, %v1514_v38  ;;  %v1510_v36 = vpop.xlane.xlu1 %1509 }
 0x58e   :  { %7855 = vpow2.f32 %v1522_v41  ;;  %v1518_v48 = vsub.f32 %v8503_v9, %v1510_v36  ;;  %v1504_v54 = vpop.xlane.xlu0 %1503 }
 0x58f   :  { %7857 = vpow2.f32 %v1520_v44  ;;  %v1516_v59 = vsub.f32 %v8509_v11, %v1504_v54 }
 0x590   :  { %v1528_v60 = vmul.f32 1.442695, %v1518_v48 }
 0x591   :  { %v1524_v62 = vmul.f32 1.442695, %v1516_v59  ;;  %v7653_v10 = vpop.permute.xlu1 %7652 }
 0x592   :  { %v7655_v63 = vunpack.i.h.bf16 %v7653_v10  ;;  %v7654_v2 = vunpack.i.l.bf16 %v7653_v10  ;;  %v1507_v6 = vpop.xlane.xlu0 %1506 }
 0x593   :  { %7859 = vpow2.f32 %v1524_v62  ;;  %v1517_v7 = vsub.f32 %v8517_v12, %v1507_v6 }
 0x594   :  { %v7249_v8 = vpack.c.bf16 %v7655_v63, %v7654_v2  ;;  %7861 = vpow2.f32 %v1528_v60 }
 0x595   :  { %v1526_v13 = vmul.f32 1.442695, %v1517_v7 }
 0x596   :  { %v1513_v15 = vpop.xlane.xlu0 %1512  ;;  %7250 = vmatprep.subr.bf16.mxu1 %v7249_v8 }
 0x597   :  { %7863 = vpow2.f32 %v1526_v13  ;;  %v1519_v9 = vsub.f32 %v8523_v4, %v1513_v15 }
 0x598   :  { %v8573_v3 = vpop.eup %7855 }
 0x599   :  { %v7858_v11 = vpop.eup %7857  ;;  %v1530_v16 = vmul.f32 1.442695, %v1519_v9  ;;  %v1535_v17 = vsel %vm1030_vm1, %v8573_v3, 0.0 }
 0x59a   :  { %1536 = vadd.xlane.f32.xlu0 %v1535_v17  ;;  %v1532_v18 = vsel %vm1030_vm1, %v7858_v11, 0.0 }
 0x59b   :  { %7865 = vpow2.f32 %v1530_v16  ;;  %1533 = vadd.xlane.f32.xlu1 %v1532_v18 }
 0x59d   :  { %v8578_v12 = vpop.eup %7859 }
 0x59e   :  { %v1538_v19 = vsel %vm1030_vm1, %v8578_v12, 0.0  ;;  %v8582_v5 = vpop.eup %7861 }
 0x59f   :  { %1539 = vadd.xlane.f32.xlu1 %v1538_v19  ;;  %v1544_v20 = vsel %vm1030_vm1, %v8582_v5, 0.0 }
 0x5a1   :  { %v8584_v4 = vpop.eup %7863 }
 0x5a2   :  { %v1541_v21 = vsel %vm1030_vm1, %v8584_v4, 0.0 }
 0x5a3   :  { %1545 = vadd.xlane.f32.xlu1 %v1544_v20  ;;  %1542 = vadd.xlane.f32.xlu0 %v1541_v21 }
 0x5a5   :  { %v8590_v31 = vpop.eup %7865 }
 0x5a6   :  { %v1547_v22 = vsel %vm1030_vm1, %v8590_v31, 0.0 }
 0x5a7   :  { %1548 = vadd.xlane.f32.xlu0 %v1547_v22 }
 0x5b4   :  { %7662 = vrot.lane.b32.xlu1 %v8330_v53, %s8111_s25 }
 0x5b8   :  { %7667 = vrot.lane.b32.xlu1 %v8310_v43, %s8113_s30 }
 0x5bc   :  { %7677 = vrot.lane.b32.xlu1 %v8330_v53, %s8113_s30 }
 0x5bd   :  { %7657 = vrot.lane.b32.xlu0 %v8320_v49, %s8111_s25 }
 0x5c0   :  { %2273 = vrot.lane.b32.xlu1 %v8302_v40, %s8114_s1 }
 0x5c1   :  { %7672 = vrot.lane.b32.xlu0 %v8320_v49, %s8113_s30 }
 0x5c4   :  { %2277 = vrot.lane.b32.xlu1 %v8314_v45, %s8114_s1 }
 0x5c5   :  { %2271 = vrot.lane.b32.xlu0 %v8304_v42, %s8114_s1 }
 0x5c8   :  { %2281 = vrot.lane.b32.xlu1 %v8322_v50, %s8114_s1 }
 0x5c9   :  { %2275 = vrot.lane.b32.xlu0 %v8316_v47, %s8114_s1 }
 0x5cd   :  { %2279 = vrot.lane.b32.xlu0 %v8324_v52, %s8114_s1 }
 0x627   :  { %v1537_v27 = vpop.xlane.xlu0 %1536 }
 0x628   :  { %v1534_v51 = vpop.xlane.xlu1 %1533 }
 0x629   :  { %7867 = vrcp.f32 %v1534_v51  ;;  %v6671_v40 = vpop.f32.mrb[14].mxu1 }
 0x62a   :  { %v1199_v23 = vpop.f32.mrb[15].mxu1  ;;  %7869 = vrcp.f32 %v1537_v27 }
 0x62b   :  { %6680 = vmatprep.mubr.msk.f32.mxu1 %vm910_vm14, %v1199_v23 }
 0x62c   :  { %v1540_v45 = vpop.xlane.xlu1 %1539  ;;  %6681 = vmatmul.mubr.msk.f32.vlgmr.msra.gmra.mrb[20].mxu1 %vm910_vm14, %v6671_v40 }
 0x62d   :  { %7252 = vmatpush3.bf16.msra.mxu1 %v7249_v8  ;;  %v6674_v42 = vpop.f32.mrb[16].mxu1  ;;  %7871 = vrcp.f32 %v1540_v45 }
 0x62e   :  { %v1209_v58 = vpop.f32.mrb[17].mxu1 }
 0x62f   :  { %6683 = vmatprep.mubr.msk.f32.mxu1 %vm910_vm14, %v1209_v58 }
 0x630   :  { %v1546_v50 = vpop.xlane.xlu1 %1545  ;;  %v1543_v47 = vpop.xlane.xlu0 %1542  ;;  %6684 = vmatmul.mubr.msk.f32.gmra.mrb[22].mxu1 %vm910_vm14, %v6674_v42 }
 0x631   :  { %v6677_v52 = vpop.f32.mrb[18].mxu1  ;;  %7873 = vrcp.f32 %v1543_v47 }
 0x632   :  { %v1219_v28 = vpop.f32.mrb[19].mxu1  ;;  %7875 = vrcp.f32 %v1546_v50 }
 0x633   :  { %v7868_v56 = vpop.eup %7867  ;;  %6686 = vmatprep.mubr.msk.f32.mxu1 %vm910_vm14, %v1219_v28 }
 0x634   :  { %v7663_v61 = vpop.permute.xlu1 %7662  ;;  %v1549_v29 = vpop.xlane.xlu0 %1548  ;;  %6687 = vmatmul.mubr.msk.f32.gmra.mrb[24].mxu1 %vm910_vm14, %v6677_v52  ;;  %v1551_v30 = vmul.f32 %v7868_v56, %v7858_v11 }
 0x635   :  { %v7665_v60 = vunpack.i.h.bf16 %v7663_v61  ;;  %v7664_v62 = vunpack.i.l.bf16 %v7663_v61  ;;  %7877 = vrcp.f32 %v1549_v29  ;;  %v7870_v51 = vpop.eup %7869 }
 0x636   :  { %6722 = vmatprep.mubr.msk.f32.mxu1 %vm1030_vm1, %v1551_v30  ;;  %v1553_v52 = vmul.f32 %v7870_v51, %v8573_v3 }
 0x637   :  { %v7257_v18 = vpack.c.bf16 %v7665_v60, %v7664_v62  ;;  %v7872_v27 = vpop.eup %7871 }
 0x638   :  { %v7668_v38 = vpop.permute.xlu1 %7667  ;;  %v7658_v41 = vpop.permute.xlu0 %7657 }
 0x639   :  { %v7670_v44 = vunpack.i.h.bf16 %v7668_v38  ;;  %v7669_v36 = vunpack.i.l.bf16 %v7668_v38  ;;  %v7660_v48 = vunpack.i.h.bf16 %v7658_v41  ;;  %v7659_v54 = vunpack.i.l.bf16 %v7658_v41  ;;  %v6756_v59 = vpop.f32.mrb[24].mxu0 }
 0x63a   :  { %v8624_v10 = vadd.f32 %v6756_v59, %v8404_v24  ;;  %v1926_v63 = vpop.f32.mrb[25].mxu0  ;;  %v1555_v41 = vmul.f32 %v7872_v27, %v8578_v12 }
 0x63b   :  { %v7291_v2 = vpack.c.bf16 %v7670_v44, %v7669_v36  ;;  %v8627_v6 = vadd.f32 %v1926_v63, %v8407_v26  ;;  %v7253_v7 = vpack.c.bf16 %v7660_v48, %v7659_v54  ;;  %v7874_v28 = vpop.eup %7873 }
 0x63c   :  { %v7673_v8 = vpop.permute.xlu0 %7672  ;;  %v1958_v13 = vsel %vm1030_vm1, %v8624_v10, -inf  ;;  %v6759_v11 = vpop.f32.mrb[26].mxu0  ;;  %v1557_v3 = vmul.f32 %v7874_v28, %v8584_v4 }
 0x63d   :  { %v7675_v15 = vunpack.i.h.bf16 %v7673_v8  ;;  %v7674_v9 = vunpack.i.l.bf16 %v7673_v8  ;;  %7293 = vmatprep.subr.msk.bf16.mxu0 %vm8354_vm15, %v7291_v2  ;;  %1959 = vmax.xlane.f32.xlu1 %v1958_v13  ;;  %v1936_v16 = vpop.f32.mrb[27].mxu0  ;;  %v1955_v17 = vsel %vm1030_vm1, %v8627_v6, -inf  ;;  %v7678_v19 = vpop.permute.xlu1 %7677  ;;  %v1942_v58 = vadd.f32 %v6759_v11, %v8417_v39 }
 0x63e   :  { %7254 = vmatprep.subr.bf16.mxu1 %v7253_v7  ;;  %7296 = vmatpush3.bf16.xpose.msk.msra.mxu0 %vm8354_vm15, %v7291_v2  ;;  %v8638_v21 = vadd.f32 %v1936_v16, %v8413_v35  ;;  %v7680_v45 = vunpack.i.h.bf16 %v7678_v19  ;;  %v7679_v42 = vunpack.i.l.bf16 %v7678_v19  ;;  %v7876_v61 = vpop.eup %7875 }
 0x63f   :  { %v7297_v20 = vpack.c.bf16 %v7675_v15, %v7674_v9  ;;  %1956 = vmax.xlane.f32.xlu0 %v1955_v17  ;;  %7256 = vmatpush3.bf16.msra.mxu1 %v7253_v7  ;;  %v1964_v38 = vsel %vm1030_vm1, %v1942_v58, -inf  ;;  %v7878_v44 = vpop.eup %7877  ;;  %v1559_v36 = vmul.f32 %v7876_v61, %v8582_v5 }
 0x640   :  { %7258 = vmatprep.subr.bf16.mxu1 %v7257_v18  ;;  %v2272_v22 = vpop.permute.xlu0 %2271  ;;  %v6762_v40 = vpop.f32.mrb[28].mxu0  ;;  %v1961_v23 = vsel %vm1030_vm1, %v8638_v21, -inf  ;;  %v7303_v29 = vpack.c.bf16 %v7680_v45, %v7679_v42  ;;  %v1561_v12 = vmul.f32 %v7878_v44, %v8590_v31  ;;  %v888_v31 = vld [vmem:[%s8536_s29 + $0x8] sm:$0xff] }
 0x641   :  { %7299 = vmatprep.subr.msk.bf16.mxu0 %vm8354_vm15, %v7297_v20  ;;  %6807 = vmatprep.mubr.msk.f32.mxu0 %vm910_vm14, %v2272_v22  ;;  %v1946_v50 = vpop.f32.mrb[29].mxu0  ;;  %v1952_v30 = vadd.f32 %v6762_v40, %v8426_v55  ;;  %v2274_v54 = vpop.permute.xlu1 %2273 }
 0x642   :  { %v1947_v47 = vadd.f32 %v1946_v50, %v8421_v46 }
 0x643   :  { %1962 = vmax.xlane.f32.xlu0 %v1961_v23  ;;  %7260 = vmatpush3.bf16.msra.mxu1 %v7257_v18  ;;  %v1970_v48 = vsel %vm1030_vm1, %v1952_v30, -inf }
 0x644   :  { %v1967_v56 = vsel %vm1030_vm1, %v1947_v47, -inf  ;;  %v2276_v4 = vpop.permute.xlu0 %2275  ;;  %6731 = vmatprep.subr.mxu1 %v888_v31 }
 0x645   :  { %1968 = vmax.xlane.f32.xlu1 %v1967_v56  ;;  %v2278_v5 = vpop.permute.xlu1 %2277 }
 0x646   :  { %6723 = vmatmul.mubr.msk.f32.vlgmr.msra.gmra.mrb[26].mxu1 %vm1030_vm1, %v1553_v52  ;;  %7302 = vmatpush3.bf16.xpose.msk.msra.mxu0 %vm8354_vm15, %v7297_v20 }
 0x647   :  { %1965 = vmax.xlane.f32.xlu0 %v1964_v38  ;;  %6725 = vmatprep.mubr.msk.f32.mxu1 %vm1030_vm1, %v1555_v41 }
 0x648   :  { %7305 = vmatprep.subr.msk.bf16.mxu0 %vm8354_vm15, %v7303_v29  ;;  %v2280_v59 = vpop.permute.xlu0 %2279  ;;  %6732 = vmatpush3.msra.mxu1 %v888_v31 }
 0x649   :  { %v2282_v60 = vpop.permute.xlu1 %2281 }
 0x64a   :  { %6726 = vmatmul.mubr.msk.f32.gmra.mrb[28].mxu1 %vm1030_vm1, %v1557_v3 }
 0x64b   :  { %1971 = vmax.xlane.f32.xlu0 %v1970_v48  ;;  %6728 = vmatprep.mubr.msk.f32.mxu1 %vm1030_vm1, %v1559_v36 }
 0x64e   :  { %6729 = vmatmul.mubr.msk.f32.gmra.mrb[30].mxu1 %vm1030_vm1, %v1561_v12  ;;  %7308 = vmatpush3.bf16.xpose.msk.msra.mxu0 %vm8354_vm15, %v7303_v29 }
 0x655   :  { %6808 = vmatmul.mubr.msk.f32.vlgmr.msra.gmra.mrb[30].mxu0 %vm910_vm14, %v2274_v54 }
 0x656   :  { %6810 = vmatprep.mubr.msk.f32.mxu0 %vm910_vm14, %v2276_v4  ;;  %7682 = vrot.lane.b32.xlu1 %v8310_v43, %s8115_s2 }
 0x659   :  { %6811 = vmatmul.mubr.msk.f32.gmra.mrb[32].mxu0 %vm910_vm14, %v2278_v5 }
 0x65a   :  { %6813 = vmatprep.mubr.msk.f32.mxu0 %vm910_vm14, %v2280_v59 }
 0x65d   :  { %6814 = vmatmul.mubr.msk.f32.gmra.mrb[34].mxu0 %vm910_vm14, %v2282_v60 }
 0x6ca   :  { %v1960_v62 = vpop.xlane.xlu1 %1959 }
 0x6cb   :  { %v1974_v63 = vsub.f32 %v8624_v10, %v1960_v62 }
 0x6cc   :  { %v1957_v2 = vpop.xlane.xlu0 %1956 }
 0x6cd   :  { %v1981_v7 = vmul.f32 1.442695, %v1974_v63  ;;  %v1973_v8 = vsub.f32 %v8627_v6, %v1957_v2 }
 0x6cf   :  { %7879 = vpow2.f32 %v1981_v7  ;;  %v1979_v13 = vmul.f32 1.442695, %v1973_v8 }
 0x6d0   :  { %v1963_v15 = vpop.xlane.xlu0 %1962 }
 0x6d1   :  { %7881 = vpow2.f32 %v1979_v13  ;;  %v1975_v9 = vsub.f32 %v8638_v21, %v1963_v15 }
 0x6d2   :  { %v1969_v16 = vpop.xlane.xlu1 %1968 }
 0x6d3   :  { %v1983_v11 = vmul.f32 1.442695, %v1975_v9  ;;  %v1977_v18 = vsub.f32 %v1947_v47, %v1969_v16 }
 0x6d4   :  { %v1966_v17 = vpop.xlane.xlu0 %1965 }
 0x6d5   :  { %7883 = vpow2.f32 %v1983_v11  ;;  %v1976_v19 = vsub.f32 %v1942_v58, %v1966_v17  ;;  %v1987_v20 = vmul.f32 1.442695, %v1977_v18 }
 0x6d6   :  { %v7683_v51 = vpop.permute.xlu1 %7682 }
 0x6d7   :  { %v1985_v22 = vmul.f32 1.442695, %v1976_v19  ;;  %7885 = vpow2.f32 %v1987_v20  ;;  %v7685_v6 = vunpack.i.h.bf16 %v7683_v51  ;;  %v7684_v23 = vunpack.i.l.bf16 %v7683_v51 }
 0x6d8   :  { %v1972_v10 = vpop.xlane.xlu0 %1971 }
 0x6d9   :  { %v8678_v40 = vpop.eup %7879  ;;  %v1978_v27 = vsub.f32 %v1952_v30, %v1972_v10  ;;  %7887 = vpow2.f32 %v1985_v22  ;;  %v7279_v50 = vpack.c.bf16 %v7685_v6, %v7684_v23 }
 0x6da   :  { %v1994_v21 = vsel %vm1030_vm1, %v8678_v40, 0.0 }
 0x6db   :  { %v8682_v45 = vpop.eup %7881  ;;  %v1989_v42 = vmul.f32 1.442695, %v1978_v27  ;;  %1995 = vadd.xlane.f32.xlu0 %v1994_v21  ;;  %7280 = vmatprep.subr.bf16.mxu1 %v7279_v50 }
 0x6dc   :  { %v1991_v58 = vsel %vm1030_vm1, %v8682_v45, 0.0 }
 0x6dd   :  { %7889 = vpow2.f32 %v1989_v42  ;;  %1992 = vadd.xlane.f32.xlu1 %v1991_v58  ;;  %v889_v42 = vld [vmem:[%s8536_s29 + $0x10] sm:$0xff] }
 0x6df   :  { %v8686_v47 = vpop.eup %7883 }
 0x6e0   :  { %v1997_v52 = vsel %vm1030_vm1, %v8686_v47, 0.0 }
 0x6e1   :  { %1998 = vadd.xlane.f32.xlu1 %v1997_v52  ;;  %v8690_v28 = vpop.eup %7885 }
 0x6e2   :  { %v2003_v61 = vsel %vm1030_vm1, %v8690_v28, 0.0 }
 0x6e3   :  { %v8692_v56 = vpop.eup %7887 }
 0x6e4   :  { %v2000_v29 = vsel %vm1030_vm1, %v8692_v56, 0.0 }
 0x6e5   :  { %2004 = vadd.xlane.f32.xlu1 %v2003_v61  ;;  %2001 = vadd.xlane.f32.xlu0 %v2000_v29 }
 0x6e7   :  { %v8698_v30 = vpop.eup %7889 }
 0x6e8   :  { %v2006_v38 = vsel %vm1030_vm1, %v8698_v30, 0.0 }
 0x6e9   :  { %2007 = vadd.xlane.f32.xlu0 %v2006_v38 }
 0x6f6   :  { %7692 = vrot.lane.b32.xlu1 %v8330_v53, %s8115_s2 }
 0x6ff   :  { %7687 = vrot.lane.b32.xlu0 %v8320_v49, %s8115_s2 }
 0x719   :  { %v6724_v41 = vpop.f32.mrb[26].mxu1 }
 0x71a   :  { %v1664_v3 = vpop.f32.mrb[27].mxu1 }
 0x71b   :  { %6733 = vmatprep.mubr.msk.f32.mxu1 %vm910_vm14, %v1664_v3 }
 0x71c   :  { %6734 = vmatmul.mubr.msk.f32.vlgmr.msra.gmra.mrb[20].mxu1 %vm910_vm14, %v6724_v41 }
 0x71d   :  { %7282 = vmatpush3.bf16.msra.mxu1 %v7279_v50  ;;  %v6727_v44 = vpop.f32.mrb[28].mxu1 }
 0x71e   :  { %v1674_v36 = vpop.f32.mrb[29].mxu1 }
 0x71f   :  { %6736 = vmatprep.mubr.msk.f32.mxu1 %vm910_vm14, %v1674_v36 }
 0x720   :  { %6737 = vmatmul.mubr.msk.f32.gmra.mrb[22].mxu1 %vm910_vm14, %v6727_v44 }
 0x721   :  { %v6730_v48 = vpop.f32.mrb[30].mxu1 }
 0x722   :  { %v1684_v12 = vpop.f32.mrb[31].mxu1 }
 0x723   :  { %6739 = vmatprep.mubr.msk.f32.mxu1 %vm910_vm14, %v1684_v12 }
 0x724   :  { %6740 = vmatmul.mubr.msk.f32.gmra.mrb[24].mxu1 %vm910_vm14, %v6730_v48 }
 0x728   :  { %v6809_v54 = vpop.f32.mrb[30].mxu0 }
 0x729   :  { %v8713_v4 = vadd.f32 %v6809_v54, %v8404_v24  ;;  %v2385_v5 = vpop.f32.mrb[31].mxu0 }
 0x72a   :  { %v8716_v59 = vadd.f32 %v2385_v5, %v8407_v26 }
 0x72b   :  { %v2417_v31 = vsel %vm1030_vm1, %v8713_v4, -inf }
 0x72c   :  { %v6812_v60 = vpop.f32.mrb[32].mxu0  ;;  %2418 = vmax.xlane.f32.xlu0 %v2417_v31  ;;  %v2414_v62 = vsel %vm1030_vm1, %v8716_v59, -inf }
 0x72d   :  { %v8723_v63 = vadd.f32 %v6812_v60, %v8417_v39  ;;  %v2395_v2 = vpop.f32.mrb[33].mxu0  ;;  %2415 = vmax.xlane.f32.xlu1 %v2414_v62 }
 0x72e   :  { %v8726_v24 = vadd.f32 %v2395_v2, %v8413_v35 }
 0x72f   :  { %v2423_v26 = vsel %vm1030_vm1, %v8723_v63, -inf }
 0x730   :  { %v6815_v7 = vpop.f32.mrb[34].mxu0  ;;  %v2420_v8 = vsel %vm1030_vm1, %v8726_v24, -inf }
 0x731   :  { %v8733_v13 = vadd.f32 %v6815_v7, %v8426_v55  ;;  %v2405_v15 = vpop.f32.mrb[35].mxu0  ;;  %2424 = vmax.xlane.f32.xlu1 %v2423_v26  ;;  %2421 = vmax.xlane.f32.xlu0 %v2420_v8 }
 0x732   :  { %v8736_v39 = vadd.f32 %v2405_v15, %v8421_v46 }
 0x733   :  { %v2429_v35 = vsel %vm1030_vm1, %v8733_v13, -inf }
 0x734   :  { %v2426_v9 = vsel %vm1030_vm1, %v8736_v39, -inf }
 0x735   :  { %2430 = vmax.xlane.f32.xlu1 %v2429_v35  ;;  %2427 = vmax.xlane.f32.xlu0 %v2426_v9 }
 0x74b   :  { %7697 = vrot.lane.b32.xlu0 %v8310_v43, %s8116_s3 }
 0x768   :  { %v1996_v16 = vpop.xlane.xlu0 %1995 }
 0x76a   :  { %v1993_v55 = vpop.xlane.xlu1 %1992 }
 0x76b   :  { %7891 = vrcp.f32 %v1993_v55 }
 0x76c   :  { %7893 = vrcp.f32 %v1996_v16 }
 0x76e   :  { %v1999_v11 = vpop.xlane.xlu1 %1998 }
 0x76f   :  { %7895 = vrcp.f32 %v1999_v11 }
 0x772   :  { %v2005_v17 = vpop.xlane.xlu1 %2004  ;;  %v2002_v18 = vpop.xlane.xlu0 %2001 }
 0x773   :  { %7897 = vrcp.f32 %v2002_v18 }
 0x774   :  { %7899 = vrcp.f32 %v2005_v17 }
 0x775   :  { %v7892_v46 = vpop.eup %7891 }
 0x776   :  { %v2010_v19 = vmul.f32 %v7892_v46, %v8682_v45  ;;  %v2008_v20 = vpop.xlane.xlu0 %2007  ;;  %v7693_v22 = vpop.permute.xlu1 %7692 }
 0x777   :  { %v7695_v10 = vunpack.i.h.bf16 %v7693_v22  ;;  %v7694_v6 = vunpack.i.l.bf16 %v7693_v22  ;;  %7901 = vrcp.f32 %v2008_v20  ;;  %v7894_v45 = vpop.eup %7893 }
 0x778   :  { %6775 = vmatprep.mubr.msk.f32.mxu1 %vm1030_vm1, %v2010_v19  ;;  %v2012_v58 = vmul.f32 %v7894_v45, %v8678_v40 }
 0x779   :  { %v7287_v21 = vpack.c.bf16 %v7695_v10, %v7694_v6  ;;  %v7896_v50 = vpop.eup %7895 }
 0x77a   :  { %v7688_v51 = vpop.permute.xlu0 %7687  ;;  %v2014_v61 = vmul.f32 %v7896_v50, %v8686_v47 }
 0x77b   :  { %v7690_v43 = vunpack.i.h.bf16 %v7688_v51  ;;  %v7689_v23 = vunpack.i.l.bf16 %v7688_v51 }
 0x77d   :  { %v7283_v27 = vpack.c.bf16 %v7690_v43, %v7689_v23  ;;  %v7898_v52 = vpop.eup %7897 }
 0x77e   :  { %v7900_v29 = vpop.eup %7899  ;;  %v2016_v38 = vmul.f32 %v7898_v52, %v8692_v56 }
 0x77f   :  { %7284 = vmatprep.subr.bf16.mxu1 %v7283_v27  ;;  %v2018_v3 = vmul.f32 %v7900_v29, %v8690_v28 }
 0x780   :  { %7286 = vmatpush3.bf16.msra.mxu1 %v7283_v27 }
 0x781   :  { %7288 = vmatprep.subr.bf16.mxu1 %v7287_v21  ;;  %v7902_v41 = vpop.eup %7901 }
 0x782   :  { %v2020_v40 = vmul.f32 %v7902_v41, %v8698_v30 }
 0x784   :  { %7290 = vmatpush3.bf16.msra.mxu1 %v7287_v21 }
 0x785   :  { %6784 = vmatprep.subr.mxu1 %v889_v42 }
 0x787   :  { %6776 = vmatmul.mubr.msk.f32.vlgmr.msra.gmra.mrb[32].mxu1 %vm1030_vm1, %v2012_v58 }
 0x788   :  { %6778 = vmatprep.mubr.msk.f32.mxu1 %vm1030_vm1, %v2014_v61  ;;  %6785 = vmatpush3.msra.mxu1 %v889_v42 }
 0x78b   :  { %6779 = vmatmul.mubr.msk.f32.gmra.mrb[34].mxu1 %vm1030_vm1, %v2016_v38 }
 0x78c   :  { %6781 = vmatprep.mubr.msk.f32.mxu1 %vm1030_vm1, %v2018_v3 }
 0x78f   :  { %6782 = vmatmul.mubr.msk.f32.gmra.mrb[36].mxu1 %vm1030_vm1, %v2020_v40 }
 0x7b9   :  { %v2419_v47 = vpop.xlane.xlu0 %2418 }
 0x7ba   :  { %v2433_v44 = vsub.f32 %v8713_v4, %v2419_v47  ;;  %v2416_v36 = vpop.xlane.xlu1 %2415 }
 0x7bb   :  { %v2432_v48 = vsub.f32 %v8716_v59, %v2416_v36  ;;  %v890_v36 = vld [vmem:[%s8536_s29 + $0x18] sm:$0xff] }
 0x7bc   :  { %v2440_v12 = vmul.f32 1.442695, %v2433_v44 }
 0x7bd   :  { %v2438_v54 = vmul.f32 1.442695, %v2432_v48 }
 0x7be   :  { %7903 = vpow2.f32 %v2440_v12  ;;  %v2425_v56 = vpop.xlane.xlu1 %2424  ;;  %v2422_v5 = vpop.xlane.xlu0 %2421 }
 0x7bf   :  { %7905 = vpow2.f32 %v2438_v54  ;;  %v2435_v28 = vsub.f32 %v8723_v63, %v2425_v56  ;;  %v2434_v31 = vsub.f32 %v8726_v24, %v2422_v5 }
 0x7c1   :  { %v2444_v60 = vmul.f32 1.442695, %v2435_v28  ;;  %v2442_v30 = vmul.f32 1.442695, %v2434_v31 }
 0x7c2   :  { %v2431_v62 = vpop.xlane.xlu1 %2430  ;;  %v2428_v2 = vpop.xlane.xlu0 %2427 }
 0x7c3   :  { %7907 = vpow2.f32 %v2444_v60  ;;  %v2437_v4 = vsub.f32 %v8733_v13, %v2431_v62  ;;  %v2436_v26 = vsub.f32 %v8736_v39, %v2428_v2 }
 0x7c4   :  { %7909 = vpow2.f32 %v2442_v30 }
 0x7c5   :  { %v2448_v59 = vmul.f32 1.442695, %v2437_v4  ;;  %v2446_v7 = vmul.f32 1.442695, %v2436_v26 }
 0x7c6   :  { %v7698_v8 = vpop.permute.xlu0 %7697 }
 0x7c7   :  { %7911 = vpow2.f32 %v2448_v59  ;;  %v7700_v15 = vunpack.i.h.bf16 %v7698_v8  ;;  %v7699_v35 = vunpack.i.l.bf16 %v7698_v8  ;;  %v5967_v8 = vld [vmem:[%s8807_s7] ss:$0 sm:$0xff] }
 0x7c8   :  { %v8763_v9 = vpop.eup %7903  ;;  %7913 = vpow2.f32 %v2446_v7 }
 0x7c9   :  { %v7906_v63 = vpop.eup %7905  ;;  %v2453_v24 = vsel %vm1030_vm1, %v8763_v9, 0.0  ;;  %v7309_v55 = vpack.c.bf16 %v7700_v15, %v7699_v35 }
 0x7ca   :  { %2454 = vadd.xlane.f32.xlu1 %v2453_v24  ;;  %v2450_v13 = vsel %vm1030_vm1, %v7906_v63, 0.0 }
 0x7cb   :  { %2451 = vadd.xlane.f32.xlu0 %v2450_v13  ;;  %7310 = vmatprep.subr.bf16.mxu1 %v7309_v55 }
 0x7cd   :  { %v8768_v39 = vpop.eup %7907 }
 0x7ce   :  { %v7910_v11 = vpop.eup %7909  ;;  %v2459_v16 = vsel %vm1030_vm1, %v8768_v39, 0.0 }
 0x7cf   :  { %2460 = vadd.xlane.f32.xlu1 %v2459_v16  ;;  %v2456_v17 = vsel %vm1030_vm1, %v7910_v11, 0.0 }
 0x7d0   :  { %2457 = vadd.xlane.f32.xlu0 %v2456_v17 }
 0x7d1   :  { %v8773_v18 = vpop.eup %7911 }
 0x7d2   :  { %v2465_v46 = vsel %vm1030_vm1, %v8773_v18, 0.0  ;;  %v7914_v19 = vpop.eup %7913 }
 0x7d3   :  { %2466 = vadd.xlane.f32.xlu1 %v2465_v46  ;;  %v2462_v20 = vsel %vm1030_vm1, %v7914_v19, 0.0 }
 0x7d7   :  { %2463 = vadd.xlane.f32.xlu1 %v2462_v20 }
 0x7e6   :  { %7707 = vrot.lane.b32.xlu0 %v8330_v53, %s8116_s3 }
 0x7e8   :  { %7702 = vrot.lane.b32.xlu1 %v8320_v49, %s8116_s3 }
 0x857   :  { %v2455_v22 = vpop.xlane.xlu1 %2454 }
 0x858   :  { %v2452_v51 = vpop.xlane.xlu0 %2451 }
 0x859   :  { %7915 = vrcp.f32 %v2452_v51 }
 0x85a   :  { %v6777_v10 = vpop.f32.mrb[32].mxu1  ;;  %7917 = vrcp.f32 %v2455_v22 }
 0x85b   :  { %v2123_v6 = vpop.f32.mrb[33].mxu1 }
 0x85c   :  { %v2461_v43 = vpop.xlane.xlu1 %2460  ;;  %6786 = vmatprep.mubr.msk.f32.mxu1 %vm910_vm14, %v2123_v6 }
 0x85d   :  { %6787 = vmatmul.mubr.msk.f32.vlgmr.msra.gmra.mrb[20].mxu1 %vm910_vm14, %v6777_v10  ;;  %v2458_v23 = vpop.xlane.xlu0 %2457 }
 0x85e   :  { %7312 = vmatpush3.bf16.msra.mxu1 %v7309_v55  ;;  %v6780_v27 = vpop.f32.mrb[34].mxu1  ;;  %7919 = vrcp.f32 %v2458_v23 }
 0x85f   :  { %v2133_v21 = vpop.f32.mrb[35].mxu1  ;;  %7921 = vrcp.f32 %v2461_v43 }
 0x860   :  { %v2467_v45 = vpop.xlane.xlu1 %2466  ;;  %6789 = vmatprep.mubr.msk.f32.mxu1 %vm910_vm14, %v2133_v21 }
 0x861   :  { %6790 = vmatmul.mubr.msk.f32.gmra.mrb[22].mxu1 %vm910_vm14, %v6780_v27  ;;  %v7708_v52 = vpop.permute.xlu0 %7707 }
 0x862   :  { %v6783_v53 = vpop.f32.mrb[36].mxu1  ;;  %v7710_v29 = vunpack.i.h.bf16 %v7708_v52  ;;  %v7709_v38 = vunpack.i.l.bf16 %v7708_v52 }
 0x863   :  { %v7916_v49 = vpop.eup %7915  ;;  %v2143_v42 = vpop.f32.mrb[37].mxu1 }
 0x864   :  { %v2464_v50 = vpop.xlane.xlu1 %2463  ;;  %v2469_v58 = vmul.f32 %v7916_v49, %v7906_v63  ;;  %6792 = vmatprep.mubr.msk.f32.mxu1 %vm910_vm14, %v2143_v42  ;;  %v7317_v47 = vpack.c.bf16 %v7710_v29, %v7709_v38  ;;  %v7918_v44 = vpop.eup %7917 }
 0x865   :  { %6793 = vmatmul.mubr.msk.f32.gmra.mrb[24].mxu1 %vm910_vm14, %v6783_v53  ;;  %7923 = vrcp.f32 %v2464_v50  ;;  %v2471_v12 = vmul.f32 %v7918_v44, %v8763_v9 }
 0x866   :  { %6828 = vmatprep.mubr.msk.f32.mxu1 %vm1030_vm1, %v2469_v58  ;;  %7925 = vrcp.f32 %v2467_v45 }
 0x868   :  { %v7703_v61 = vpop.permute.xlu1 %7702  ;;  %v7920_v48 = vpop.eup %7919 }
 0x869   :  { %v7705_v41 = vunpack.i.h.bf16 %v7703_v61  ;;  %v7704_v3 = vunpack.i.l.bf16 %v7703_v61  ;;  %v7922_v54 = vpop.eup %7921  ;;  %v2473_v56 = vmul.f32 %v7920_v48, %v7910_v11 }
 0x86a   :  { %v2475_v28 = vmul.f32 %v7922_v54, %v8768_v39 }
 0x86b   :  { %v7313_v40 = vpack.c.bf16 %v7705_v41, %v7704_v3 }
 0x86d   :  { %7314 = vmatprep.subr.bf16.mxu1 %v7313_v40 }
 0x86e   :  { %7316 = vmatpush3.bf16.msra.mxu1 %v7313_v40 }
 0x86f   :  { %7318 = vmatprep.subr.bf16.mxu1 %v7317_v47  ;;  %v7924_v5 = vpop.eup %7923 }
 0x870   :  { %v7926_v31 = vpop.eup %7925  ;;  %v2477_v60 = vmul.f32 %v7924_v5, %v7914_v19 }
 0x871   :  { %v2479_v30 = vmul.f32 %v7926_v31, %v8773_v18 }
 0x872   :  { %7320 = vmatpush3.bf16.msra.mxu1 %v7317_v47 }
 0x873   :  { %6837 = vmatprep.subr.mxu1 %v890_v36 }
 0x875   :  { %6829 = vmatmul.mubr.msk.f32.vlgmr.msra.gmra.mrb[38].mxu1 %vm1030_vm1, %v2471_v12 }
 0x876   :  { %6831 = vmatprep.mubr.msk.f32.mxu1 %vm1030_vm1, %v2473_v56  ;;  %6838 = vmatpush3.msra.mxu1 %v890_v36 }
 0x879   :  { %6832 = vmatmul.mubr.msk.f32.gmra.mrb[40].mxu1 %vm1030_vm1, %v2475_v28 }
 0x87a   :  { %6834 = vmatprep.mubr.msk.f32.mxu1 %vm1030_vm1, %v2477_v60 }
 0x87d   :  { %6835 = vmatmul.mubr.msk.f32.gmra.mrb[42].mxu1 %vm1030_vm1, %v2479_v30 }
 0x948   :  { %v6830_v62 = vpop.f32.mrb[38].mxu1 }
 0x949   :  { %v2582_v2 = vpop.f32.mrb[39].mxu1 }
 0x94a   :  { %6839 = vmatprep.mubr.msk.f32.mxu1 %vm910_vm14, %v2582_v2  ;;  %v2842_v2 = vld [vmem:[%s8855_s11 + $0x8] sm:$0xff] }
 0x94b   :  { %6840 = vmatmul.mubr.msk.f32.vlgmr.msra.gmra.mrb[20].mxu1 %vm910_vm14, %v6830_v62  ;;  %v2841_v62 = vld [vmem:[%s8855_s11] sm:$0xff] }
 0x94c   :  { %v6833_v4 = vpop.f32.mrb[40].mxu1 }
 0x94d   :  { %v2592_v26 = vpop.f32.mrb[41].mxu1 }
 0x94e   :  { %6842 = vmatprep.mubr.msk.f32.mxu1 %vm910_vm14, %v2592_v26  ;;  %v2843_v26 = vld [vmem:[%s8855_s11 + $0x10] sm:$0xff] }
 0x94f   :  { %6843 = vmatmul.mubr.msk.f32.gmra.mrb[22].mxu1 %vm910_vm14, %v6833_v4  ;;  %v7321_v4 = vpack.c.bf16 %v2842_v2, %v2841_v62 }
 0x950   :  { %v6836_v59 = vpop.f32.mrb[42].mxu1 }
 0x951   :  { %v2602_v7 = vpop.f32.mrb[43].mxu1  ;;  %7322 = vmatprep.subr.bf16.mxu0 %v7321_v4 }
 0x952   :  { %6845 = vmatprep.mubr.msk.f32.mxu1 %vm910_vm14, %v2602_v7  ;;  %7324 = vmatpush3.bf16.msra.mxu0 %v7321_v4 }
 0x953   :  { %6846 = vmatmul.mubr.msk.f32.gmra.mrb[24].mxu1 %vm910_vm14, %v6836_v59  ;;  %v2844_v59 = vld [vmem:[%s8855_s11 + $0x18] sm:$0xff] }
 0x954   :  { %v7325_v7 = vpack.c.bf16 %v2844_v59, %v2843_v26 }
 0x956   :  { %7326 = vmatprep.subr.bf16.mxu0 %v7325_v7 }
 0x957   :  { %7328 = vmatpush3.bf16.msra.mxu0 %v7325_v7 }
 0xa1e   :  { %v6841_v15 = vpop.f32.mrb[20].mxu1 }
 0xa1f   :  { %v7493_v35 = vadd.f32 %v6841_v15, %v5967_v8  ;;  %v2695_v9 = vpop.f32.mrb[21].mxu1  ;;  %v2972_v15 = vld [vmem:[%s8864_s19 + $0x8] sm:$0xff] }
 0xa20   :  { %v7494_v63 = vadd.f32 %v5967_v8, %v2695_v9 }
 0xa21   :  { %v2731_v24 = vadd.f32 %v7493_v35, %v8272_v25 }
 0xa22   :  { %v6844_v55 = vpop.f32.mrb[22].mxu1  ;;  %v2730_v13 = vadd.f32 %v7494_v63, %v8264_v14 }
 0xa23   :  { %v2705_v39 = vpop.f32.mrb[23].mxu1  ;;  %v2741_v11 = vsel %vm267_vm9, %v2731_v24, 0.0  ;;  %v7495_v16 = vadd.f32 %v6844_v55, %v5967_v8 }
 0xa24   :  { %v7496_v17 = vadd.f32 %v5967_v8, %v2705_v39  ;;  %2742 = vadd.xlane.f32.xlu1 %v2741_v11  ;;  %v2738_v18 = vsel %vm267_vm9, %v2730_v13, 0.0 }
 0xa25   :  { %2739 = vadd.xlane.f32.xlu0 %v2738_v18  ;;  %v2733_v10 = vadd.f32 %v7495_v16, %v8281_v33 }
 0xa26   :  { %v6847_v46 = vpop.f32.mrb[24].mxu1  ;;  %v2732_v19 = vadd.f32 %v7496_v17, %v8279_v32 }
 0xa27   :  { %v2715_v20 = vpop.f32.mrb[25].mxu1  ;;  %v7497_v22 = vadd.f32 %v6847_v46, %v5967_v8  ;;  %v2747_v6 = vsel %vm267_vm9, %v2733_v10, 0.0 }
 0xa28   :  { %v7498_v51 = vadd.f32 %v5967_v8, %v2715_v20  ;;  %v2744_v25 = vsel %vm267_vm9, %v2732_v19, 0.0  ;;  %v2971_v8 = vld [vmem:[%s8864_s19] sm:$0xff] }
 0xa29   :  { %2745 = vadd.xlane.f32.xlu0 %v2744_v25  ;;  %v2735_v23 = vadd.f32 %v7497_v22, %v8292_v37  ;;  %v7329_v35 = vpack.c.bf16 %v2972_v15, %v2971_v8 }
 0xa2a   :  { %v2734_v14 = vadd.f32 %v7498_v51, %v8285_v34 }
 0xa2b   :  { %v2753_v32 = vsel %vm267_vm9, %v2735_v23, 0.0  ;;  %7330 = vmatprep.subr.bf16.mxu1 %v7329_v35 }
 0xa2c   :  { %v2750_v43 = vsel %vm267_vm9, %v2734_v14, 0.0  ;;  %7332 = vmatpush3.bf16.msra.mxu1 %v7329_v35 }
 0xa2d   :  { %2748 = vadd.xlane.f32.xlu0 %v2747_v6  ;;  %2751 = vadd.xlane.f32.xlu1 %v2750_v43  ;;  %v6040_v6 = vld [vmem:[%s8871_s4] ss:$0 sm:$0xff] }
 0xa31   :  { %2754 = vadd.xlane.f32.xlu0 %v2753_v32 }
 0xab1   :  { %v2743_v27 = vpop.xlane.xlu1 %2742 }
 0xab2   :  { %v2758_v21 = vmul.f32 0.03125, %v2743_v27  ;;  %v2740_v45 = vpop.xlane.xlu0 %2739 }
 0xab3   :  { %v2757_v49 = vmul.f32 0.03125, %v2740_v45  ;;  %v6041_v45 = vld [vmem:[%s8876_s9] ss:$0 sm:$0xff] }
 0xab4   :  { %v8822_v53 = vsub.f32 %v2731_v24, %v2758_v21 }
 0xab5   :  { %v8824_v33 = vsub.f32 %v2730_v13, %v2757_v49 }
 0xab6   :  { %v2746_v34 = vpop.xlane.xlu0 %2745  ;;  %v2770_v42 = vmul.f32 %v8822_v53, %v8822_v53 }
 0xab7   :  { %v2759_v50 = vmul.f32 0.03125, %v2746_v34  ;;  %v2769_v37 = vmul.f32 %v8824_v33, %v8824_v33 }
 0xab8   :  { %v2778_v58 = vsel %vm267_vm9, %v2770_v42, 0.0 }
 0xab9   :  { %v8831_v52 = vsub.f32 %v2732_v19, %v2759_v50  ;;  %2779 = vadd.xlane.f32.xlu0 %v2778_v58  ;;  %v2775_v61 = vsel %vm267_vm9, %v2769_v37, 0.0 }
 0xaba   :  { %v2749_v29 = vpop.xlane.xlu0 %2748  ;;  %2776 = vadd.xlane.f32.xlu1 %v2775_v61  ;;  %v2752_v38 = vpop.xlane.xlu1 %2751 }
 0xabb   :  { %v2760_v41 = vmul.f32 0.03125, %v2749_v29  ;;  %v2761_v3 = vmul.f32 0.03125, %v2752_v38  ;;  %v2771_v40 = vmul.f32 %v8831_v52, %v8831_v52 }
 0xabd   :  { %v8836_v47 = vsub.f32 %v2733_v10, %v2760_v41  ;;  %v8838_v44 = vsub.f32 %v2734_v14, %v2761_v3  ;;  %v2781_v36 = vsel %vm267_vm9, %v2771_v40, 0.0 }
 0xabe   :  { %v2755_v48 = vpop.xlane.xlu0 %2754  ;;  %2782 = vadd.xlane.f32.xlu1 %v2781_v36 }
 0xabf   :  { %v2762_v12 = vmul.f32 0.03125, %v2755_v48  ;;  %v2772_v54 = vmul.f32 %v8836_v47, %v8836_v47  ;;  %v2773_v56 = vmul.f32 %v8838_v44, %v8838_v44 }
 0xac1   :  { %v8845_v5 = vsub.f32 %v2735_v23, %v2762_v12  ;;  %v2784_v28 = vsel %vm267_vm9, %v2772_v54, 0.0  ;;  %v2787_v31 = vsel %vm267_vm9, %v2773_v56, 0.0  ;;  %v2974_v54 = vld [vmem:[%s8864_s19 + $0x18] sm:$0xff] }
 0xac2   :  { %2785 = vadd.xlane.f32.xlu0 %v2784_v28  ;;  %2788 = vadd.xlane.f32.xlu1 %v2787_v31 }
 0xac3   :  { %v2774_v60 = vmul.f32 %v8845_v5, %v8845_v5 }
 0xac5   :  { %v2790_v30 = vsel %vm267_vm9, %v2774_v60, 0.0 }
 0xac6   :  { %2791 = vadd.xlane.f32.xlu0 %v2790_v30 }
 0xb46   :  { %v2780_v9 = vpop.xlane.xlu0 %2779 }
 0xb47   :  { %v2794_v63 = vmul.f32 0.03125, %v2780_v9  ;;  %v2777_v24 = vpop.xlane.xlu1 %2776 }
 0xb48   :  { %v2793_v55 = vmul.f32 0.03125, %v2777_v24 }
 0xb49   :  { %v2800_v13 = vadd.f32 1e-05, %v2794_v63 }
 0xb4a   :  { %v2799_v39 = vadd.f32 1e-05, %v2793_v55 }
 0xb4b   :  { %7927 = vrsqrt.f32 %v2800_v13  ;;  %v2783_v11 = vpop.xlane.xlu1 %2782 }
 0xb4c   :  { %7929 = vrsqrt.f32 %v2799_v39  ;;  %v2795_v16 = vmul.f32 0.03125, %v2783_v11  ;;  %v6049_v39 = vld [vmem:[%s8918_s5] ss:$0 sm:$0xff] }
 0xb4e   :  { %v2801_v17 = vadd.f32 1e-05, %v2795_v16 }
 0xb4f   :  { %v2786_v18 = vpop.xlane.xlu0 %2785  ;;  %v2789_v46 = vpop.xlane.xlu1 %2788 }
 0xb50   :  { %7931 = vrsqrt.f32 %v2801_v17  ;;  %v2796_v19 = vmul.f32 0.03125, %v2786_v18  ;;  %v2797_v20 = vmul.f32 0.03125, %v2789_v46 }
 0xb52   :  { %v2802_v22 = vadd.f32 1e-05, %v2796_v19  ;;  %v2803_v51 = vadd.f32 1e-05, %v2797_v20 }
 0xb53   :  { %v2792_v25 = vpop.xlane.xlu0 %2791 }
 0xb54   :  { %7933 = vrsqrt.f32 %v2802_v22  ;;  %v2798_v10 = vmul.f32 0.03125, %v2792_v25 }
 0xb55   :  { %v7928_v14 = vpop.eup %7927  ;;  %7935 = vrsqrt.f32 %v2803_v51 }
 0xb56   :  { %v7930_v43 = vpop.eup %7929  ;;  %v2812_v23 = vmul.f32 %v7928_v14, %v8822_v53  ;;  %v2804_v32 = vadd.f32 1e-05, %v2798_v10 }
 0xb57   :  { %v2811_v27 = vmul.f32 %v7930_v43, %v8824_v33 }
 0xb58   :  { %v2824_v21 = vmul.f32 %v6040_v6, %v2812_v23  ;;  %7937 = vrsqrt.f32 %v2804_v32 }
 0xb59   :  { %v2823_v49 = vmul.f32 %v6040_v6, %v2811_v27 }
 0xb5a   :  { %v7932_v34 = vpop.eup %7931  ;;  %v2836_v37 = vadd.f32 %v6041_v45, %v2824_v21 }
 0xb5b   :  { %v8882_v42 = vadd.f32 %v6041_v45, %v2823_v49  ;;  %v2813_v50 = vmul.f32 %v7932_v34, %v8831_v52 }
 0xb5d   :  { %6856 = vmatprep.mubr.msk.f32.mxu0 %vm267_vm9, %v8882_v42  ;;  %v2825_v58 = vmul.f32 %v6040_v6, %v2813_v50 }
 0xb5e   :  { %v7934_v61 = vpop.eup %7933  ;;  %6857 = vmatmul.mubr.msk.f32.vlgmr.msra.gmra.mrb[36].mxu0 %vm267_vm9, %v2836_v37 }
 0xb5f   :  { %v7936_v53 = vpop.eup %7935  ;;  %v8888_v33 = vadd.f32 %v6041_v45, %v2825_v58  ;;  %v2814_v29 = vmul.f32 %v7934_v61, %v8836_v47 }
 0xb60   :  { %v2815_v38 = vmul.f32 %v7936_v53, %v8838_v44  ;;  %v2973_v44 = vld [vmem:[%s8864_s19 + $0x10] sm:$0xff] }
 0xb61   :  { %6859 = vmatprep.mubr.msk.f32.mxu0 %vm267_vm9, %v8888_v33  ;;  %v2826_v52 = vmul.f32 %v6040_v6, %v2814_v29  ;;  %v7333_v56 = vpack.c.bf16 %v2974_v54, %v2973_v44 }
 0xb62   :  { %v7938_v41 = vpop.eup %7937  ;;  %v2827_v3 = vmul.f32 %v6040_v6, %v2815_v38 }
 0xb63   :  { %v2838_v40 = vadd.f32 %v6041_v45, %v2826_v52  ;;  %v2816_v36 = vmul.f32 %v7938_v41, %v8845_v5  ;;  %7334 = vmatprep.subr.bf16.mxu1 %v7333_v56  ;;  %v6042_v5 = vld [vmem:[%s8906_s18] ss:$0 sm:$0xff] }
 0xb64   :  { %v8895_v48 = vadd.f32 %v6041_v45, %v2827_v3  ;;  %7336 = vmatpush3.bf16.msra.mxu1 %v7333_v56 }
 0xb65   :  { %6860 = vmatmul.mubr.msk.f32.gmra.mrb[38].mxu0 %vm267_vm9, %v2838_v40  ;;  %v2828_v12 = vmul.f32 %v6040_v6, %v2816_v36 }
 0xb66   :  { %6862 = vmatprep.mubr.msk.f32.mxu0 %vm267_vm9, %v8895_v48 }
 0xb67   :  { %v2840_v47 = vadd.f32 %v6041_v45, %v2828_v12 }
 0xb69   :  { %6863 = vmatmul.mubr.msk.f32.gmra.mrb[40].mxu0 %vm267_vm9, %v2840_v47 }
 0xc31   :  { %v6858_v28 = vpop.f32.mrb[36].mxu0 }
 0xc32   :  { %v2942_v31 = vadd.f32 %v6858_v28, %v6042_v5  ;;  %v2936_v60 = vpop.f32.mrb[37].mxu0 }
 0xc33   :  { %v2937_v30 = vadd.f32 %v6042_v5, %v2936_v60 }
 0xc34   :  { %v2966_v2 = vmax.f32 %v2942_v31, 0.0 }
 0xc35   :  { %v2965_v62 = vmax.f32 %v2937_v30, 0.0 }
 0xc37   :  { %6873 = vmatprep.mubr.msk.f32.mxu1 %vm267_vm9, %v2965_v62 }
 0xc38   :  { %v6861_v4 = vpop.f32.mrb[38].mxu0  ;;  %6874 = vmatmul.mubr.msk.f32.vlgmr.msra.gmra.mrb[44].mxu1 %vm267_vm9, %v2966_v2 }
 0xc39   :  { %v2952_v26 = vadd.f32 %v6861_v4, %v6042_v5  ;;  %v2946_v59 = vpop.f32.mrb[39].mxu0 }
 0xc3a   :  { %v2947_v7 = vadd.f32 %v6042_v5, %v2946_v59 }
 0xc3b   :  { %v2968_v35 = vmax.f32 %v2952_v26, 0.0 }
 0xc3c   :  { %v2967_v8 = vmax.f32 %v2947_v7, 0.0  ;;  %v6864_v15 = vpop.f32.mrb[40].mxu0 }
 0xc3d   :  { %v2962_v9 = vadd.f32 %v6864_v15, %v6042_v5  ;;  %v2956_v63 = vpop.f32.mrb[41].mxu0 }
 0xc3e   :  { %v2957_v24 = vadd.f32 %v6042_v5, %v2956_v63  ;;  %6876 = vmatprep.mubr.msk.f32.mxu1 %vm267_vm9, %v2967_v8 }
 0xc3f   :  { %6877 = vmatmul.mubr.msk.f32.gmra.mrb[46].mxu1 %vm267_vm9, %v2968_v35  ;;  %v2970_v13 = vmax.f32 %v2962_v9, 0.0  ;;  %v6058_v35 = vld [vmem:[%s8239_s23 + $0x20] sm:$0xff]  ;;  %v6059_v9 = vld [vmem:[%s8239_s23 + $0x28] sm:$0xff] }
 0xc40   :  { %v2969_v55 = vmax.f32 %v2957_v24, 0.0  ;;  %v7337_v63 = vpack.c.bf16 %v6059_v9, %v6058_v35  ;;  %v6060_v24 = vld [vmem:[%s8239_s23 + $0x30] sm:$0xff] }
 0xc42   :  { %6879 = vmatprep.mubr.msk.f32.mxu1 %vm267_vm9, %v2969_v55  ;;  %v6061_v55 = vld [vmem:[%s8239_s23 + $0x38] sm:$0xff]  ;;  %7338 = vmatprep.subr.bf16.mxu0 %v7337_v63  ;;  %s8125_s23 = smov 28  }
 0xc43   :  { %6880 = vmatmul.mubr.msk.f32.gmra.mrb[48].mxu1 %vm267_vm9, %v2970_v13  ;;  %v7341_v13 = vpack.c.bf16 %v6061_v55, %v6060_v24  ;;  %7340 = vmatpush3.bf16.msra.mxu0 %v7337_v63  ;;  %s8972_s27 = sld [smem:[%s9673_s0 + %s8125_s23]]  }
 0xc45   :  { %7342 = vmatprep.subr.bf16.mxu0 %v7341_v13 }
 0xc47   :  { %7344 = vmatpush3.bf16.msra.mxu0 %v7341_v13 }
 0xd0b   :  { %v6875_v11 = vpop.f32.mrb[44].mxu1 }
 0xd0c   :  { %v3072_v16 = vadd.f32 %v6875_v11, %v6049_v39  ;;  %v3066_v17 = vpop.f32.mrb[45].mxu1 }
 0xd0d   :  { %v3067_v18 = vadd.f32 %v6049_v39, %v3066_v17 }
 0xd0e   :  { %v3096_v46 = vadd.f32 %v3072_v16, %v2836_v37 }
 0xd0f   :  { %v3095_v19 = vadd.f32 %v3067_v18, %v8882_v42 }
 0xd10   :  { %v3106_v20 = vsel %vm267_vm9, %v3096_v46, 0.0 }
 0xd11   :  { %3107 = vadd.xlane.f32.xlu0 %v3106_v20  ;;  %v3103_v22 = vsel %vm267_vm9, %v3095_v19, 0.0 }
 0xd12   :  { %3104 = vadd.xlane.f32.xlu1 %v3103_v22  ;;  %v6878_v51 = vpop.f32.mrb[46].mxu1 }
 0xd13   :  { %v3082_v25 = vadd.f32 %v6878_v51, %v6049_v39  ;;  %v3076_v10 = vpop.f32.mrb[47].mxu1 }
 0xd14   :  { %v3077_v14 = vadd.f32 %v6049_v39, %v3076_v10 }
 0xd15   :  { %v3098_v6 = vadd.f32 %v3082_v25, %v2838_v40 }
 0xd16   :  { %v3097_v43 = vadd.f32 %v3077_v14, %v8888_v33  ;;  %v6881_v23 = vpop.f32.mrb[48].mxu1 }
 0xd17   :  { %v3092_v32 = vadd.f32 %v6881_v23, %v6049_v39  ;;  %v3086_v27 = vpop.f32.mrb[49].mxu1  ;;  %v3112_v21 = vsel %vm267_vm9, %v3098_v6, 0.0 }
 0xd18   :  { %v3087_v45 = vadd.f32 %v6049_v39, %v3086_v27  ;;  %3113 = vadd.xlane.f32.xlu0 %v3112_v21  ;;  %v3109_v49 = vsel %vm267_vm9, %v3097_v43, 0.0  ;;  %v6056_v21 = vld [vmem:[%s8967_s12] ss:$0 sm:$0xff] }
 0xd19   :  { %v3100_v34 = vadd.f32 %v3092_v32, %v2840_v47  ;;  %3110 = vadd.xlane.f32.xlu1 %v3109_v49 }
 0xd1a   :  { %v3099_v42 = vadd.f32 %v3087_v45, %v8895_v48 }
 0xd1b   :  { %v3118_v50 = vsel %vm267_vm9, %v3100_v34, 0.0 }
 0xd1c   :  { %3119 = vadd.xlane.f32.xlu0 %v3118_v50  ;;  %v3115_v37 = vsel %vm267_vm9, %v3099_v42, 0.0 }
 0xd1d   :  { %3116 = vadd.xlane.f32.xlu1 %v3115_v37  ;;  %v6057_v37 = vld [vmem:[%s8972_s27] ss:$0 sm:$0xff] }
 0xd9e   :  { %v3108_v58 = vpop.xlane.xlu0 %3107 }
 0xd9f   :  { %v3122_v61 = vmul.f32 0.03125, %v3108_v58  ;;  %v3105_v53 = vpop.xlane.xlu1 %3104 }
 0xda0   :  { %v3121_v33 = vmul.f32 0.03125, %v3105_v53 }
 0xda1   :  { %v8930_v29 = vsub.f32 %v3096_v46, %v3122_v61 }
 0xda2   :  { %v8932_v38 = vsub.f32 %v3095_v19, %v3121_v33 }
 0xda3   :  { %v3134_v52 = vmul.f32 %v8930_v29, %v8930_v29 }
 0xda4   :  { %v3133_v41 = vmul.f32 %v8932_v38, %v8932_v38 }
 0xda5   :  { %v3114_v3 = vpop.xlane.xlu0 %3113  ;;  %v3142_v40 = vsel %vm267_vm9, %v3134_v52, 0.0 }
 0xda6   :  { %v3124_v36 = vmul.f32 0.03125, %v3114_v3  ;;  %3143 = vadd.xlane.f32.xlu0 %v3142_v40  ;;  %v3111_v48 = vpop.xlane.xlu1 %3110  ;;  %v3139_v12 = vsel %vm267_vm9, %v3133_v41, 0.0 }
 0xda7   :  { %v3123_v47 = vmul.f32 0.03125, %v3111_v48  ;;  %3140 = vadd.xlane.f32.xlu1 %v3139_v12 }
 0xda8   :  { %v8940_v44 = vsub.f32 %v3098_v6, %v3124_v36 }
 0xda9   :  { %v8942_v54 = vsub.f32 %v3097_v43, %v3123_v47  ;;  %v3120_v56 = vpop.xlane.xlu0 %3119 }
 0xdaa   :  { %v3126_v5 = vmul.f32 0.03125, %v3120_v56  ;;  %v3117_v28 = vpop.xlane.xlu1 %3116  ;;  %v3136_v31 = vmul.f32 %v8940_v44, %v8940_v44 }
 0xdab   :  { %v3125_v60 = vmul.f32 0.03125, %v3117_v28  ;;  %v3135_v30 = vmul.f32 %v8942_v54, %v8942_v54 }
 0xdac   :  { %v8948_v62 = vsub.f32 %v3100_v34, %v3126_v5  ;;  %v3148_v2 = vsel %vm267_vm9, %v3136_v31, 0.0  ;;  %v6063_v31 = vld [vmem:[%s8299_s13 + $0x1] ss:$0 sm:$0xff]  ;;  %s8126_s13 = smov 31  }
 0xdad   :  { %v8951_v4 = vsub.f32 %v3099_v42, %v3125_v60  ;;  %3149 = vadd.xlane.f32.xlu0 %v3148_v2  ;;  %v3145_v26 = vsel %vm267_vm9, %v3135_v30, 0.0 }
 0xdae   :  { %3146 = vadd.xlane.f32.xlu1 %v3145_v26  ;;  %v3138_v59 = vmul.f32 %v8948_v62, %v8948_v62 }
 0xdaf   :  { %v3137_v7 = vmul.f32 %v8951_v4, %v8951_v4 }
 0xdb0   :  { %v3154_v8 = vsel %vm267_vm9, %v3138_v59, 0.0 }
 0xdb1   :  { %3155 = vadd.xlane.f32.xlu0 %v3154_v8  ;;  %v3151_v15 = vsel %vm267_vm9, %v3137_v7, 0.0 }
 0xdb2   :  { %3152 = vadd.xlane.f32.xlu1 %v3151_v15 }
 0xe33   :  { %v3144_v39 = vpop.xlane.xlu0 %3143 }
 0xe34   :  { %v3158_v11 = vmul.f32 0.03125, %v3144_v39  ;;  %v3141_v16 = vpop.xlane.xlu1 %3140 }
 0xe35   :  { %v3157_v17 = vmul.f32 0.03125, %v3141_v16 }
 0xe36   :  { %v3164_v18 = vadd.f32 1e-05, %v3158_v11 }
 0xe37   :  { %v3163_v46 = vadd.f32 1e-05, %v3157_v17 }
 0xe38   :  { %7939 = vrsqrt.f32 %v3164_v18 }
 0xe39   :  { %7941 = vrsqrt.f32 %v3163_v46 }
 0xe3a   :  { %v3150_v19 = vpop.xlane.xlu0 %3149 }
 0xe3b   :  { %v3160_v20 = vmul.f32 0.03125, %v3150_v19  ;;  %v3147_v22 = vpop.xlane.xlu1 %3146 }
 0xe3c   :  { %v3159_v51 = vmul.f32 0.03125, %v3147_v22 }
 0xe3d   :  { %v3166_v25 = vadd.f32 1e-05, %v3160_v20 }
 0xe3e   :  { %v3165_v10 = vadd.f32 1e-05, %v3159_v51  ;;  %v3156_v14 = vpop.xlane.xlu0 %3155 }
 0xe3f   :  { %7943 = vrsqrt.f32 %v3166_v25  ;;  %v3162_v6 = vmul.f32 0.03125, %v3156_v14  ;;  %v3153_v43 = vpop.xlane.xlu1 %3152 }
 0xe40   :  { %7945 = vrsqrt.f32 %v3165_v10  ;;  %v3161_v23 = vmul.f32 0.03125, %v3153_v43 }
 0xe41   :  { %v3168_v32 = vadd.f32 1e-05, %v3162_v6 }
 0xe42   :  { %v7940_v27 = vpop.eup %7939  ;;  %v3167_v45 = vadd.f32 1e-05, %v3161_v23 }
 0xe43   :  { %v7942_v49 = vpop.eup %7941  ;;  %v3176_v34 = vmul.f32 %v7940_v27, %v8930_v29  ;;  %7947 = vrsqrt.f32 %v3168_v32 }
 0xe44   :  { %7949 = vrsqrt.f32 %v3167_v45  ;;  %v3175_v42 = vmul.f32 %v7942_v49, %v8932_v38 }
 0xe45   :  { %v3188_v50 = vmul.f32 %v6056_v21, %v3176_v34 }
 0xe46   :  { %v3187_v58 = vmul.f32 %v6056_v21, %v3175_v42 }
 0xe47   :  { %v8980_v33 = vadd.f32 %v6057_v37, %v3188_v50 }
 0xe48   :  { %v8978_v61 = vadd.f32 %v6057_v37, %v3187_v58 }
 0xe49   :  { %v7944_v53 = vpop.eup %7943 }
 0xe4a   :  { %v7946_v52 = vpop.eup %7945  ;;  %6890 = vmatprep.mubr.msk.f32.mxu0 %vm267_vm9, %v8978_v61  ;;  %v3178_v41 = vmul.f32 %v7944_v53, %v8940_v44 }
 0xe4b   :  { %6891 = vmatmul.mubr.msk.f32.vlgmr.msra.gmra.mrb[42].mxu0 %vm267_vm9, %v8980_v33  ;;  %v3177_v29 = vmul.f32 %v7946_v52, %v8942_v54 }
 0xe4c   :  { %v3190_v38 = vmul.f32 %v6056_v21, %v3178_v41 }
 0xe4d   :  { %v7948_v3 = vpop.eup %7947  ;;  %v3189_v40 = vmul.f32 %v6056_v21, %v3177_v29 }
 0xe4e   :  { %v7950_v36 = vpop.eup %7949  ;;  %v3180_v48 = vmul.f32 %v7948_v3, %v8948_v62  ;;  %v8992_v56 = vadd.f32 %v6057_v37, %v3190_v38  ;;  %v9098_v38 = vld [vmem:[%s8401_s20 + $0x8] sm:$0xff] }
 0xe4f   :  { %v8989_v12 = vadd.f32 %v6057_v37, %v3189_v40  ;;  %v3179_v47 = vmul.f32 %v7950_v36, %v8951_v4  ;;  %v9102_v36 = vld [vmem:[%s8401_s20] sm:$0xff] }
 0xe50   :  { %v3192_v5 = vmul.f32 %v6056_v21, %v3180_v48 }
 0xe51   :  { %6893 = vmatprep.mubr.msk.f32.mxu0 %vm267_vm9, %v8989_v12  ;;  %v3191_v44 = vmul.f32 %v6056_v21, %v3179_v47 }
 0xe52   :  { %6894 = vmatmul.mubr.msk.f32.gmra.mrb[44].mxu0 %vm267_vm9, %v8992_v56  ;;  %v9000_v28 = vadd.f32 %v6057_v37, %v3192_v5 }
 0xe53   :  { %v8998_v54 = vadd.f32 %v6057_v37, %v3191_v44 }
 0xe55   :  { %6896 = vmatprep.mubr.msk.f32.mxu0 %vm267_vm9, %v8998_v54 }
 0xe56   :  { %6897 = vmatmul.mubr.msk.f32.gmra.mrb[46].mxu0 %vm267_vm9, %v9000_v28 }
 0xf1e   :  { %v6892_v60 = vpop.f32.mrb[42].mxu0 }
 0xf1f   :  { %v9007_v30 = vadd.f32 %v6892_v60, %v6063_v31  ;;  %v3302_v62 = vpop.f32.mrb[43].mxu0  ;;  %v9108_v60 = vld [vmem:[%s8401_s20 + $0x10] sm:$0xff] }
 0xf20   :  { %v9009_v2 = vadd.f32 %v6063_v31, %v3302_v62 }
 0xf22   :  { %6911 = vmatprep.mubr.msk.f32.mxu1 %vm910_vm14, %v9009_v2  ;;  %v9015_v4 = vpack.i.bf16 %v9007_v30, %v9009_v2 }
 0xf24   :  { %7712 = vrot.lane.b32.xlu1 %v9015_v4, %s8104_s14 }
 0xf25   :  { %v6895_v26 = vpop.f32.mrb[44].mxu0 }
 0xf26   :  { %v9019_v59 = vadd.f32 %v6895_v26, %v6063_v31  ;;  %v3312_v7 = vpop.f32.mrb[45].mxu0  ;;  %v9112_v26 = vld [vmem:[%s8401_s20 + $0x18] sm:$0xff] }
 0xf27   :  { %v9021_v8 = vadd.f32 %v6063_v31, %v3312_v7 }
 0xf29   :  { %v6898_v15 = vpop.f32.mrb[46].mxu0  ;;  %v9025_v35 = vpack.i.bf16 %v9019_v59, %v9021_v8 }
 0xf2a   :  { %v9027_v9 = vadd.f32 %v6898_v15, %v6063_v31  ;;  %v3322_v63 = vpop.f32.mrb[47].mxu0 }
 0xf2b   :  { %v9029_v24 = vadd.f32 %v6063_v31, %v3322_v63  ;;  %7717 = vrot.lane.b32.xlu0 %v9025_v35, %s8104_s14 }
 0xf2d   :  { %v9035_v55 = vpack.i.bf16 %v9027_v9, %v9029_v24 }
 0xf2f   :  { %7732 = vrot.lane.b32.xlu0 %v9025_v35, %s8105_s15  ;;  %7722 = vrot.lane.b32.xlu1 %v9035_v55, %s8104_s14 }
 0xf33   :  { %3797 = vrot.lane.b32.xlu0 %v9009_v2, %s8106_s16  ;;  %7727 = vrot.lane.b32.xlu1 %v9015_v4, %s8105_s15 }
 0xf37   :  { %3801 = vrot.lane.b32.xlu0 %v9021_v8, %s8106_s16  ;;  %7737 = vrot.lane.b32.xlu1 %v9035_v55, %s8105_s15 }
 0xf3b   :  { %3805 = vrot.lane.b32.xlu0 %v9029_v24, %s8106_s16  ;;  %3799 = vrot.lane.b32.xlu1 %v9007_v30, %s8106_s16 }
 0xf3f   :  { %3803 = vrot.lane.b32.xlu1 %v9019_v59, %s8106_s16 }
 0xf43   :  { %3807 = vrot.lane.b32.xlu1 %v9027_v9, %s8106_s16  ;;  %s5910_s16 = sld [smem:[%s9673_s0 + %s8126_s13]]  }
 0xf96   :  { %v7713_v13 = vpop.permute.xlu1 %7712 }
 0xf97   :  { %v7715_v39 = vunpack.i.h.bf16 %v7713_v13  ;;  %v7714_v11 = vunpack.i.l.bf16 %v7713_v13 }
 0xf99   :  { %v7345_v16 = vpack.c.bf16 %v7715_v39, %v7714_v11  ;;  %v9117_v39 = vld [vmem:[%s8401_s20 + $0x20] sm:$0xff] }
 0xf9b   :  { %7347 = vmatprep.subr.msk.bf16.mxu1 %vm8354_vm15, %v7345_v16 }
 0xf9c   :  { %7350 = vmatpush3.bf16.xpose.msk.msra.mxu1 %vm8354_vm15, %v7345_v16  ;;  %v9121_v16 = vld [vmem:[%s8401_s20 + $0x28] sm:$0xff]  ;;  %s8127_s20 = smov 29  }
 0xf9d   :  { %v7718_v17 = vpop.permute.xlu0 %7717 }
 0xf9e   :  { %v7720_v18 = vunpack.i.h.bf16 %v7718_v17  ;;  %v7719_v46 = vunpack.i.l.bf16 %v7718_v17 }
 0xfa0   :  { %v7351_v19 = vpack.c.bf16 %v7720_v18, %v7719_v46 }
 0xfa1   :  { %v7723_v20 = vpop.permute.xlu1 %7722  ;;  %v7733_v23 = vpop.permute.xlu0 %7732 }
 0xfa2   :  { %v7725_v22 = vunpack.i.h.bf16 %v7723_v20  ;;  %v7724_v51 = vunpack.i.l.bf16 %v7723_v20  ;;  %7353 = vmatprep.subr.msk.bf16.mxu1 %vm8354_vm15, %v7351_v19  ;;  %v7735_v32 = vunpack.i.h.bf16 %v7733_v23  ;;  %v7734_v27 = vunpack.i.l.bf16 %v7733_v23 }
 0xfa4   :  { %v7357_v25 = vpack.c.bf16 %v7725_v22, %v7724_v51  ;;  %7356 = vmatpush3.bf16.xpose.msk.msra.mxu1 %vm8354_vm15, %v7351_v19  ;;  %v7381_v21 = vpack.c.bf16 %v7735_v32, %v7734_v27 }
 0xfa5   :  { %v7728_v10 = vpop.permute.xlu1 %7727  ;;  %v3798_v42 = vpop.permute.xlu0 %3797 }
 0xfa6   :  { %7359 = vmatprep.subr.msk.bf16.mxu1 %vm8354_vm15, %v7357_v25  ;;  %v7730_v14 = vunpack.i.h.bf16 %v7728_v10  ;;  %v7729_v6 = vunpack.i.l.bf16 %v7728_v10 }
 0xfa8   :  { %v7375_v43 = vpack.c.bf16 %v7730_v14, %v7729_v6 }
 0xfa9   :  { %v7738_v45 = vpop.permute.xlu1 %7737  ;;  %v3802_v58 = vpop.permute.xlu0 %3801 }
 0xfaa   :  { %v7740_v49 = vunpack.i.h.bf16 %v7738_v45  ;;  %v7739_v34 = vunpack.i.l.bf16 %v7738_v45 }
 0xfac   :  { %7362 = vmatpush3.bf16.xpose.msk.msra.mxu1 %vm8354_vm15, %v7357_v25  ;;  %v7387_v50 = vpack.c.bf16 %v7740_v49, %v7739_v34 }
 0xfad   :  { %7377 = vmatprep.subr.msk.bf16.mxu1 %vm8354_vm15, %v7375_v43  ;;  %v3800_v37 = vpop.permute.xlu1 %3799  ;;  %v3806_v52 = vpop.permute.xlu0 %3805 }
 0xfb1   :  { %v3804_v53 = vpop.permute.xlu1 %3803 }
 0xfb3   :  { %6912 = vmatmul.mubr.msk.f32.vlgmr.msra.gmra.mrb[50].mxu1 %vm910_vm14, %v9007_v30 }
 0xfb4   :  { %6914 = vmatprep.mubr.msk.f32.mxu1 %vm910_vm14, %v9021_v8  ;;  %7380 = vmatpush3.bf16.xpose.msk.msra.mxu1 %vm8354_vm15, %v7375_v43 }
 0xfb5   :  { %7383 = vmatprep.subr.msk.bf16.mxu1 %vm8354_vm15, %v7381_v21  ;;  %v3808_v41 = vpop.permute.xlu1 %3807 }
 0xfb7   :  { %6915 = vmatmul.mubr.msk.f32.gmra.mrb[52].mxu1 %vm910_vm14, %v9019_v59 }
 0xfb8   :  { %6917 = vmatprep.mubr.msk.f32.mxu1 %vm910_vm14, %v9029_v24 }
 0xfbb   :  { %6918 = vmatmul.mubr.msk.f32.gmra.mrb[54].mxu1 %vm910_vm14, %v9027_v9 }
 0xfbc   :  { %7386 = vmatpush3.bf16.xpose.msk.msra.mxu1 %vm8354_vm15, %v7381_v21  ;;  %6964 = vmatprep.mubr.msk.f32.mxu1 %vm910_vm14, %v3798_v42 }
 0xfbd   :  { %7389 = vmatprep.subr.msk.bf16.mxu1 %vm8354_vm15, %v7387_v50 }
 0xfc4   :  { %7392 = vmatpush3.bf16.xpose.msk.msra.mxu1 %vm8354_vm15, %v7387_v50 }
 0xfcb   :  { %6965 = vmatmul.mubr.msk.f32.vlgmr.msra.gmra.mrb[56].mxu1 %vm910_vm14, %v3800_v37 }
 0xfcc   :  { %6967 = vmatprep.mubr.msk.f32.mxu1 %vm910_vm14, %v3802_v58 }
 0xfcf   :  { %6968 = vmatmul.mubr.msk.f32.gmra.mrb[58].mxu1 %vm910_vm14, %v3804_v53 }
 0xfd0   :  { %6970 = vmatprep.mubr.msk.f32.mxu1 %vm910_vm14, %v3806_v52 }
 0xfd3   :  { %6971 = vmatmul.mubr.msk.f32.gmra.mrb[60].mxu1 %vm910_vm14, %v3808_v41 }
0x1086   :  { %v6913_v29 = vpop.f32.mrb[50].mxu1 }
0x1087   :  { %v3452_v3 = vadd.f32 %v9098_v38, %v6913_v29  ;;  %v3446_v40 = vpop.f32.mrb[51].mxu1 }
0x1088   :  { %v3447_v48 = vadd.f32 %v9102_v36, %v3446_v40 }
0x1089   :  { %v3478_v47 = vsel %vm1030_vm1, %v3452_v3, -inf }
0x108a   :  { %3479 = vmax.xlane.f32.xlu1 %v3478_v47  ;;  %v6916_v5 = vpop.f32.mrb[52].mxu1  ;;  %v3475_v44 = vsel %vm1030_vm1, %v3447_v48, -inf }
0x108b   :  { %v3456_v31 = vpop.f32.mrb[53].mxu1  ;;  %3476 = vmax.xlane.f32.xlu0 %v3475_v44  ;;  %v3462_v7 = vadd.f32 %v9112_v26, %v6916_v5 }
0x108c   :  { %v3457_v62 = vadd.f32 %v9108_v60, %v3456_v31 }
0x108d   :  { %v3484_v46 = vsel %vm1030_vm1, %v3462_v7, -inf }
0x108e   :  { %v6919_v15 = vpop.f32.mrb[54].mxu1  ;;  %v3481_v63 = vsel %vm1030_vm1, %v3457_v62, -inf }
0x108f   :  { %v3466_v13 = vpop.f32.mrb[55].mxu1  ;;  %3482 = vmax.xlane.f32.xlu0 %v3481_v63  ;;  %v3472_v17 = vadd.f32 %v9121_v16, %v6919_v15 }
0x1090   :  { %v3467_v11 = vadd.f32 %v9117_v39, %v3466_v13 }
0x1091   :  { %v3490_v19 = vsel %vm1030_vm1, %v3472_v17, -inf }
0x1092   :  { %v3487_v18 = vsel %vm1030_vm1, %v3467_v11, -inf }
0x1093   :  { %3488 = vmax.xlane.f32.xlu1 %v3487_v18  ;;  %3485 = vmax.xlane.f32.xlu0 %v3484_v46 }
0x1097   :  { %3491 = vmax.xlane.f32.xlu0 %v3490_v19 }
0x109e   :  { %v9127_v20 = vpop.f32.mrb[56].mxu1 }
0x109f   :  { %v9129_v22 = vpop.f32.mrb[57].mxu1 }
0x10a2   :  { %v9131_v51 = vpop.f32.mrb[58].mxu1 }
0x10a3   :  { %v9133_v25 = vpop.f32.mrb[59].mxu1 }
0x10a4   :  { %7742 = vrot.lane.b32.xlu1 %v9015_v4, %s8108_s21 }
0x10a6   :  { %v9137_v10 = vpop.f32.mrb[60].mxu1 }
0x10a7   :  { %v3931_v14 = vpop.f32.mrb[61].mxu1 }
0x1117   :  { %v3480_v6 = vpop.xlane.xlu1 %3479 }
0x1118   :  { %v3494_v43 = vsub.f32 %v3452_v3, %v3480_v6  ;;  %v3477_v23 = vpop.xlane.xlu0 %3476  ;;  %v9184_v6 = vadd.f32 %v9098_v38, %v9127_v20 }
0x1119   :  { %v3493_v32 = vsub.f32 %v3447_v48, %v3477_v23  ;;  %v9191_v23 = vadd.f32 %v9117_v39, %v3931_v14 }
0x111a   :  { %v3501_v27 = vmul.f32 1.442695, %v3494_v43  ;;  %v9188_v43 = vadd.f32 %v9102_v36, %v9129_v22  ;;  %v9205_v22 = vadd.f32 %v9112_v26, %v9131_v51 }
0x111b   :  { %v3499_v21 = vmul.f32 1.442695, %v3493_v32  ;;  %v3943_v32 = vsel %vm1030_vm1, %v9184_v6, -inf  ;;  %v3952_v20 = vsel %vm1030_vm1, %v9191_v23, -inf }
0x111c   :  { %7951 = vpow2.f32 %v3501_v27  ;;  %v3483_v45 = vpop.xlane.xlu0 %3482  ;;  %v9197_v27 = vadd.f32 %v9108_v60, %v9133_v25  ;;  %v9211_v25 = vadd.f32 %v9121_v16, %v9137_v10 }
0x111d   :  { %7953 = vpow2.f32 %v3499_v21  ;;  %v3495_v49 = vsub.f32 %v3457_v62, %v3483_v45  ;;  %v3940_v21 = vsel %vm1030_vm1, %v9188_v43, -inf  ;;  %v3949_v45 = vsel %vm1030_vm1, %v9205_v22, -inf }
0x111e   :  { %v3946_v14 = vsel %vm1030_vm1, %v9197_v27, -inf }
0x111f   :  { %v3503_v34 = vmul.f32 1.442695, %v3495_v49  ;;  %v3955_v49 = vsel %vm1030_vm1, %v9211_v25, -inf }
0x1120   :  { %v3489_v42 = vpop.xlane.xlu1 %3488  ;;  %v3486_v50 = vpop.xlane.xlu0 %3485 }
0x1121   :  { %7955 = vpow2.f32 %v3503_v34  ;;  %v3497_v37 = vsub.f32 %v3467_v11, %v3489_v42  ;;  %v3496_v58 = vsub.f32 %v3462_v7, %v3486_v50 }
0x1123   :  { %v3507_v53 = vmul.f32 1.442695, %v3497_v37  ;;  %v3505_v52 = vmul.f32 1.442695, %v3496_v58 }
0x1124   :  { %v7743_v41 = vpop.permute.xlu1 %7742  ;;  %v3492_v29 = vpop.xlane.xlu0 %3491 }
0x1125   :  { %7957 = vpow2.f32 %v3507_v53  ;;  %v7745_v3 = vunpack.i.h.bf16 %v7743_v41  ;;  %v7744_v40 = vunpack.i.l.bf16 %v7743_v41  ;;  %v3498_v48 = vsub.f32 %v3472_v17, %v3492_v29 }
0x1126   :  { %v9139_v47 = vpop.eup %7951  ;;  %7959 = vpow2.f32 %v3505_v52 }
0x1127   :  { %v7954_v5 = vpop.eup %7953  ;;  %v7363_v44 = vpack.c.bf16 %v7745_v3, %v7744_v40  ;;  %v3509_v31 = vmul.f32 1.442695, %v3498_v48  ;;  %v3514_v62 = vsel %vm1030_vm1, %v9139_v47, 0.0 }
0x1128   :  { %3515 = vadd.xlane.f32.xlu0 %v3514_v62  ;;  %v3511_v7 = vsel %vm1030_vm1, %v7954_v5, 0.0 }
0x1129   :  { %7961 = vpow2.f32 %v3509_v31  ;;  %7364 = vmatprep.subr.bf16.mxu0 %v7363_v44  ;;  %3512 = vadd.xlane.f32.xlu1 %v3511_v7 }
0x112a   :  { %7366 = vmatpush3.bf16.msra.mxu0 %v7363_v44 }
0x112b   :  { %v9144_v15 = vpop.eup %7955 }
0x112c   :  { %v3517_v63 = vsel %vm1030_vm1, %v9144_v15, 0.0 }
0x112d   :  { %3518 = vadd.xlane.f32.xlu1 %v3517_v63 }
0x112f   :  { %v9148_v13 = vpop.eup %7957 }
0x1130   :  { %v9150_v11 = vpop.eup %7959  ;;  %v3523_v17 = vsel %vm1030_vm1, %v9148_v13, 0.0 }
0x1131   :  { %3524 = vadd.xlane.f32.xlu1 %v3523_v17  ;;  %v3520_v18 = vsel %vm1030_vm1, %v9150_v11, 0.0 }
0x1132   :  { %3521 = vadd.xlane.f32.xlu0 %v3520_v18 }
0x1133   :  { %v9156_v46 = vpop.eup %7961 }
0x1134   :  { %v3526_v19 = vsel %vm1030_vm1, %v9156_v46, 0.0 }
0x1136   :  { %3527 = vadd.xlane.f32.xlu0 %v3526_v19 }
0x1142   :  { %7752 = vrot.lane.b32.xlu1 %v9035_v55, %s8108_s21 }
0x1146   :  { %7757 = vrot.lane.b32.xlu1 %v9015_v4, %s8109_s22 }
0x114a   :  { %7767 = vrot.lane.b32.xlu1 %v9035_v55, %s8109_s22 }
0x114c   :  { %7747 = vrot.lane.b32.xlu0 %v9025_v35, %s8108_s21 }
0x114e   :  { %4258 = vrot.lane.b32.xlu1 %v9007_v30, %s8110_s24 }
0x1150   :  { %7762 = vrot.lane.b32.xlu0 %v9025_v35, %s8109_s22 }
0x1152   :  { %4262 = vrot.lane.b32.xlu1 %v9019_v59, %s8110_s24 }
0x1154   :  { %4256 = vrot.lane.b32.xlu0 %v9009_v2, %s8110_s24 }
0x1156   :  { %4266 = vrot.lane.b32.xlu1 %v9027_v9, %s8110_s24 }
0x1158   :  { %4260 = vrot.lane.b32.xlu0 %v9021_v8, %s8110_s24 }
0x115c   :  { %4264 = vrot.lane.b32.xlu0 %v9029_v24, %s8110_s24  ;;  %s5908_s24 = sld [smem:[%s9673_s0 + %s8127_s20]]  }
0x117a   :  { %3944 = vmax.xlane.f32.xlu1 %v3943_v32 }
0x117b   :  { %3941 = vmax.xlane.f32.xlu0 %v3940_v21 }
0x117e   :  { %3953 = vmax.xlane.f32.xlu1 %v3952_v20 }
0x117f   :  { %3947 = vmax.xlane.f32.xlu0 %v3946_v14 }
0x1183   :  { %3950 = vmax.xlane.f32.xlu0 %v3949_v45 }
0x1187   :  { %3956 = vmax.xlane.f32.xlu0 %v3955_v49 }
0x118f   :  { %7772 = vrot.lane.b32.xlu1 %v9015_v4, %s8111_s25 }
0x11b5   :  { %v3516_v42 = vpop.xlane.xlu0 %3515 }
0x11b6   :  { %v3513_v51 = vpop.xlane.xlu1 %3512 }
0x11b7   :  { %7963 = vrcp.f32 %v3513_v51  ;;  %v6070_v51 = vld [vmem:[%s8536_s29 + $0x20] sm:$0xff] }
0x11b8   :  { %7965 = vrcp.f32 %v3516_v42 }
0x11ba   :  { %v3519_v34 = vpop.xlane.xlu1 %3518 }
0x11bb   :  { %7967 = vrcp.f32 %v3519_v34 }
0x11be   :  { %v3525_v50 = vpop.xlane.xlu1 %3524 }
0x11bf   :  { %v3522_v37 = vpop.xlane.xlu0 %3521 }
0x11c0   :  { %7969 = vrcp.f32 %v3522_v37 }
0x11c1   :  { %v7964_v58 = vpop.eup %7963  ;;  %7971 = vrcp.f32 %v3525_v50 }
0x11c2   :  { %v7753_v10 = vpop.permute.xlu1 %7752  ;;  %v3530_v53 = vmul.f32 %v7964_v58, %v7954_v5  ;;  %v7966_v20 = vpop.eup %7965 }
0x11c3   :  { %v3528_v52 = vpop.xlane.xlu0 %3527  ;;  %v7755_v48 = vunpack.i.h.bf16 %v7753_v10  ;;  %v7754_v44 = vunpack.i.l.bf16 %v7753_v10  ;;  %v3532_v42 = vmul.f32 %v7966_v20, %v9139_v47 }
0x11c4   :  { %6932 = vmatprep.mubr.msk.f32.mxu0 %vm1030_vm1, %v3530_v53  ;;  %7973 = vrcp.f32 %v3528_v52 }
0x11c5   :  { %v7371_v5 = vpack.c.bf16 %v7755_v48, %v7754_v44  ;;  %v7968_v34 = vpop.eup %7967 }
0x11c6   :  { %v7758_v41 = vpop.permute.xlu1 %7757  ;;  %v3534_v58 = vmul.f32 %v7968_v34, %v9144_v15 }
0x11c7   :  { %v7760_v29 = vunpack.i.h.bf16 %v7758_v41  ;;  %v7759_v3 = vunpack.i.l.bf16 %v7758_v41  ;;  %v7748_v40 = vpop.permute.xlu0 %7747 }
0x11c8   :  { %v7750_v31 = vunpack.i.h.bf16 %v7748_v40  ;;  %v7749_v62 = vunpack.i.l.bf16 %v7748_v40 }
0x11c9   :  { %v7405_v7 = vpack.c.bf16 %v7760_v29, %v7759_v3 }
0x11ca   :  { %v7367_v63 = vpack.c.bf16 %v7750_v31, %v7749_v62  ;;  %v7768_v18 = vpop.permute.xlu1 %7767  ;;  %v7970_v50 = vpop.eup %7969 }
0x11cb   :  { %v7763_v17 = vpop.permute.xlu0 %7762  ;;  %7407 = vmatprep.subr.msk.bf16.mxu1 %vm8354_vm15, %v7405_v7  ;;  %v7770_v14 = vunpack.i.h.bf16 %v7768_v18  ;;  %v7769_v45 = vunpack.i.l.bf16 %v7768_v18  ;;  %v7972_v10 = vpop.eup %7971  ;;  %v3536_v53 = vmul.f32 %v7970_v50, %v9150_v11 }
0x11cc   :  { %v7765_v19 = vunpack.i.h.bf16 %v7763_v17  ;;  %v7764_v32 = vunpack.i.l.bf16 %v7763_v17  ;;  %7368 = vmatprep.subr.bf16.mxu0 %v7367_v63  ;;  %7410 = vmatpush3.bf16.xpose.msk.msra.mxu1 %vm8354_vm15, %v7405_v7  ;;  %v3538_v52 = vmul.f32 %v7972_v10, %v9148_v13 }
0x11cd   :  { %7370 = vmatpush3.bf16.msra.mxu0 %v7367_v63  ;;  %v7417_v37 = vpack.c.bf16 %v7770_v14, %v7769_v45 }
0x11ce   :  { %v7411_v21 = vpack.c.bf16 %v7765_v19, %v7764_v32  ;;  %7372 = vmatprep.subr.bf16.mxu0 %v7371_v5  ;;  %v7974_v47 = vpop.eup %7973  ;;  %v4259_v41 = vpop.permute.xlu1 %4258 }
0x11cf   :  { %v4257_v49 = vpop.permute.xlu0 %4256  ;;  %v3540_v15 = vmul.f32 %v7974_v47, %v9156_v46 }
0x11d0   :  { %7413 = vmatprep.subr.msk.bf16.mxu1 %vm8354_vm15, %v7411_v21  ;;  %7017 = vmatprep.mubr.msk.f32.mxu1 %vm910_vm14, %v4257_v49 }
0x11d1   :  { %7374 = vmatpush3.bf16.msra.mxu0 %v7371_v5 }
0x11d2   :  { %6941 = vmatprep.subr.mxu0 %v6070_v51  ;;  %v4263_v11 = vpop.permute.xlu1 %4262 }
0x11d3   :  { %v4261_v29 = vpop.permute.xlu0 %4260 }
0x11d4   :  { %6933 = vmatmul.mubr.msk.f32.vlgmr.msra.gmra.mrb[48].mxu0 %vm1030_vm1, %v3532_v42  ;;  %7416 = vmatpush3.bf16.xpose.msk.msra.mxu1 %vm8354_vm15, %v7411_v21 }
0x11d5   :  { %6935 = vmatprep.mubr.msk.f32.mxu0 %vm1030_vm1, %v3534_v58  ;;  %7419 = vmatprep.subr.msk.bf16.mxu1 %vm8354_vm15, %v7417_v37 }
0x11d6   :  { %6942 = vmatpush3.msra.mxu0 %v6070_v51  ;;  %v4267_v13 = vpop.permute.xlu1 %4266 }
0x11d7   :  { %v4265_v3 = vpop.permute.xlu0 %4264 }
0x11d8   :  { %6936 = vmatmul.mubr.msk.f32.gmra.mrb[50].mxu0 %vm1030_vm1, %v3536_v53 }
0x11d9   :  { %6938 = vmatprep.mubr.msk.f32.mxu0 %vm1030_vm1, %v3538_v52 }
0x11dc   :  { %6939 = vmatmul.mubr.msk.f32.gmra.mrb[52].mxu0 %vm1030_vm1, %v3540_v15  ;;  %7422 = vmatpush3.bf16.xpose.msk.msra.mxu1 %vm8354_vm15, %v7417_v37 }
0x11e3   :  { %7018 = vmatmul.mubr.msk.f32.vlgmr.msra.gmra.mrb[62].mxu1 %vm910_vm14, %v4259_v41 }
0x11e4   :  { %7020 = vmatprep.mubr.msk.f32.mxu1 %vm910_vm14, %v4261_v29 }
0x11e7   :  { %7021 = vmatmul.mubr.msk.f32.gmra.mrb[64].mxu1 %vm910_vm14, %v4263_v11 }
0x11e8   :  { %7023 = vmatprep.mubr.msk.f32.mxu1 %vm910_vm14, %v4265_v3 }
0x11eb   :  { %7024 = vmatmul.mubr.msk.f32.gmra.mrb[66].mxu1 %vm910_vm14, %v4267_v13 }
0x1207   :  { %v3945_v46 = vpop.xlane.xlu1 %3944 }
0x1208   :  { %v3959_v40 = vsub.f32 %v9184_v6, %v3945_v46  ;;  %v3942_v48 = vpop.xlane.xlu0 %3941 }
0x1209   :  { %v3958_v44 = vsub.f32 %v9188_v43, %v3942_v48 }
0x120a   :  { %v3966_v31 = vmul.f32 1.442695, %v3959_v40 }
0x120b   :  { %v3964_v62 = vmul.f32 1.442695, %v3958_v44  ;;  %v3954_v7 = vpop.xlane.xlu1 %3953 }
0x120c   :  { %7975 = vpow2.f32 %v3966_v31  ;;  %v3962_v63 = vsub.f32 %v9191_v23, %v3954_v7  ;;  %v3948_v17 = vpop.xlane.xlu0 %3947 }
0x120d   :  { %7977 = vpow2.f32 %v3964_v62  ;;  %v3960_v5 = vsub.f32 %v9197_v27, %v3948_v17 }
0x120e   :  { %v3972_v18 = vmul.f32 1.442695, %v3962_v63 }
0x120f   :  { %v3968_v19 = vmul.f32 1.442695, %v3960_v5  ;;  %v7773_v32 = vpop.permute.xlu1 %7772 }
0x1210   :  { %v7775_v21 = vunpack.i.h.bf16 %v7773_v32  ;;  %v7774_v20 = vunpack.i.l.bf16 %v7773_v32  ;;  %v3951_v14 = vpop.xlane.xlu0 %3950 }
0x1211   :  { %7979 = vpow2.f32 %v3968_v19  ;;  %v3961_v6 = vsub.f32 %v9205_v22, %v3951_v14 }
0x1212   :  { %v7393_v43 = vpack.c.bf16 %v7775_v21, %v7774_v20  ;;  %7981 = vpow2.f32 %v3972_v18 }
0x1213   :  { %v3970_v45 = vmul.f32 1.442695, %v3961_v6 }
0x1214   :  { %v3957_v49 = vpop.xlane.xlu0 %3956  ;;  %7394 = vmatprep.subr.bf16.mxu0 %v7393_v43 }
0x1215   :  { %7983 = vpow2.f32 %v3970_v45  ;;  %v3963_v23 = vsub.f32 %v9211_v25, %v3957_v49 }
0x1216   :  { %v9255_v51 = vpop.eup %7975 }
0x1217   :  { %v7978_v27 = vpop.eup %7977  ;;  %v3974_v34 = vmul.f32 1.442695, %v3963_v23  ;;  %v3979_v42 = vsel %vm1030_vm1, %v9255_v51, 0.0 }
0x1218   :  { %3980 = vadd.xlane.f32.xlu0 %v3979_v42  ;;  %v3976_v50 = vsel %vm1030_vm1, %v7978_v27, 0.0 }
0x1219   :  { %7985 = vpow2.f32 %v3974_v34  ;;  %3977 = vadd.xlane.f32.xlu1 %v3976_v50 }
0x121b   :  { %v9260_v22 = vpop.eup %7979 }
0x121c   :  { %v3982_v37 = vsel %vm1030_vm1, %v9260_v22, 0.0  ;;  %v9264_v58 = vpop.eup %7981 }
0x121d   :  { %3983 = vadd.xlane.f32.xlu1 %v3982_v37  ;;  %v3988_v10 = vsel %vm1030_vm1, %v9264_v58, 0.0 }
0x121f   :  { %v9266_v25 = vpop.eup %7983 }
0x1220   :  { %v3985_v53 = vsel %vm1030_vm1, %v9266_v25, 0.0 }
0x1221   :  { %3989 = vadd.xlane.f32.xlu1 %v3988_v10  ;;  %3986 = vadd.xlane.f32.xlu0 %v3985_v53 }
0x1223   :  { %v9272_v47 = vpop.eup %7985 }
0x1224   :  { %v3991_v52 = vsel %vm1030_vm1, %v9272_v47, 0.0 }
0x1225   :  { %3992 = vadd.xlane.f32.xlu0 %v3991_v52 }
0x1232   :  { %7782 = vrot.lane.b32.xlu1 %v9035_v55, %s8111_s25 }
0x1236   :  { %7787 = vrot.lane.b32.xlu1 %v9015_v4, %s8113_s30 }
0x123a   :  { %7797 = vrot.lane.b32.xlu1 %v9035_v55, %s8113_s30 }
0x123b   :  { %7777 = vrot.lane.b32.xlu0 %v9025_v35, %s8111_s25  ;;  %s8128_s25 = smov 30  }
0x123e   :  { %4717 = vrot.lane.b32.xlu1 %v9007_v30, %s8114_s1 }
0x123f   :  { %7792 = vrot.lane.b32.xlu0 %v9025_v35, %s8113_s30 }
0x1242   :  { %4721 = vrot.lane.b32.xlu1 %v9019_v59, %s8114_s1 }
0x1243   :  { %4715 = vrot.lane.b32.xlu0 %v9009_v2, %s8114_s1 }
0x1246   :  { %4725 = vrot.lane.b32.xlu1 %v9027_v9, %s8114_s1 }
0x1247   :  { %4719 = vrot.lane.b32.xlu0 %v9021_v8, %s8114_s1 }
0x124b   :  { %4723 = vrot.lane.b32.xlu0 %v9029_v24, %s8114_s1  ;;  %s5909_s1 = sld [smem:[%s9673_s0 + %s8128_s25]]  }
0x12a5   :  { %v3981_v29 = vpop.xlane.xlu0 %3980 }
0x12a6   :  { %v3978_v15 = vpop.xlane.xlu1 %3977 }
0x12a7   :  { %7987 = vrcp.f32 %v3978_v15  ;;  %v6934_v30 = vpop.f32.mrb[48].mxu0 }
0x12a8   :  { %v3643_v41 = vpop.f32.mrb[49].mxu0  ;;  %7989 = vrcp.f32 %v3981_v29 }
0x12a9   :  { %6943 = vmatprep.mubr.msk.f32.mxu0 %vm910_vm14, %v3643_v41 }
0x12aa   :  { %v3984_v59 = vpop.xlane.xlu1 %3983  ;;  %6944 = vmatmul.mubr.msk.f32.vlgmr.msra.gmra.mrb[54].mxu0 %vm910_vm14, %v6934_v30 }
0x12ab   :  { %7396 = vmatpush3.bf16.msra.mxu0 %v7393_v43  ;;  %v6937_v2 = vpop.f32.mrb[50].mxu0  ;;  %7991 = vrcp.f32 %v3984_v59 }
0x12ac   :  { %v3653_v11 = vpop.f32.mrb[51].mxu0 }
0x12ad   :  { %6946 = vmatprep.mubr.msk.f32.mxu0 %vm910_vm14, %v3653_v11 }
0x12ae   :  { %v3990_v9 = vpop.xlane.xlu1 %3989  ;;  %v3987_v8 = vpop.xlane.xlu0 %3986  ;;  %6947 = vmatmul.mubr.msk.f32.gmra.mrb[56].mxu0 %vm910_vm14, %v6937_v2 }
0x12af   :  { %v6940_v24 = vpop.f32.mrb[52].mxu0  ;;  %7993 = vrcp.f32 %v3987_v8 }
0x12b0   :  { %v3663_v3 = vpop.f32.mrb[53].mxu0  ;;  %7995 = vrcp.f32 %v3990_v9 }
0x12b1   :  { %v7988_v13 = vpop.eup %7987  ;;  %6949 = vmatprep.mubr.msk.f32.mxu0 %vm910_vm14, %v3663_v3 }
0x12b2   :  { %v7783_v46 = vpop.permute.xlu1 %7782  ;;  %v3993_v40 = vpop.xlane.xlu0 %3992  ;;  %6950 = vmatmul.mubr.msk.f32.gmra.mrb[58].mxu0 %vm910_vm14, %v6940_v24  ;;  %v3995_v48 = vmul.f32 %v7988_v13, %v7978_v27 }
0x12b3   :  { %v7785_v18 = vunpack.i.h.bf16 %v7783_v46  ;;  %v7784_v19 = vunpack.i.l.bf16 %v7783_v46  ;;  %7997 = vrcp.f32 %v3993_v40  ;;  %v7990_v15 = vpop.eup %7989 }
0x12b4   :  { %6985 = vmatprep.mubr.msk.f32.mxu0 %vm1030_vm1, %v3995_v48  ;;  %v3997_v24 = vmul.f32 %v7990_v15, %v9255_v51 }
0x12b5   :  { %v7401_v34 = vpack.c.bf16 %v7785_v18, %v7784_v19  ;;  %v7992_v29 = vpop.eup %7991 }
0x12b6   :  { %v7788_v44 = vpop.permute.xlu1 %7787  ;;  %v7778_v31 = vpop.permute.xlu0 %7777 }
0x12b7   :  { %v7790_v62 = vunpack.i.h.bf16 %v7788_v44  ;;  %v7789_v7 = vunpack.i.l.bf16 %v7788_v44  ;;  %v7780_v63 = vunpack.i.h.bf16 %v7778_v31  ;;  %v7779_v17 = vunpack.i.l.bf16 %v7778_v31  ;;  %v7019_v5 = vpop.f32.mrb[62].mxu1 }
0x12b8   :  { %v9306_v32 = vadd.f32 %v9098_v38, %v7019_v5  ;;  %v4370_v21 = vpop.f32.mrb[63].mxu1  ;;  %v3999_v31 = vmul.f32 %v7992_v29, %v9260_v22 }
0x12b9   :  { %v7435_v20 = vpack.c.bf16 %v7790_v62, %v7789_v7  ;;  %v7397_v14 = vpack.c.bf16 %v7780_v63, %v7779_v17  ;;  %v9309_v6 = vadd.f32 %v9102_v36, %v4370_v21  ;;  %v7994_v3 = vpop.eup %7993 }
0x12ba   :  { %v7793_v43 = vpop.permute.xlu0 %7792  ;;  %v4402_v45 = vsel %vm1030_vm1, %v9306_v32, -inf  ;;  %v7022_v27 = vpop.f32.mrb[64].mxu1  ;;  %v4001_v51 = vmul.f32 %v7994_v3, %v9266_v25 }
0x12bb   :  { %v7795_v49 = vunpack.i.h.bf16 %v7793_v43  ;;  %v7794_v23 = vunpack.i.l.bf16 %v7793_v43  ;;  %7437 = vmatprep.subr.msk.bf16.mxu1 %vm8354_vm15, %v7435_v20  ;;  %4403 = vmax.xlane.f32.xlu1 %v4402_v45  ;;  %v4380_v42 = vpop.f32.mrb[65].mxu1  ;;  %v4399_v50 = vsel %vm1030_vm1, %v9309_v6, -inf  ;;  %v7798_v37 = vpop.permute.xlu1 %7797  ;;  %v4386_v11 = vadd.f32 %v9112_v26, %v7022_v27 }
0x12bc   :  { %7398 = vmatprep.subr.bf16.mxu0 %v7397_v14  ;;  %7440 = vmatpush3.bf16.xpose.msk.msra.mxu1 %vm8354_vm15, %v7435_v20  ;;  %v9320_v53 = vadd.f32 %v9108_v60, %v4380_v42  ;;  %v7800_v59 = vunpack.i.h.bf16 %v7798_v37  ;;  %v7799_v2 = vunpack.i.l.bf16 %v7798_v37  ;;  %v7996_v46 = vpop.eup %7995 }
0x12bd   :  { %v7441_v10 = vpack.c.bf16 %v7795_v49, %v7794_v23  ;;  %4400 = vmax.xlane.f32.xlu0 %v4399_v50  ;;  %7400 = vmatpush3.bf16.msra.mxu0 %v7397_v14  ;;  %v4408_v44 = vsel %vm1030_vm1, %v4386_v11, -inf  ;;  %v7998_v62 = vpop.eup %7997  ;;  %v4003_v7 = vmul.f32 %v7996_v46, %v9264_v58 }
0x12be   :  { %7402 = vmatprep.subr.bf16.mxu0 %v7401_v34  ;;  %v4716_v52 = vpop.permute.xlu0 %4715  ;;  %v7025_v30 = vpop.f32.mrb[66].mxu1  ;;  %v4405_v41 = vsel %vm1030_vm1, %v9320_v53, -inf  ;;  %v7447_v40 = vpack.c.bf16 %v7800_v59, %v7799_v2  ;;  %v4005_v22 = vmul.f32 %v7998_v62, %v9272_v47  ;;  %v6071_v47 = vld [vmem:[%s8536_s29 + $0x28] sm:$0xff] }
0x12bf   :  { %7443 = vmatprep.subr.msk.bf16.mxu1 %vm8354_vm15, %v7441_v10  ;;  %7070 = vmatprep.mubr.msk.f32.mxu1 %vm910_vm14, %v4716_v52  ;;  %v4390_v9 = vpop.f32.mrb[67].mxu1  ;;  %v4396_v48 = vadd.f32 %v9121_v16, %v7025_v30  ;;  %v4718_v17 = vpop.permute.xlu1 %4717 }
0x12c0   :  { %v4391_v8 = vadd.f32 %v9117_v39, %v4390_v9 }
0x12c1   :  { %4406 = vmax.xlane.f32.xlu0 %v4405_v41  ;;  %7404 = vmatpush3.bf16.msra.mxu0 %v7401_v34  ;;  %v4414_v63 = vsel %vm1030_vm1, %v4396_v48, -inf }
0x12c2   :  { %v4411_v13 = vsel %vm1030_vm1, %v4391_v8, -inf  ;;  %v4720_v25 = vpop.permute.xlu0 %4719  ;;  %6994 = vmatprep.subr.mxu0 %v6071_v47 }
0x12c3   :  { %4412 = vmax.xlane.f32.xlu1 %v4411_v13  ;;  %v4722_v58 = vpop.permute.xlu1 %4721 }
0x12c4   :  { %6986 = vmatmul.mubr.msk.f32.vlgmr.msra.gmra.mrb[60].mxu0 %vm1030_vm1, %v3997_v24  ;;  %7446 = vmatpush3.bf16.xpose.msk.msra.mxu1 %vm8354_vm15, %v7441_v10 }
0x12c5   :  { %4409 = vmax.xlane.f32.xlu0 %v4408_v44  ;;  %6988 = vmatprep.mubr.msk.f32.mxu0 %vm1030_vm1, %v3999_v31 }
0x12c6   :  { %7449 = vmatprep.subr.msk.bf16.mxu1 %vm8354_vm15, %v7447_v40  ;;  %v4724_v5 = vpop.permute.xlu0 %4723  ;;  %6995 = vmatpush3.msra.mxu0 %v6071_v47 }
0x12c7   :  { %v4726_v18 = vpop.permute.xlu1 %4725 }
0x12c8   :  { %6989 = vmatmul.mubr.msk.f32.gmra.mrb[62].mxu0 %vm1030_vm1, %v4001_v51 }
0x12c9   :  { %4415 = vmax.xlane.f32.xlu0 %v4414_v63  ;;  %6991 = vmatprep.mubr.msk.f32.mxu0 %vm1030_vm1, %v4003_v7 }
0x12cc   :  { %6992 = vmatmul.mubr.msk.f32.gmra.mrb[64].mxu0 %vm1030_vm1, %v4005_v22  ;;  %7452 = vmatpush3.bf16.xpose.msk.msra.mxu1 %vm8354_vm15, %v7447_v40 }
0x12d3   :  { %7071 = vmatmul.mubr.msk.f32.vlgmr.msra.gmra.mrb[68].mxu1 %vm910_vm14, %v4718_v17 }
0x12d4   :  { %7073 = vmatprep.mubr.msk.f32.mxu1 %vm910_vm14, %v4720_v25  ;;  %7802 = vrot.lane.b32.xlu1 %v9015_v4, %s8115_s2 }
0x12d7   :  { %7074 = vmatmul.mubr.msk.f32.gmra.mrb[70].mxu1 %vm910_vm14, %v4722_v58 }
0x12d8   :  { %7076 = vmatprep.mubr.msk.f32.mxu1 %vm910_vm14, %v4724_v5 }
0x12db   :  { %7077 = vmatmul.mubr.msk.f32.gmra.mrb[72].mxu1 %vm910_vm14, %v4726_v18 }
0x1348   :  { %v4404_v57 = vpop.xlane.xlu1 %4403 }
0x1349   :  { %v4418_v19 = vsub.f32 %v9306_v32, %v4404_v57 }
0x134a   :  { %v4401_v21 = vpop.xlane.xlu0 %4400 }
0x134b   :  { %v4425_v20 = vmul.f32 1.442695, %v4418_v19  ;;  %v4417_v14 = vsub.f32 %v9309_v6, %v4401_v21 }
0x134d   :  { %7999 = vpow2.f32 %v4425_v20  ;;  %v4423_v43 = vmul.f32 1.442695, %v4417_v14 }
0x134e   :  { %v4407_v45 = vpop.xlane.xlu0 %4406 }
0x134f   :  { %8001 = vpow2.f32 %v4423_v43  ;;  %v4419_v49 = vsub.f32 %v9320_v53, %v4407_v45 }
0x1350   :  { %v4413_v27 = vpop.xlane.xlu1 %4412 }
0x1351   :  { %v4427_v23 = vmul.f32 1.442695, %v4419_v49  ;;  %v4421_v42 = vsub.f32 %v4391_v8, %v4413_v27 }
0x1352   :  { %v4410_v34 = vpop.xlane.xlu0 %4409 }
0x1353   :  { %8003 = vpow2.f32 %v4427_v23  ;;  %v4420_v50 = vsub.f32 %v4386_v11, %v4410_v34  ;;  %v4431_v37 = vmul.f32 1.442695, %v4421_v42 }
0x1354   :  { %v7803_v52 = vpop.permute.xlu1 %7802 }
0x1355   :  { %v4429_v10 = vmul.f32 1.442695, %v4420_v50  ;;  %8005 = vpow2.f32 %v4431_v37  ;;  %v7805_v6 = vunpack.i.h.bf16 %v7803_v52  ;;  %v7804_v30 = vunpack.i.l.bf16 %v7803_v52 }
0x1356   :  { %v4416_v32 = vpop.xlane.xlu0 %4415 }
0x1357   :  { %v9360_v15 = vpop.eup %7999  ;;  %v4422_v41 = vsub.f32 %v4396_v48, %v4416_v32  ;;  %8007 = vpow2.f32 %v4429_v10  ;;  %v7423_v59 = vpack.c.bf16 %v7805_v6, %v7804_v30 }
0x1358   :  { %v4438_v53 = vsel %vm1030_vm1, %v9360_v15, 0.0 }
0x1359   :  { %v9364_v29 = vpop.eup %8001  ;;  %v4433_v2 = vmul.f32 1.442695, %v4422_v41  ;;  %4439 = vadd.xlane.f32.xlu0 %v4438_v53  ;;  %7424 = vmatprep.subr.bf16.mxu0 %v7423_v59 }
0x135a   :  { %v4435_v11 = vsel %vm1030_vm1, %v9364_v29, 0.0 }
0x135b   :  { %8009 = vpow2.f32 %v4433_v2  ;;  %4436 = vadd.xlane.f32.xlu1 %v4435_v11 }
0x135d   :  { %v9368_v9 = vpop.eup %8003 }
0x135e   :  { %v4441_v8 = vsel %vm1030_vm1, %v9368_v9, 0.0 }
0x135f   :  { %4442 = vadd.xlane.f32.xlu1 %v4441_v8  ;;  %v9372_v24 = vpop.eup %8005 }
0x1360   :  { %v4447_v13 = vsel %vm1030_vm1, %v9372_v24, 0.0 }
0x1361   :  { %v9374_v3 = vpop.eup %8007 }
0x1362   :  { %v4444_v46 = vsel %vm1030_vm1, %v9374_v3, 0.0 }
0x1363   :  { %4448 = vadd.xlane.f32.xlu1 %v4447_v13  ;;  %4445 = vadd.xlane.f32.xlu0 %v4444_v46 }
0x1365   :  { %v9380_v40 = vpop.eup %8009 }
0x1366   :  { %v4450_v48 = vsel %vm1030_vm1, %v9380_v40, 0.0 }
0x1367   :  { %4451 = vadd.xlane.f32.xlu0 %v4450_v48 }
0x1374   :  { %7812 = vrot.lane.b32.xlu1 %v9035_v55, %s8115_s2 }
0x137d   :  { %7807 = vrot.lane.b32.xlu0 %v9025_v35, %s8115_s2  ;;  %s8129_s2 = smov 33  }
0x1397   :  { %v6987_v44 = vpop.f32.mrb[60].mxu0 }
0x1398   :  { %v4108_v31 = vpop.f32.mrb[61].mxu0 }
0x1399   :  { %6996 = vmatprep.mubr.msk.f32.mxu0 %vm910_vm14, %v4108_v31 }
0x139a   :  { %6997 = vmatmul.mubr.msk.f32.vlgmr.msra.gmra.mrb[54].mxu0 %vm910_vm14, %v6987_v44 }
0x139b   :  { %7426 = vmatpush3.bf16.msra.mxu0 %v7423_v59  ;;  %v6990_v51 = vpop.f32.mrb[62].mxu0 }
0x139c   :  { %v4118_v62 = vpop.f32.mrb[63].mxu0 }
0x139d   :  { %6999 = vmatprep.mubr.msk.f32.mxu0 %vm910_vm14, %v4118_v62 }
0x139e   :  { %7000 = vmatmul.mubr.msk.f32.gmra.mrb[56].mxu0 %vm910_vm14, %v6990_v51 }
0x139f   :  { %v6993_v7 = vpop.f32.mrb[64].mxu0 }
0x13a0   :  { %v4128_v63 = vpop.f32.mrb[65].mxu0 }
0x13a1   :  { %7002 = vmatprep.mubr.msk.f32.mxu0 %vm910_vm14, %v4128_v63 }
0x13a2   :  { %7003 = vmatmul.mubr.msk.f32.gmra.mrb[58].mxu0 %vm910_vm14, %v6993_v7 }
0x13a6   :  { %v7072_v22 = vpop.f32.mrb[68].mxu1 }
0x13a7   :  { %v9395_v17 = vadd.f32 %v9098_v38, %v7072_v22  ;;  %v4829_v25 = vpop.f32.mrb[69].mxu1 }
0x13a8   :  { %v9398_v58 = vadd.f32 %v9102_v36, %v4829_v25 }
0x13a9   :  { %v4861_v5 = vsel %vm1030_vm1, %v9395_v17, -inf }
0x13aa   :  { %v7075_v47 = vpop.f32.mrb[70].mxu1  ;;  %4862 = vmax.xlane.f32.xlu0 %v4861_v5  ;;  %v4858_v18 = vsel %vm1030_vm1, %v9398_v58, -inf }
0x13ab   :  { %v9405_v57 = vadd.f32 %v9112_v26, %v7075_v47  ;;  %v4839_v19 = vpop.f32.mrb[71].mxu1  ;;  %4859 = vmax.xlane.f32.xlu1 %v4858_v18 }
0x13ac   :  { %v9408_v38 = vadd.f32 %v9108_v60, %v4839_v19 }
0x13ad   :  { %v4867_v36 = vsel %vm1030_vm1, %v9405_v57, -inf }
0x13ae   :  { %v7078_v21 = vpop.f32.mrb[72].mxu1  ;;  %v4864_v20 = vsel %vm1030_vm1, %v9408_v38, -inf }
0x13af   :  { %v9415_v14 = vadd.f32 %v9121_v16, %v7078_v21  ;;  %v4849_v43 = vpop.f32.mrb[73].mxu1  ;;  %4868 = vmax.xlane.f32.xlu1 %v4867_v36  ;;  %4865 = vmax.xlane.f32.xlu0 %v4864_v20 }
0x13b0   :  { %v9418_v26 = vadd.f32 %v9117_v39, %v4849_v43 }
0x13b1   :  { %v4873_v60 = vsel %vm1030_vm1, %v9415_v14, -inf }
0x13b2   :  { %v4870_v45 = vsel %vm1030_vm1, %v9418_v26, -inf }
0x13b3   :  { %4874 = vmax.xlane.f32.xlu1 %v4873_v60  ;;  %4871 = vmax.xlane.f32.xlu0 %v4870_v45 }
0x13e6   :  { %v4440_v27 = vpop.xlane.xlu0 %4439 }
0x13e8   :  { %v4437_v49 = vpop.xlane.xlu1 %4436 }
0x13e9   :  { %8011 = vrcp.f32 %v4437_v49 }
0x13ea   :  { %8013 = vrcp.f32 %v4440_v27 }
0x13ec   :  { %v4443_v23 = vpop.xlane.xlu1 %4442 }
0x13ed   :  { %8015 = vrcp.f32 %v4443_v23 }
0x13f0   :  { %v4449_v16 = vpop.xlane.xlu1 %4448  ;;  %v4446_v34 = vpop.xlane.xlu0 %4445 }
0x13f1   :  { %8017 = vrcp.f32 %v4446_v34 }
0x13f2   :  { %8019 = vrcp.f32 %v4449_v16  ;;  %v6072_v16 = vld [vmem:[%s8536_s29 + $0x30] sm:$0xff] }
0x13f3   :  { %v8012_v42 = vpop.eup %8011 }
0x13f4   :  { %v4454_v50 = vmul.f32 %v8012_v42, %v9364_v29  ;;  %v4452_v37 = vpop.xlane.xlu0 %4451  ;;  %v7813_v39 = vpop.permute.xlu1 %7812 }
0x13f5   :  { %v7815_v52 = vunpack.i.h.bf16 %v7813_v39  ;;  %v7814_v32 = vunpack.i.l.bf16 %v7813_v39  ;;  %8021 = vrcp.f32 %v4452_v37  ;;  %v8014_v29 = vpop.eup %8013 }
0x13f6   :  { %7038 = vmatprep.mubr.msk.f32.mxu0 %vm1030_vm1, %v4454_v50  ;;  %v4456_v2 = vmul.f32 %v8014_v29, %v9360_v15 }
0x13f7   :  { %v7431_v53 = vpack.c.bf16 %v7815_v52, %v7814_v32  ;;  %v8016_v59 = vpop.eup %8015 }
0x13f8   :  { %v7808_v10 = vpop.permute.xlu0 %7807  ;;  %v4458_v8 = vmul.f32 %v8016_v59, %v9368_v9 }
0x13f9   :  { %v7810_v6 = vunpack.i.h.bf16 %v7808_v10  ;;  %v7809_v30 = vunpack.i.l.bf16 %v7808_v10 }
0x13fb   :  { %v7427_v41 = vpack.c.bf16 %v7810_v6, %v7809_v30  ;;  %v8018_v11 = vpop.eup %8017 }
0x13fc   :  { %v8020_v13 = vpop.eup %8019  ;;  %v4460_v46 = vmul.f32 %v8018_v11, %v9374_v3 }
0x13fd   :  { %7428 = vmatprep.subr.bf16.mxu0 %v7427_v41  ;;  %v4462_v44 = vmul.f32 %v8020_v13, %v9372_v24 }
0x13fe   :  { %7430 = vmatpush3.bf16.msra.mxu0 %v7427_v41 }
0x13ff   :  { %7432 = vmatprep.subr.bf16.mxu0 %v7431_v53  ;;  %v8022_v48 = vpop.eup %8021 }
0x1400   :  { %v4464_v31 = vmul.f32 %v8022_v48, %v9380_v40 }
0x1402   :  { %7434 = vmatpush3.bf16.msra.mxu0 %v7431_v53 }
0x1403   :  { %7047 = vmatprep.subr.mxu0 %v6072_v16 }
0x1405   :  { %7039 = vmatmul.mubr.msk.f32.vlgmr.msra.gmra.mrb[66].mxu0 %vm1030_vm1, %v4456_v2 }
0x1406   :  { %7041 = vmatprep.mubr.msk.f32.mxu0 %vm1030_vm1, %v4458_v8  ;;  %7048 = vmatpush3.msra.mxu0 %v6072_v16 }
0x1409   :  { %7042 = vmatmul.mubr.msk.f32.gmra.mrb[68].mxu0 %vm1030_vm1, %v4460_v46 }
0x140a   :  { %7044 = vmatprep.mubr.msk.f32.mxu0 %vm1030_vm1, %v4462_v44 }
0x140d   :  { %7045 = vmatmul.mubr.msk.f32.gmra.mrb[70].mxu0 %vm1030_vm1, %v4464_v31 }
0x1437   :  { %v4863_v15 = vpop.xlane.xlu0 %4862 }
0x1438   :  { %v4877_v9 = vsub.f32 %v9395_v17, %v4863_v15  ;;  %v4860_v51 = vpop.xlane.xlu1 %4859 }
0x1439   :  { %v4876_v62 = vsub.f32 %v9398_v58, %v4860_v51  ;;  %v6073_v51 = vld [vmem:[%s8536_s29 + $0x38] sm:$0xff] }
0x143a   :  { %v4884_v7 = vmul.f32 1.442695, %v4877_v9 }
0x143b   :  { %v4882_v63 = vmul.f32 1.442695, %v4876_v62 }
0x143c   :  { %8023 = vpow2.f32 %v4884_v7  ;;  %v4869_v3 = vpop.xlane.xlu1 %4868  ;;  %v4866_v22 = vpop.xlane.xlu0 %4865 }
0x143d   :  { %8025 = vpow2.f32 %v4882_v63  ;;  %v4879_v24 = vsub.f32 %v9405_v57, %v4869_v3  ;;  %v4878_v25 = vsub.f32 %v9408_v38, %v4866_v22 }
0x143f   :  { %v4888_v5 = vmul.f32 1.442695, %v4879_v24  ;;  %v4886_v40 = vmul.f32 1.442695, %v4878_v25 }
0x1440   :  { %v4875_v47 = vpop.xlane.xlu1 %4874  ;;  %v4872_v18 = vpop.xlane.xlu0 %4871 }
0x1441   :  { %8027 = vpow2.f32 %v4888_v5  ;;  %v4881_v17 = vsub.f32 %v9415_v14, %v4875_v47  ;;  %v4880_v19 = vsub.f32 %v9418_v26, %v4872_v18 }
0x1442   :  { %8029 = vpow2.f32 %v4886_v40 }
0x1443   :  { %v4892_v58 = vmul.f32 1.442695, %v4881_v17  ;;  %v4890_v36 = vmul.f32 1.442695, %v4880_v19 }
0x1445   :  { %8031 = vpow2.f32 %v4892_v58 }
0x1446   :  { %v9442_v21 = vpop.eup %8023  ;;  %8033 = vpow2.f32 %v4890_v36 }
0x1447   :  { %v8026_v20 = vpop.eup %8025  ;;  %v4897_v57 = vsel %vm1030_vm1, %v9442_v21, 0.0 }
0x1448   :  { %4898 = vadd.xlane.f32.xlu1 %v4897_v57  ;;  %v4894_v38 = vsel %vm1030_vm1, %v8026_v20, 0.0 }
0x1449   :  { %4895 = vadd.xlane.f32.xlu0 %v4894_v38 }
0x144b   :  { %v9447_v43 = vpop.eup %8027 }
0x144c   :  { %v9449_v14 = vpop.eup %8029  ;;  %v4903_v26 = vsel %vm1030_vm1, %v9447_v43, 0.0 }
0x144d   :  { %4904 = vadd.xlane.f32.xlu1 %v4903_v26  ;;  %v4900_v60 = vsel %vm1030_vm1, %v9449_v14, 0.0 }
0x144e   :  { %4901 = vadd.xlane.f32.xlu0 %v4900_v60 }
0x144f   :  { %v9455_v45 = vpop.eup %8031 }
0x1450   :  { %v9457_v49 = vpop.eup %8033  ;;  %v4909_v23 = vsel %vm1030_vm1, %v9455_v45, 0.0 }
0x1451   :  { %4910 = vadd.xlane.f32.xlu1 %v4909_v23  ;;  %v4906_v27 = vsel %vm1030_vm1, %v9457_v49, 0.0 }
0x1452   :  { %4907 = vadd.xlane.f32.xlu0 %v4906_v27 }
0x1462   :  { %7822 = vrot.lane.b32.xlu1 %v9025_v35, %s8116_s3 }
0x1466   :  { %7827 = vrot.lane.b32.xlu1 %v9035_v55, %s8116_s3 }
0x1468   :  { %7817 = vrot.lane.b32.xlu0 %v9015_v4, %s8116_s3 }
0x14d5   :  { %v4899_v34 = vpop.xlane.xlu1 %4898 }
0x14d6   :  { %v4896_v42 = vpop.xlane.xlu0 %4895 }
0x14d7   :  { %8035 = vrcp.f32 %v4896_v42 }
0x14d8   :  { %v7040_v50 = vpop.f32.mrb[66].mxu0  ;;  %8037 = vrcp.f32 %v4899_v34 }
0x14d9   :  { %v4567_v37 = vpop.f32.mrb[67].mxu0 }
0x14da   :  { %v4905_v39 = vpop.xlane.xlu1 %4904  ;;  %7049 = vmatprep.mubr.msk.f32.mxu0 %vm910_vm14, %v4567_v37 }
0x14db   :  { %v4902_v10 = vpop.xlane.xlu0 %4901  ;;  %7050 = vmatmul.mubr.msk.f32.vlgmr.msra.gmra.mrb[54].mxu0 %vm910_vm14, %v7040_v50 }
0x14dc   :  { %v7043_v52 = vpop.f32.mrb[68].mxu0  ;;  %8039 = vrcp.f32 %v4902_v10 }
0x14dd   :  { %v4577_v32 = vpop.f32.mrb[69].mxu0  ;;  %8041 = vrcp.f32 %v4905_v39 }
0x14de   :  { %v4911_v35 = vpop.xlane.xlu1 %4910  ;;  %7052 = vmatprep.mubr.msk.f32.mxu0 %vm910_vm14, %v4577_v32 }
0x14df   :  { %v4908_v55 = vpop.xlane.xlu0 %4907  ;;  %7053 = vmatmul.mubr.msk.f32.gmra.mrb[56].mxu0 %vm910_vm14, %v7043_v52 }
0x14e0   :  { %v7046_v6 = vpop.f32.mrb[70].mxu0  ;;  %8043 = vrcp.f32 %v4908_v55 }
0x14e1   :  { %v8036_v4 = vpop.eup %8035  ;;  %v4587_v30 = vpop.f32.mrb[71].mxu0  ;;  %8045 = vrcp.f32 %v4911_v35 }
0x14e2   :  { %v7823_v41 = vpop.permute.xlu1 %7822  ;;  %v4913_v53 = vmul.f32 %v8036_v4, %v8026_v20  ;;  %7055 = vmatprep.mubr.msk.f32.mxu0 %vm910_vm14, %v4587_v30  ;;  %v8038_v9 = vpop.eup %8037 }
0x14e3   :  { %v7818_v29 = vpop.permute.xlu0 %7817  ;;  %v7825_v59 = vunpack.i.h.bf16 %v7823_v41  ;;  %v7824_v2 = vunpack.i.l.bf16 %v7823_v41  ;;  %7056 = vmatmul.mubr.msk.f32.gmra.mrb[58].mxu0 %vm910_vm14, %v7046_v6  ;;  %v4915_v7 = vmul.f32 %v8038_v9, %v9442_v21  ;;  %v6099_v21 = vld [vmem:[%s8807_s7 + $0x1] ss:$0 sm:$0xff] }
0x14e4   :  { %v7820_v11 = vunpack.i.h.bf16 %v7818_v29  ;;  %v7819_v8 = vunpack.i.l.bf16 %v7818_v29  ;;  %7091 = vmatprep.mubr.msk.f32.mxu0 %vm1030_vm1, %v4913_v53 }
0x14e5   :  { %v7457_v48 = vpack.c.bf16 %v7825_v59, %v7824_v2 }
0x14e6   :  { %v7453_v13 = vpack.c.bf16 %v7820_v11, %v7819_v8  ;;  %v7828_v46 = vpop.permute.xlu1 %7827  ;;  %v8040_v62 = vpop.eup %8039 }
0x14e7   :  { %v7830_v44 = vunpack.i.h.bf16 %v7828_v46  ;;  %v7829_v31 = vunpack.i.l.bf16 %v7828_v46  ;;  %v8042_v63 = vpop.eup %8041  ;;  %v4917_v3 = vmul.f32 %v8040_v62, %v9449_v14 }
0x14e8   :  { %7454 = vmatprep.subr.bf16.mxu0 %v7453_v13  ;;  %v4919_v24 = vmul.f32 %v8042_v63, %v9447_v43 }
0x14e9   :  { %7456 = vmatpush3.bf16.msra.mxu0 %v7453_v13  ;;  %v7461_v15 = vpack.c.bf16 %v7830_v44, %v7829_v31 }
0x14ea   :  { %7458 = vmatprep.subr.bf16.mxu0 %v7457_v48  ;;  %v8044_v22 = vpop.eup %8043 }
0x14eb   :  { %v8046_v25 = vpop.eup %8045  ;;  %v4921_v5 = vmul.f32 %v8044_v22, %v9457_v49 }
0x14ec   :  { %v4923_v40 = vmul.f32 %v8046_v25, %v9455_v45 }
0x14ed   :  { %7460 = vmatpush3.bf16.msra.mxu0 %v7457_v48 }
0x14ee   :  { %7462 = vmatprep.subr.bf16.mxu0 %v7461_v15 }
0x14f1   :  { %7464 = vmatpush3.bf16.msra.mxu0 %v7461_v15 }
0x14f2   :  { %7100 = vmatprep.subr.mxu0 %v6073_v51 }
0x14f4   :  { %7092 = vmatmul.mubr.msk.f32.vlgmr.msra.gmra.mrb[72].mxu0 %vm1030_vm1, %v4915_v7 }
0x14f5   :  { %7094 = vmatprep.mubr.msk.f32.mxu0 %vm1030_vm1, %v4917_v3  ;;  %7101 = vmatpush3.msra.mxu0 %v6073_v51 }
0x14f8   :  { %7095 = vmatmul.mubr.msk.f32.gmra.mrb[74].mxu0 %vm1030_vm1, %v4919_v24 }
0x14f9   :  { %7097 = vmatprep.mubr.msk.f32.mxu0 %vm1030_vm1, %v4921_v5 }
0x14fc   :  { %7098 = vmatmul.mubr.msk.f32.gmra.mrb[76].mxu0 %vm1030_vm1, %v4923_v40  ;;  %v6176_v40 = vld [vmem:[%s8855_s11 + $0x20] sm:$0xff] }
0x15c7   :  { %v7093_v47 = vpop.f32.mrb[72].mxu0 }
0x15c8   :  { %v5026_v18 = vpop.f32.mrb[73].mxu0 }
0x15c9   :  { %7102 = vmatprep.mubr.msk.f32.mxu0 %vm910_vm14, %v5026_v18 }
0x15ca   :  { %7103 = vmatmul.mubr.msk.f32.vlgmr.msra.gmra.mrb[54].mxu0 %vm910_vm14, %v7093_v47  ;;  %v6177_v47 = vld [vmem:[%s8855_s11 + $0x28] sm:$0xff] }
0x15cb   :  { %v7096_v17 = vpop.f32.mrb[74].mxu0  ;;  %v7465_v18 = vpack.c.bf16 %v6177_v47, %v6176_v40 }
0x15cc   :  { %v5036_v19 = vpop.f32.mrb[75].mxu0 }
0x15cd   :  { %7105 = vmatprep.mubr.msk.f32.mxu0 %vm910_vm14, %v5036_v19  ;;  %7466 = vmatprep.subr.bf16.mxu1 %v7465_v18  ;;  %v6179_v19 = vld [vmem:[%s8855_s11 + $0x38] sm:$0xff] }
0x15ce   :  { %7106 = vmatmul.mubr.msk.f32.gmra.mrb[56].mxu0 %vm910_vm14, %v7096_v17  ;;  %7468 = vmatpush3.bf16.msra.mxu1 %v7465_v18  ;;  %v6178_v17 = vld [vmem:[%s8855_s11 + $0x30] sm:$0xff]  ;;  %s5912_s11 = sld [smem:[%s9673_s0 + %s8129_s2]]  }
0x15cf   :  { %v7099_v58 = vpop.f32.mrb[76].mxu0 }
0x15d0   :  { %v5046_v36 = vpop.f32.mrb[77].mxu0 }
0x15d1   :  { %7108 = vmatprep.mubr.msk.f32.mxu0 %vm910_vm14, %v5046_v36  ;;  %v6188_v36 = vld [vmem:[%s8864_s19 + $0x20] sm:$0xff] }
0x15d2   :  { %7109 = vmatmul.mubr.msk.f32.gmra.mrb[58].mxu0 %vm910_vm14, %v7099_v58  ;;  %v7469_v58 = vpack.c.bf16 %v6179_v19, %v6178_v17 }
0x15d4   :  { %7470 = vmatprep.subr.bf16.mxu1 %v7469_v58 }
0x15d5   :  { %7472 = vmatpush3.bf16.msra.mxu1 %v7469_v58 }
0x15d6   :  { %7481 = vmatprep.subr.bf16.mxu1 %v8087_v1 }
0x169d   :  { %v7104_v20 = vpop.f32.mrb[54].mxu0 }
0x169e   :  { %v7499_v57 = vadd.f32 %v7104_v20, %v6099_v21  ;;  %v5139_v38 = vpop.f32.mrb[55].mxu0 }
0x169f   :  { %v7500_v43 = vadd.f32 %v6099_v21, %v5139_v38 }
0x16a0   :  { %v5175_v14 = vadd.f32 %v7499_v57, %v8980_v33 }
0x16a1   :  { %v5174_v26 = vadd.f32 %v7500_v43, %v8978_v61  ;;  %v7107_v60 = vpop.f32.mrb[56].mxu0 }
0x16a2   :  { %v5149_v45 = vpop.f32.mrb[57].mxu0  ;;  %v5187_v49 = vsel %vm267_vm9, %v5175_v14, 0.0  ;;  %v7501_v23 = vadd.f32 %v7107_v60, %v6099_v21 }
0x16a3   :  { %v7502_v27 = vadd.f32 %v6099_v21, %v5149_v45  ;;  %5188 = vadd.xlane.f32.xlu1 %v5187_v49  ;;  %v5184_v16 = vsel %vm267_vm9, %v5174_v26, 0.0 }
0x16a4   :  { %5185 = vadd.xlane.f32.xlu0 %v5184_v16  ;;  %v5177_v37 = vadd.f32 %v7501_v23, %v8992_v56 }
0x16a5   :  { %v5176_v34 = vadd.f32 %v7502_v27, %v8989_v12  ;;  %v7110_v42 = vpop.f32.mrb[58].mxu0 }
0x16a6   :  { %v5159_v50 = vpop.f32.mrb[59].mxu0  ;;  %v7503_v39 = vadd.f32 %v7110_v42, %v6099_v21  ;;  %v5193_v32 = vsel %vm267_vm9, %v5177_v37, 0.0 }
0x16a7   :  { %v7504_v33 = vadd.f32 %v6099_v21, %v5159_v50  ;;  %v5190_v61 = vsel %vm267_vm9, %v5176_v34, 0.0  ;;  %v6189_v21 = vld [vmem:[%s8864_s19 + $0x28] sm:$0xff] }
0x16a8   :  { %5191 = vadd.xlane.f32.xlu0 %v5190_v61  ;;  %v5179_v52 = vadd.f32 %v7503_v39, %v9000_v28  ;;  %v7473_v20 = vpack.c.bf16 %v6189_v21, %v6188_v36 }
0x16a9   :  { %v5178_v10 = vadd.f32 %v7504_v33, %v8998_v54 }
0x16aa   :  { %v5199_v12 = vsel %vm267_vm9, %v5179_v52, 0.0  ;;  %7474 = vmatprep.subr.bf16.mxu0 %v7473_v20 }
0x16ab   :  { %v5196_v35 = vsel %vm267_vm9, %v5178_v10, 0.0  ;;  %7476 = vmatpush3.bf16.msra.mxu0 %v7473_v20 }
0x16ac   :  { %5194 = vadd.xlane.f32.xlu0 %v5193_v32  ;;  %5197 = vadd.xlane.f32.xlu1 %v5196_v35 }
0x16b0   :  { %5200 = vadd.xlane.f32.xlu0 %v5199_v12 }
0x1730   :  { %v5189_v55 = vpop.xlane.xlu1 %5188 }
0x1731   :  { %v5203_v56 = vmul.f32 0.03125, %v5189_v55  ;;  %v5186_v4 = vpop.xlane.xlu0 %5185  ;;  %v6175_v55 = vld [vmem:[%s8876_s9 + $0x1] ss:$0 sm:$0xff] }
0x1732   :  { %v5202_v6 = vmul.f32 0.03125, %v5186_v4 }
0x1733   :  { %v9507_v30 = vsub.f32 %v5175_v14, %v5203_v56 }
0x1734   :  { %v9509_v41 = vsub.f32 %v5174_v26, %v5202_v6 }
0x1735   :  { %v5192_v54 = vpop.xlane.xlu0 %5191  ;;  %v5215_v28 = vmul.f32 %v9507_v30, %v9507_v30 }
0x1736   :  { %v5204_v53 = vmul.f32 0.03125, %v5192_v54  ;;  %v5214_v29 = vmul.f32 %v9509_v41, %v9509_v41 }
0x1737   :  { %v5223_v59 = vsel %vm267_vm9, %v5215_v28, 0.0 }
0x1738   :  { %v9516_v2 = vsub.f32 %v5176_v34, %v5204_v53  ;;  %5224 = vadd.xlane.f32.xlu0 %v5223_v59  ;;  %v5220_v11 = vsel %vm267_vm9, %v5214_v29, 0.0 }
0x1739   :  { %v5195_v8 = vpop.xlane.xlu0 %5194  ;;  %5221 = vadd.xlane.f32.xlu1 %v5220_v11  ;;  %v5198_v13 = vpop.xlane.xlu1 %5197 }
0x173a   :  { %v5205_v46 = vmul.f32 0.03125, %v5195_v8  ;;  %v5206_v48 = vmul.f32 0.03125, %v5198_v13  ;;  %v5216_v44 = vmul.f32 %v9516_v2, %v9516_v2 }
0x173c   :  { %v9521_v31 = vsub.f32 %v5177_v37, %v5205_v46  ;;  %v9523_v15 = vsub.f32 %v5178_v10, %v5206_v48  ;;  %v5226_v9 = vsel %vm267_vm9, %v5216_v44, 0.0  ;;  %v6174_v10 = vld [vmem:[%s8871_s4 + $0x1] ss:$0 sm:$0xff] }
0x173d   :  { %v5201_v51 = vpop.xlane.xlu0 %5200  ;;  %5227 = vadd.xlane.f32.xlu1 %v5226_v9 }
0x173e   :  { %v5207_v62 = vmul.f32 0.03125, %v5201_v51  ;;  %v5217_v7 = vmul.f32 %v9521_v31, %v9521_v31  ;;  %v5218_v63 = vmul.f32 %v9523_v15, %v9523_v15 }
0x1740   :  { %v9530_v3 = vsub.f32 %v5179_v52, %v5207_v62  ;;  %v5229_v22 = vsel %vm267_vm9, %v5217_v7, 0.0  ;;  %v5232_v24 = vsel %vm267_vm9, %v5218_v63, 0.0  ;;  %v6191_v62 = vld [vmem:[%s8864_s19 + $0x38] sm:$0xff]  ;;  %v6181_v63 = vld [vmem:[%s8906_s18 + $0x1] ss:$0 sm:$0xff] }
0x1741   :  { %5230 = vadd.xlane.f32.xlu0 %v5229_v22  ;;  %5233 = vadd.xlane.f32.xlu1 %v5232_v24 }
0x1742   :  { %v5219_v25 = vmul.f32 %v9530_v3, %v9530_v3 }
0x1744   :  { %v5235_v5 = vsel %vm267_vm9, %v5219_v25, 0.0 }
0x1745   :  { %5236 = vadd.xlane.f32.xlu0 %v5235_v5 }
0x17c5   :  { %v5225_v57 = vpop.xlane.xlu0 %5224 }
0x17c6   :  { %v5239_v38 = vmul.f32 0.03125, %v5225_v57  ;;  %v5222_v43 = vpop.xlane.xlu1 %5221 }
0x17c7   :  { %v5238_v14 = vmul.f32 0.03125, %v5222_v43 }
0x17c8   :  { %v5245_v26 = vadd.f32 1e-05, %v5239_v38 }
0x17c9   :  { %v5244_v60 = vadd.f32 1e-05, %v5238_v14 }
0x17ca   :  { %8047 = vrsqrt.f32 %v5245_v26  ;;  %v5228_v45 = vpop.xlane.xlu1 %5227  ;;  %v6193_v26 = vld [vmem:[%s8918_s5 + $0x1] ss:$0 sm:$0xff] }
0x17cb   :  { %8049 = vrsqrt.f32 %v5244_v60  ;;  %v5240_v49 = vmul.f32 0.03125, %v5228_v45 }
0x17cd   :  { %v5246_v23 = vadd.f32 1e-05, %v5240_v49 }
0x17ce   :  { %v5231_v27 = vpop.xlane.xlu0 %5230  ;;  %v5234_v16 = vpop.xlane.xlu1 %5233 }
0x17cf   :  { %8051 = vrsqrt.f32 %v5246_v23  ;;  %v5241_v34 = vmul.f32 0.03125, %v5231_v27  ;;  %v5242_v42 = vmul.f32 0.03125, %v5234_v16 }
0x17d1   :  { %v5247_v50 = vadd.f32 1e-05, %v5241_v34  ;;  %v5248_v37 = vadd.f32 1e-05, %v5242_v42 }
0x17d2   :  { %v5237_v39 = vpop.xlane.xlu0 %5236 }
0x17d3   :  { %8053 = vrsqrt.f32 %v5247_v50  ;;  %v5243_v33 = vmul.f32 0.03125, %v5237_v39 }
0x17d4   :  { %v8048_v61 = vpop.eup %8047  ;;  %8055 = vrsqrt.f32 %v5248_v37 }
0x17d5   :  { %v8050_v52 = vpop.eup %8049  ;;  %v5257_v32 = vmul.f32 %v8048_v61, %v9507_v30  ;;  %v5249_v35 = vadd.f32 1e-05, %v5243_v33 }
0x17d6   :  { %v5256_v12 = vmul.f32 %v8050_v52, %v9509_v41 }
0x17d7   :  { %v5269_v56 = vmul.f32 %v6174_v10, %v5257_v32  ;;  %8057 = vrsqrt.f32 %v5249_v35 }
0x17d8   :  { %v5268_v4 = vmul.f32 %v6174_v10, %v5256_v12 }
0x17d9   :  { %v8052_v6 = vpop.eup %8051  ;;  %v9551_v53 = vadd.f32 %v6175_v55, %v5269_v56 }
0x17da   :  { %v9548_v54 = vadd.f32 %v6175_v55, %v5268_v4  ;;  %v5258_v28 = vmul.f32 %v8052_v6, %v9516_v2 }
0x17dc   :  { %7119 = vmatprep.mubr.msk.f32.mxu1 %vm267_vm9, %v9548_v54  ;;  %v5270_v29 = vmul.f32 %v6174_v10, %v5258_v28 }
0x17dd   :  { %v8054_v59 = vpop.eup %8053  ;;  %7120 = vmatmul.mubr.msk.f32.vlgmr.msra.gmra.mrb[74].mxu1 %vm267_vm9, %v9551_v53 }
0x17de   :  { %v8056_v30 = vpop.eup %8055  ;;  %v5282_v41 = vadd.f32 %v6175_v55, %v5270_v29  ;;  %v5259_v11 = vmul.f32 %v8054_v59, %v9521_v31 }
0x17df   :  { %v5260_v8 = vmul.f32 %v8056_v30, %v9523_v15  ;;  %v6190_v15 = vld [vmem:[%s8864_s19 + $0x30] sm:$0xff]  ;;  %s8130_s19 = smov 34  }
0x17e0   :  { %7122 = vmatprep.mubr.msk.f32.mxu1 %vm267_vm9, %v5282_v41  ;;  %v5271_v2 = vmul.f32 %v6174_v10, %v5259_v11  ;;  %v7477_v7 = vpack.c.bf16 %v6191_v62, %v6190_v15  ;;  %v9594_v15 = vld [vmem:[%s8972_s27 + $0x1] ss:$0 sm:$0xff]  ;;  %s5913_s18 = sld [smem:[%s9673_s0 + %s8130_s19]]  }
0x17e1   :  { %v8058_v13 = vpop.eup %8057  ;;  %v5272_v46 = vmul.f32 %v6174_v10, %v5260_v8 }
0x17e2   :  { %v9560_v48 = vadd.f32 %v6175_v55, %v5271_v2  ;;  %v5261_v44 = vmul.f32 %v8058_v13, %v9530_v3  ;;  %7478 = vmatprep.subr.bf16.mxu0 %v7477_v7 }
0x17e3   :  { %v9563_v9 = vadd.f32 %v6175_v55, %v5272_v46  ;;  %7480 = vmatpush3.bf16.msra.mxu0 %v7477_v7 }
0x17e4   :  { %7123 = vmatmul.mubr.msk.f32.gmra.mrb[76].mxu1 %vm267_vm9, %v9560_v48  ;;  %v5273_v51 = vmul.f32 %v6174_v10, %v5261_v44 }
0x17e5   :  { %7125 = vmatprep.mubr.msk.f32.mxu1 %vm267_vm9, %v9563_v9 }
0x17e6   :  { %v5285_v31 = vadd.f32 %v6175_v55, %v5273_v51  ;;  %v9591_v51 = vld [vmem:[%s8967_s12 + $0x1] ss:$0 sm:$0xff] }
0x17e8   :  { %7126 = vmatmul.mubr.msk.f32.gmra.mrb[78].mxu1 %vm267_vm9, %v5285_v31 }
0x17e9   :  { %7153 = vmatprep.mubr.msk.f32.mxu1 %vm8085_vm0, %v8083_v0 }
0x18b0   :  { %v7121_v3 = vpop.f32.mrb[74].mxu1 }
0x18b1   :  { %v5389_v22 = vadd.f32 %v7121_v3, %v6181_v63  ;;  %v5383_v24 = vpop.f32.mrb[75].mxu1 }
0x18b2   :  { %v5384_v25 = vadd.f32 %v6181_v63, %v5383_v24 }
0x18b3   :  { %v5413_v40 = vmax.f32 %v5389_v22, 0.0 }
0x18b4   :  { %v5412_v5 = vmax.f32 %v5384_v25, 0.0 }
0x18b6   :  { %7136 = vmatprep.mubr.msk.f32.mxu0 %vm267_vm9, %v5412_v5 }
0x18b7   :  { %v7124_v47 = vpop.f32.mrb[76].mxu1  ;;  %7137 = vmatmul.mubr.msk.f32.vlgmr.msra.gmra.mrb[78].mxu0 %vm267_vm9, %v5413_v40 }
0x18b8   :  { %v5399_v18 = vadd.f32 %v7124_v47, %v6181_v63  ;;  %v5393_v17 = vpop.f32.mrb[77].mxu1 }
0x18b9   :  { %v5394_v19 = vadd.f32 %v6181_v63, %v5393_v17 }
0x18ba   :  { %v5415_v21 = vmax.f32 %v5399_v18, 0.0 }
0x18bb   :  { %v5414_v58 = vmax.f32 %v5394_v19, 0.0  ;;  %v7127_v36 = vpop.f32.mrb[78].mxu1 }
0x18bc   :  { %v5409_v20 = vadd.f32 %v7127_v36, %v6181_v63  ;;  %v5403_v57 = vpop.f32.mrb[79].mxu1 }
0x18bd   :  { %v5404_v38 = vadd.f32 %v6181_v63, %v5403_v57  ;;  %7139 = vmatprep.mubr.msk.f32.mxu0 %vm267_vm9, %v5414_v58 }
0x18be   :  { %7140 = vmatmul.mubr.msk.f32.gmra.mrb[80].mxu0 %vm267_vm9, %v5415_v21  ;;  %v5417_v14 = vmax.f32 %v5409_v20, 0.0 }
0x18bf   :  { %v5416_v43 = vmax.f32 %v5404_v38, 0.0 }
0x18c1   :  { %7142 = vmatprep.mubr.msk.f32.mxu0 %vm267_vm9, %v5416_v43 }
0x18c2   :  { %7143 = vmatmul.mubr.msk.f32.gmra.mrb[82].mxu0 %vm267_vm9, %v5417_v14 }
0x198a   :  { %v7138_v60 = vpop.f32.mrb[78].mxu0 }
0x198b   :  { %v9582_v45 = vadd.f32 %v7138_v60, %v6193_v26  ;;  %v5515_v49 = vpop.f32.mrb[79].mxu0 }
0x198c   :  { %v5516_v23 = vadd.f32 %v6193_v26, %v5515_v49 }
0x198d   :  { %v5545_v14 = vadd.f32 %v9582_v45, %v9551_v53 }
0x198e   :  { %v5544_v18 = vadd.f32 %v5516_v23, %v9548_v54 }
0x1990   :  { %v5554_v58 = vsel %vm267_vm9, %v5544_v18, 0.0 }
0x1991   :  { %v7141_v27 = vpop.f32.mrb[80].mxu0 }
0x1992   :  { %v5531_v16 = vadd.f32 %v7141_v27, %v6193_v26  ;;  %v5525_v34 = vpop.f32.mrb[81].mxu0 }
0x1993   :  { %v5526_v42 = vadd.f32 %v6193_v26, %v5525_v34  ;;  %v5557_v34 = vsel %vm267_vm9, %v5545_v14, 0.0 }
0x1994   :  { %v5547_v19 = vadd.f32 %v5531_v16, %v9560_v48 }
0x1995   :  { %v5546_v50 = vadd.f32 %v5526_v42, %v5282_v41  ;;  %v7144_v37 = vpop.f32.mrb[82].mxu0 }
0x1996   :  { %v5541_v39 = vadd.f32 %v7144_v37, %v6193_v26  ;;  %v5535_v33 = vpop.f32.mrb[83].mxu0  ;;  %v5563_v36 = vsel %vm267_vm9, %v5547_v19, 0.0  ;;  %v5700_v37 = vld [vmem:[%s5910_s16 + $0x8] sm:$0xff] }
0x1997   :  { %v9584_v61 = vadd.f32 %v6193_v26, %v5535_v33  ;;  %v5560_v10 = vsel %vm267_vm9, %v5546_v50, 0.0  ;;  %v5701_v33 = vld [vmem:[%s5910_s16 + $0x10] sm:$0xff] }
0x1998   :  { %v5549_v52 = vadd.f32 %v5541_v39, %v5285_v31  ;;  %5561 = vadd.xlane.f32.xlu0 %v5560_v10 }
0x1999   :  { %v5548_v27 = vadd.f32 %v9584_v61, %v9563_v9  ;;  %v5699_v9 = vld [vmem:[%s5910_s16] sm:$0xff]  ;;  %v5702_v61 = vld [vmem:[%s5910_s16 + $0x18] sm:$0xff] }
0x199a   :  { %v5569_v32 = vsel %vm267_vm9, %v5549_v52, 0.0  ;;  %v7482_v39 = vpack.c.bf16 %v5700_v37, %v5699_v9  ;;  %v7485_v10 = vpack.c.bf16 %v5702_v61, %v5701_v33 }
0x199b   :  { %5570 = vadd.xlane.f32.xlu1 %v5569_v32 }
0x199c   :  { %7483 = vmatpush3.bf16.msra.mxu1 %v7482_v39 }
0x199d   :  { %7484 = vmatprep.subr.bf16.mxu1 %v8087_v1 }
0x19a0   :  { %7486 = vmatpush3.bf16.msra.mxu1 %v7485_v10 }
0x19a1   :  { %7487 = vmatprep.subr.bf16.mxu1 %v8087_v1 }
0x1a25   :  { %v5562_v35 = vpop.xlane.xlu0 %5561 }
0x1a26   :  { %v5574_v12 = vmul.f32 0.03125, %v5562_v35 }
0x1a28   :  { %v5580_v55 = vsub.f32 %v5546_v50, %v5574_v12  ;;  %v5571_v56 = vpop.xlane.xlu1 %5570  ;;  %v5566_v50 = vsel %vm267_vm9, %v5548_v27, 0.0 }
0x1a29   :  { %v5577_v4 = vmul.f32 0.03125, %v5571_v56 }
0x1a2a   :  { %v5586_v6 = vmul.f32 %v5580_v55, %v5580_v55 }
0x1a2b   :  { %v5583_v28 = vsub.f32 %v5549_v52, %v5577_v4 }
0x1a2c   :  { %v5596_v29 = vsel %vm267_vm9, %v5586_v6, 0.0 }
0x1a2d   :  { %5597 = vadd.xlane.f32.xlu0 %v5596_v29  ;;  %v5589_v59 = vmul.f32 %v5583_v28, %v5583_v28 }
0x1a2f   :  { %v5605_v30 = vsel %vm267_vm9, %v5589_v59, 0.0 }
0x1a30   :  { %5606 = vadd.xlane.f32.xlu1 %v5605_v30 }
0x1aba   :  { %v5598_v41 = vpop.xlane.xlu0 %5597 }
0x1abb   :  { %v5610_v11 = vmul.f32 0.03125, %v5598_v41 }
0x1abd   :  { %v5616_v8 = vadd.f32 1e-05, %v5610_v11  ;;  %v5607_v2 = vpop.xlane.xlu1 %5606 }
0x1abe   :  { %v5613_v13 = vmul.f32 0.03125, %v5607_v2 }
0x1abf   :  { %8059 = vrsqrt.f32 %v5616_v8 }
0x1ac0   :  { %v5619_v46 = vadd.f32 1e-05, %v5613_v13 }
0x1ac2   :  { %8061 = vrsqrt.f32 %v5619_v46 }
0x1ac9   :  { %v8060_v44 = vpop.eup %8059 }
0x1aca   :  { %v5628_v31 = vmul.f32 %v8060_v44, %v5580_v55 }
0x1acc   :  { %v8062_v62 = vpop.eup %8061  ;;  %v5640_v7 = vmul.f32 %v9591_v51, %v5628_v31  ;;  %v6204_v31 = vld [vmem:[%s5908_s24] ss:$0 sm:$0xff] }
0x1acd   :  { %v5631_v63 = vmul.f32 %v8062_v62, %v5583_v28 }
0x1ace   :  { %v5652_v3 = vadd.f32 %v9594_v15, %v5640_v7 }
0x1acf   :  { %v5643_v22 = vmul.f32 %v9591_v51, %v5631_v63  ;;  %v6205_v63 = vld [vmem:[%s5909_s1] ss:$0 sm:$0xff] }
0x1ad0   :  { %5658 = vst.msk [vmem:[#allocation2 + $0x10] sm:$0xff] %vm267_vm9, %v5652_v3 }
0x1ad1   :  { %v5655_v24 = vadd.f32 %v9594_v15, %v5643_v22 }
0x1ad3   :  { %5661 = vst.msk [vmem:[#allocation2 + $0x28] sm:$0xff] %vm267_vm9, %v5655_v24 }
0x1ad7   :  { %v5662_v40 = vld [vmem:[#allocation2 + $0x16] sm:$0x1] }
0x1ada   :  { %v5663_v25 = vld [vmem:[#allocation2 + $0x2e] sm:$0x1] }
0x1adb   :  { %v5665_v5 = vrot.slane %v5663_v25, 7 }
0x1add   :  { %v5668_v47 = vsel %vm5667_vm2, %v5662_v40, %v5665_v5 }
0x1ade   :  { %v5672_v17 = vsel %vm5671_vm3, %v5668_v47, 0.0 }
0x1adf   :  { %5673 = vadd.xlane.f32.xlu1 %v5672_v17 }
0x1ae3   :  { %5555 = vadd.xlane.f32.xlu1 %v5554_v58  ;;  %v5784_v58 = vld [vmem:[%s5912_s11] sm:$0xff] }
0x1ae7   :  { %5564 = vadd.xlane.f32.xlu1 %v5563_v36  ;;  %v5785_v36 = vld [vmem:[%s5912_s11 + $0x8] sm:$0xff] }
0x1b6c   :  { %v5674_v21 = vpop.xlane.xlu1 %5673 }
0x1b6d   :  { %v5675_v20 = vmul.f32 0.03125, %v5674_v21  ;;  %v5786_v21 = vld [vmem:[%s5912_s11 + $0x10] sm:$0xff] }
0x1b6f   :  { %v9607_v57 = vsub.f32 %v5668_v47, %v5675_v20  ;;  %v5787_v20 = vld [vmem:[%s5912_s11 + $0x18] sm:$0xff] }
0x1b70   :  { %v5556_v38 = vpop.xlane.xlu1 %5555 }
0x1b71   :  { %v5572_v43 = vmul.f32 0.03125, %v5556_v38  ;;  %v5677_v54 = vmul.f32 %v9607_v57, %v9607_v57  ;;  %v76_v38 = vstv %s5913_s18 }
0x1b72   :  { %77 = vst [vmem:[#allocation3] sm:$0x1] %v76_v38 }
0x1b73   :  { %v9613_v26 = vsub.f32 %v5544_v18, %v5572_v43  ;;  %v5678_v48 = vsel %vm5671_vm3, %v5677_v54, 0.0 }
0x1b74   :  { %5679 = vadd.xlane.f32.xlu0 %v5678_v48  ;;  %v5565_v60 = vpop.xlane.xlu1 %5564 }
0x1b75   :  { %v5575_v49 = vmul.f32 0.03125, %v5565_v60  ;;  %v5584_v23 = vmul.f32 %v9613_v26, %v9613_v26 }
0x1b77   :  { %v9620_v16 = vsub.f32 %v5547_v19, %v5575_v49  ;;  %v5590_v42 = vsel %vm267_vm9, %v5584_v23, 0.0 }
0x1b78   :  { %5558 = vadd.xlane.f32.xlu0 %v5557_v34  ;;  %5591 = vadd.xlane.f32.xlu1 %v5590_v42 }
0x1b79   :  { %v5587_v53 = vmul.f32 %v9620_v16, %v9620_v16  ;;  %v6208_v33 = vld [vmem:[#allocation3] ss:$0 sm:$0xff] }
0x1b7b   :  { %v5599_v45 = vsel %vm267_vm9, %v5587_v53, 0.0 }
0x1b7c   :  { %5600 = vadd.xlane.f32.xlu1 %v5599_v45  ;;  %5567 = vadd.xlane.f32.xlu0 %v5566_v50  ;;  %v6206_v45 = vld [vmem:[%s5911_s8] ss:$0 sm:$0xff] }
0x1c01   :  { %v5680_v52 = vpop.xlane.xlu0 %5679 }
0x1c02   :  { %v5681_v32 = vmul.f32 0.03125, %v5680_v52 }
0x1c04   :  { %v5682_v35 = vadd.f32 1e-05, %v5681_v32 }
0x1c05   :  { %v5559_v12 = vpop.xlane.xlu0 %5558  ;;  %v5592_v55 = vpop.xlane.xlu1 %5591 }
0x1c06   :  { %8063 = vrsqrt.f32 %v5682_v35  ;;  %v5573_v56 = vmul.f32 0.03125, %v5559_v12  ;;  %v5608_v4 = vmul.f32 0.03125, %v5592_v55 }
0x1c08   :  { %v5579_v6 = vsub.f32 %v5545_v14, %v5573_v56  ;;  %v5614_v28 = vadd.f32 1e-05, %v5608_v4 }
0x1c09   :  { %v5601_v29 = vpop.xlane.xlu1 %5600  ;;  %v5568_v59 = vpop.xlane.xlu0 %5567 }
0x1c0a   :  { %8065 = vrsqrt.f32 %v5614_v28  ;;  %v5611_v30 = vmul.f32 0.03125, %v5601_v29  ;;  %v5576_v41 = vmul.f32 0.03125, %v5568_v59  ;;  %v5585_v11 = vmul.f32 %v5579_v6, %v5579_v6 }
0x1c0c   :  { %v5617_v8 = vadd.f32 1e-05, %v5611_v30  ;;  %v5582_v2 = vsub.f32 %v5548_v27, %v5576_v41  ;;  %v5593_v13 = vsel %vm267_vm9, %v5585_v11, 0.0 }
0x1c0d   :  { %5594 = vadd.xlane.f32.xlu0 %v5593_v13 }
0x1c0e   :  { %8067 = vrsqrt.f32 %v5617_v8  ;;  %v5588_v46 = vmul.f32 %v5582_v2, %v5582_v2 }
0x1c10   :  { %v8064_v44 = vpop.eup %8063  ;;  %v5602_v62 = vsel %vm267_vm9, %v5588_v46, 0.0 }
0x1c11   :  { %v5684_v7 = vmul.f32 %v8064_v44, %v9607_v57  ;;  %5603 = vadd.xlane.f32.xlu0 %v5602_v62  ;;  %v7491_v57 = vpack.c.bf16 %v5787_v20, %v5786_v21 }
0x1c13   :  { %v5691_v3 = vmul.f32 %v6204_v31, %v5684_v7 }
0x1c14   :  { %v8066_v22 = vpop.eup %8065 }
0x1c15   :  { %v5698_v24 = vadd.f32 %v6205_v63, %v5691_v3  ;;  %v5626_v25 = vmul.f32 %v8066_v22, %v9613_v26 }
0x1c17   :  { %v5638_v5 = vmul.f32 %v9591_v51, %v5626_v25  ;;  %7154 = vmatmul.mubr.msk.f32.vlgmr.msra.gmra.mrb[80].mxu1 %vm267_vm9, %v5698_v24 }
0x1c18   :  { %v8068_v40 = vpop.eup %8067  ;;  %7164 = vmatprep.mubr.msk.f32.mxu1 %vm8085_vm0, %v8083_v0  ;;  %v7488_v0 = vpack.c.bf16 %v5785_v36, %v5784_v58  ;;  %vm5874_vm0 = vcmask 1024  }
0x1c19   :  { %v5650_v47 = vadd.f32 %v9594_v15, %v5638_v5  ;;  %v5629_v18 = vmul.f32 %v8068_v40, %v9620_v16 }
0x1c1a   :  { %7489 = vmatpush3.bf16.msra.mxu1 %v7488_v0 }
0x1c1b   :  { %5656 = vst.msk [vmem:[#allocation2] sm:$0xff] %vm267_vm9, %v5650_v47  ;;  %v5641_v17 = vmul.f32 %v9591_v51, %v5629_v18  ;;  %7490 = vmatprep.subr.bf16.mxu1 %v8087_v1 }
0x1c1d   :  { %v5653_v19 = vadd.f32 %v9594_v15, %v5641_v17 }
0x1c1e   :  { %7492 = vmatpush3.bf16.msra.mxu1 %v7491_v57 }
0x1c1f   :  { %5659 = vst.msk [vmem:[#allocation2 + $0x18] sm:$0xff] %vm267_vm9, %v5653_v19 }
0x1c9a   :  { %v5595_v43 = vpop.xlane.xlu0 %5594 }
0x1c9b   :  { %v5609_v54 = vmul.f32 0.03125, %v5595_v43 }
0x1c9d   :  { %v5615_v14 = vadd.f32 1e-05, %v5609_v54 }
0x1c9e   :  { %v5604_v26 = vpop.xlane.xlu0 %5603 }
0x1c9f   :  { %8069 = vrsqrt.f32 %v5615_v14  ;;  %v5612_v48 = vmul.f32 0.03125, %v5604_v26 }
0x1ca1   :  { %v5618_v60 = vadd.f32 1e-05, %v5612_v48 }
0x1ca3   :  { %8071 = vrsqrt.f32 %v5618_v60 }
0x1ca9   :  { %v8070_v1 = vpop.eup %8069 }
0x1caa   :  { %v5627_v49 = vmul.f32 %v8070_v1, %v5579_v6 }
0x1cac   :  { %v5639_v23 = vmul.f32 %v9591_v51, %v5627_v49 }
0x1cad   :  { %v8072_v27 = vpop.eup %8071 }
0x1cae   :  { %v5651_v16 = vadd.f32 %v9594_v15, %v5639_v23  ;;  %v5630_v34 = vmul.f32 %v8072_v27, %v5582_v2 }
0x1cb0   :  { %5657 = vst.msk [vmem:[#allocation2 + $0x8] sm:$0xff] %vm267_vm9, %v5651_v16  ;;  %v5642_v42 = vmul.f32 %v9591_v51, %v5630_v34 }
0x1cb2   :  { %v5654_v53 = vadd.f32 %v9594_v15, %v5642_v42 }
0x1cb4   :  { %5660 = vst.msk [vmem:[#allocation2 + $0x20] sm:$0xff] %vm267_vm9, %v5654_v53 }
0x1cea   :  { %v5779_v50 = vpop.f32.mrb[80].mxu1 }
0x1ceb   :  { %v5780_v9 = vadd.f32 %v6206_v45, %v5779_v50  ;;  %v7155_v37 = vpop.f32.mrb[81].mxu1 }
0x1ced   :  { %v5783_v39 = vmax.f32 %v5780_v9, 0.0 }
0x1cef   :  { %7165 = vmatmul.mubr.msk.f32.vlgmr.msra.gmra.mrb[82].mxu1 %vm267_vm9, %v5783_v39 }
0x1dc2   :  { %v5864_v61 = vpop.f32.mrb[82].mxu1 }
0x1dc3   :  { %v5865_v10 = vadd.f32 %v6208_v33, %v5864_v61  ;;  %v7166_v51 = vpop.f32.mrb[83].mxu1 }
0x1dc5   :  { %v6210_v52 = vmul.f32 -1.442695, %v5865_v10 }
0x1dc7   :  { %8073 = vpow2.f32 %v6210_v52 }
0x1dd1   :  { %v8074_v15 = vpop.eup %8073 }
0x1dd2   :  { %v5871_v32 = vadd.f32 1.0, %v8074_v15 }
0x1dd4   :  { %8075 = vrcp.f32 %v5871_v32 }
0x1dde   :  { %v8076_v35 = vpop.eup %8075 }
0x1ddf   :  { %5875 = vst.msk [vmem:[%s5914_s17] sm:$0x3] %vm5874_vm0, %v8076_v35 }

</bundles_post_ra>
